<compile_context>
chip_gen: v5e
topology: v5e:2x2
jax: 0.10.0
libtpu: 0.0.40
codegen_flags: <defaults>
</compile_context>

<pallas_src>
import functools
import math

import jax
import jax.numpy as jnp
from jax.experimental import pallas as pl

# ----------------------------- configuration --------------------------------
B = 2          # batch
N = 16         # num_nodes (adjacency is N x N)
T = 8          # num_timesteps
HID_S = 32     # spatial hidden dim
RANK_S = 8     # spatial rank
HID_T = 32     # temporal hidden dim
RANK_T = 8     # temporal rank
KSIZE = 3      # temporal conv kernel size
ORD1, ORD2, ORD3 = 3, 2, 2     # diffusion orders of SC1 / SC2 / SC3

BN = B * N
BT = B * T
L_VALID = T - KSIZE + 1        # valid temporal-conv length
K1 = KSIZE - 1

assert KSIZE <= T
# matches the reference zero-tail assembly: rows [0,K-1) fwd-only, [L,T) bwd-only
assert 2 * (KSIZE - 1) <= T, "bidirectional-conv overlap region is ill-formed"

_W_WIDTH = 6 * max(HID_T, RANK_T)        # 192 = widest packed block


def _build_wslab_layout():
    """Static (row0, rows, cols) layout of every block inside the packed weight slab."""
    layout = {}
    row = 0

    def add(name, h, w):
        nonlocal row
        assert w <= _W_WIDTH, (name, w)
        layout[name] = (row, h, w)
        row += ((h + 7) // 8) * 8        # keep every block sublane-aligned

    add("acat", 2 * BN, 2 * BN)          # folded block-diag diffusion matrix
    add("sc1_w", HID_S, (2 * ORD1 + 1) * T)
    add("sc1_b", HID_S, BN)
    add("sc2_w", RANK_S, (2 * ORD2 + 1) * HID_S)
    add("sc2_b", RANK_S, BN)
    add("sc3_w", HID_S, (2 * ORD3 + 1) * RANK_S)
    add("sc3_b", HID_S, BN)
    add("sg_w", 2 * T, HID_S)
    add("sg_b", 2 * T, BN)
    add("tc1_w", KSIZE * N, 6 * HID_T)
    add("tc1_b", BT, 6 * HID_T)
    add("tc2_w", KSIZE * HID_T, 6 * RANK_T)
    add("tc2_b", BT, 6 * RANK_T)
    add("tc3_w", KSIZE * RANK_T, 6 * HID_T)
    add("tc3_b", BT, 6 * HID_T)
    add("tg_w", HID_T, 2 * N)
    add("tg_b", BT, 2 * N)
    add("tmask_f", BT, HID_T)            # 1.0 where fwd conv output is valid
    add("tmask_b", BT, HID_T)            # 1.0 where (shifted) bwd conv output is valid
    return layout, ((row + 7) // 8) * 8


_W_LAYOUT, _W_ROWS = _build_wslab_layout()
_X_ROWS = T + BT                          # packed activations: rows [0,T) spatial, [T,T+BT) temporal


# ----------------------------- fused Pallas kernel ---------------------------
def _st_gau_kernel(x_ref, w_ref, out_ref):
    f32 = jnp.float32
    HIGHEST = jax.lax.Precision.HIGHEST

    def mm(a, b):                         # small f32 MXU matmul, full precision
        return jnp.dot(a, b, preferred_element_type=f32, precision=HIGHEST)

    def softplus(v):                      # numerically stable, VPU + EUP
        return jnp.maximum(v, 0.0) + jnp.log(1.0 + jnp.exp(-jnp.abs(v)))

    def wget(name):                       # static slice of the weight slab (free view)
        r0, h, w = _W_LAYOUT[name]
        return w_ref[r0:r0 + h, 0:w]

    def roll_up(x, j):                    # result[r] = x[(r + j) % rows]
        return x if j == 0 else jnp.concatenate([x[j:, :], x[:j, :]], axis=0)

    def roll_down(x, j):                  # result[r] = x[(r - j) % rows]
        n = x.shape[0]
        return x if j == 0 else jnp.concatenate([x[n - j:, :], x[:n - j, :]], axis=0)

    # ---------------- spatial branch: (channels, B*N) layout ----------------
    # acat = blockdiag(blockdiag_B(A_q^T), blockdiag_B(A_h^T)); the Chebyshev
    # recursion runs on the lane-concatenated state [x_q | x_h], so each diffusion
    # order is ONE matmul for both random-walk directions.
    acat = wget("acat")

    def dgcn(x, wname, bname, orders, relu):
        x0 = jnp.concatenate([x, x], axis=1)          # (cin, 2BN)
        x1 = mm(x0, acat)
        states = [x1]
        for _ in range(2, orders + 1):
            x2 = 2.0 * mm(x1, acat) - x0
            states.append(x2)
            x1, x0 = x2, x1
        stack = jnp.concatenate(                      # ((2*orders+1)*cin, BN)
            [x] + [s[:, 0:BN] for s in states] + [s[:, BN:2 * BN] for s in states],
            axis=0)
        out = mm(wget(wname), stack) + wget(bname)    # single packed theta matmul
        return jnp.maximum(out, 0.0) if relu else out

    xs = x_ref[0:T, :]                                # (T, BN)
    s1 = dgcn(xs, "sc1_w", "sc1_b", ORD1, True)       # (HID_S, BN)
    s2 = dgcn(s1, "sc2_w", "sc2_b", ORD2, False)      # (RANK_S, BN)
    s3 = dgcn(s2, "sc3_w", "sc3_b", ORD3, False)      # (HID_S, BN)
    zs = mm(wget("sg_w"), s3) + wget("sg_b")          # (2T, BN): rows [0,T)=loc, [T,2T)=scale

    # ---------------- temporal branch: (B*T, channels) layout ----------------
    mask_f = wget("tmask_f")                          # (BT, HID_T) of 0/1 (HID_T >= every cout)
    mask_b = wget("tmask_b")

    def btcn(x, wname, bname, cout, relu):
        im2col = jnp.concatenate(                     # (BT, KSIZE*cin)
            [roll_up(x, j) for j in range(KSIZE)], axis=1)
        z = mm(im2col, wget(wname)) + wget(bname)     # (BT, 6*cout)
        c2 = 2 * cout
        fused = z[:, 0:c2] * jax.nn.sigmoid(z[:, c2:2 * c2]) + z[:, 2 * c2:3 * c2]
        if relu:
            fused = jnp.maximum(fused, 0.0)           # relu(fwd) and relu(bwd) in one shot
        fwd = fused[:, 0:cout]                        # valid at local t in [0, L)
        bwd = roll_down(fused, K1)[:, cout:c2]        # row r now holds bwd[t - (K-1)]
        return fwd * mask_f[:, 0:cout] + bwd * mask_b[:, 0:cout]

    xt = x_ref[T:T + BT, 0:N]                         # (BT, N)
    t1 = btcn(xt, "tc1_w", "tc1_b", HID_T, True)
    t2 = btcn(t1, "tc2_w", "tc2_b", RANK_T, False)
    t3 = btcn(t2, "tc3_w", "tc3_b", HID_T, False)
    zt = mm(t3, wget("tg_w")) + wget("tg_b")          # (BT, 2N): cols [0,N)=loc, [N,2N)=scale

    # ---------------- fuse both Gaussian heads + final product ----------------
    # Reassemble the spatial head into the temporal (B*T, 2N) layout, softplus only
    # on the scale lanes via a lane mask, multiply, ONE full lane-packed store.
    zs_bt = jnp.concatenate(
        [jnp.concatenate([zs[0:T, bi * N:(bi + 1) * N],
                          zs[T:2 * T, bi * N:(bi + 1) * N]], axis=1)
         for bi in range(B)], axis=0)                 # (BT, 2N)
    lane = jax.lax.broadcasted_iota(jnp.int32, (BT, 2 * N), 1)

    def head_act(z):                                  # identity on loc lanes, softplus on scale lanes
        return jnp.where(lane < N, z, softplus(z))

    out_ref[...] = head_act(zt) * head_act(zs_bt)     # (BT, 2N) = [loc || scale]


# ----------------------------- host-side weight packing ----------------------
def pack_params(params, A_q, A_h):
    """Pack all weights/biases (biases pre-broadcast), the folded diffusion matrix
    and the conv validity masks into ONE f32 slab -> a single input DMA."""
    f32 = jnp.float32
    eyeB = jnp.eye(B, dtype=f32)
    blocks = {}

    acat = jnp.zeros((2 * BN, 2 * BN), f32)
    acat = acat.at[0:BN, 0:BN].set(jnp.kron(eyeB, A_q.T.astype(f32)))
    acat = acat.at[BN:, BN:].set(jnp.kron(eyeB, A_h.T.astype(f32)))
    blocks["acat"] = acat

    def pack_sc(name, p):                 # theta -> (cout, (2o+1)*cin), bias pre-broadcast
        k, cin, cout = p["theta"].shape
        blocks[name + "_w"] = jnp.transpose(p["theta"], (2, 0, 1)).reshape(cout, k * cin)
        blocks[name + "_b"] = jnp.broadcast_to(p["bias"].T, (cout, BN))

    def pack_tc(name, p):                 # taps -> (k*cin, 6*cout): [f_f|f_b|g_f|g_b|r_f|r_b]
        _, k, cin, cout = p["wf"].shape
        wcols, bcols = [], []
        for gi in range(3):               # f, g, r gates
            wcols.append(p["wf"][gi].reshape(k * cin, cout))            # forward taps
            wcols.append(p["wb"][gi][::-1].reshape(k * cin, cout))      # backward, taps pre-flipped
            bcols.append(jnp.broadcast_to(p["bf"][gi], (BT, cout)))
            bcols.append(jnp.broadcast_to(p["bb"][gi], (BT, cout)))
        blocks[name + "_w"] = jnp.concatenate(wcols, axis=1)
        blocks[name + "_b"] = jnp.concatenate(bcols, axis=1)

    pack_sc("sc1", params["SC1"]); pack_sc("sc2", params["SC2"]); pack_sc("sc3", params["SC3"])
    pack_tc("tc1", params["TC1"]); pack_tc("tc2", params["TC2"]); pack_tc("tc3", params["TC3"])

    sg = params["SGau"]
    blocks["sg_w"] = jnp.concatenate([sg["wl"].T, sg["ws"].T], axis=0)          # (2T, HID_S)
    blocks["sg_b"] = jnp.concatenate([jnp.broadcast_to(sg["bl"].T, (T, BN)),
                                      jnp.broadcast_to(sg["bs"].T, (T, BN))], axis=0)
    tg = params["TGau"]
    blocks["tg_w"] = jnp.concatenate([tg["wl"], tg["ws"]], axis=1)              # (HID_T, 2N)
    blocks["tg_b"] = jnp.concatenate([jnp.broadcast_to(tg["bl"], (BT, N)),
                                      jnp.broadcast_to(tg["bs"], (BT, N))], axis=1)

    t_local = jnp.arange(BT, dtype=jnp.int32) % T     # local time index per row
    blocks["tmask_f"] = jnp.broadcast_to((t_local < L_VALID).astype(f32)[:, None], (BT, HID_T))
    blocks["tmask_b"] = jnp.broadcast_to((t_local >= K1).astype(f32)[:, None], (BT, HID_T))

    slab = jnp.zeros((_W_ROWS, _W_WIDTH), f32)
    for name, (r0, h, w) in _W_LAYOUT.items():
        arr = blocks[name].astype(f32)
        assert arr.shape == (h, w), (name, arr.shape, (h, w))
        slab = slab.at[r0:r0 + h, 0:w].set(arr)
    return slab


# ----------------------------- ST_Gau forward --------------------------------
@jax.jit
def st_gau_forward(X, wslab):
    """X: (B, N, T, 1) -> (loc_res, scale_res), each (B, T, N)."""
    f32 = jnp.float32
    Xm = X[:, :, :, 0].astype(f32)
    xs = jnp.transpose(Xm, (2, 0, 1)).reshape(T, BN)       # spatial view (channels=T, B*N)
    xt = jnp.transpose(Xm, (0, 2, 1)).reshape(BT, N)       # temporal view (B*T, channels=N)
    xin = jnp.zeros((_X_ROWS, BN), f32)
    xin = xin.at[0:T, :].set(xs)
    xin = xin.at[T:T + BT, 0:N].set(xt)

    out = pl.pallas_call(                                  # grid-less: whole problem is one block
        _st_gau_kernel,
        out_shape=jax.ShapeDtypeStruct((BT, 2 * N), jnp.float32),
    )(xin, wslab)

    loc = out[:, 0:N].reshape(B, T, N)
    scale = out[:, N:2 * N].reshape(B, T, N)
    return loc, scale


# ----------------------------- parameter init (unpacked, torch-like) ----------
def init_params(key):
    keys = iter(jax.random.split(key, 64))

    def u(shape, bound):
        return jax.random.uniform(next(keys), shape, jnp.float32, -bound, bound)

    def dgcn_p(cin, cout, orders):
        k = 2 * orders + 1
        bound = 1.0 / math.sqrt(cout)
        return {"theta": u((k, cin, cout), bound), "bias": u((1, cout), bound)}

    def btcn_p(cin, cout, ksize):
        bound = 1.0 / math.sqrt(cin * ksize)
        return {"wf": u((3, ksize, cin, cout), bound), "bf": u((3, 1, cout), bound),
                "wb": u((3, ksize, cin, cout), bound), "bb": u((3, 1, cout), bound)}

    def gau_p(cin, cout):
        bound = 1.0 / math.sqrt(cin)
        return {"wl": u((cin, cout), bound), "bl": u((1, cout), bound),
                "ws": u((cin, cout), bound), "bs": u((1, cout), bound)}

    return {
        "SC1": dgcn_p(T, HID_S, ORD1),
        "SC2": dgcn_p(HID_S, RANK_S, ORD2),
        "SC3": dgcn_p(RANK_S, HID_S, ORD3),
        "SGau": gau_p(HID_S, T),
        "TC1": btcn_p(N, HID_T, KSIZE),
        "TC2": btcn_p(HID_T, RANK_T, KSIZE),
        "TC3": btcn_p(RANK_T, HID_T, KSIZE),
        "TGau": gau_p(HID_T, N),
    }


# ----------------------------- pure-JAX reference (correctness check) ---------
_einsum = functools.partial(jnp.einsum, precision=jax.lax.Precision.HIGHEST)


def reference_forward(X, A_q, A_h, params):
    Xm = X[:, :, :, 0]
    X_T = jnp.transpose(Xm, (0, 2, 1))

    def dgcn(x, prm, orders, relu):
        theta, bias = prm["theta"], prm["bias"]
        acc = _einsum("bnc,cd->bnd", x, theta[0])
        idx = 1
        for A in (A_q, A_h):
            x0 = x
            x1 = _einsum("nm,bmc->bnc", A, x0)
            acc = acc + _einsum("bnc,cd->bnd", x1, theta[idx]); idx += 1
            for _ in range(2, orders + 1):
                x2 = 2.0 * _einsum("nm,bmc->bnc", A, x1) - x0
                acc = acc + _einsum("bnc,cd->bnd", x2, theta[idx]); idx += 1
                x1, x0 = x2, x1
        out = acc + bias
        return jnp.maximum(out, 0.0) if relu else out

    def btcn(x, prm, relu):
        k = KSIZE
        Lv = T - k + 1

        def tconv(xx, w, bb, i):
            acc = _einsum("blc,cd->bld", xx[:, 0:Lv, :], w[i, 0])
            for j in range(1, k):
                acc = acc + _einsum("blc,cd->bld", xx[:, j:j + Lv, :], w[i, j])
            return acc + bb[i]

        xb = x[:, ::-1, :]
        outf = (tconv(x, prm["wf"], prm["bf"], 0)
                * jax.nn.sigmoid(tconv(x, prm["wf"], prm["bf"], 1))
                + tconv(x, prm["wf"], prm["bf"], 2))
        outb = (tconv(xb, prm["wb"], prm["bb"], 0)
                * jax.nn.sigmoid(tconv(xb, prm["wb"], prm["bb"], 1))
                + tconv(xb, prm["wb"], prm["bb"], 2))
        if relu:
            outf = jnp.maximum(outf, 0.0)
            outb = jnp.maximum(outb, 0.0)
        pad = jnp.zeros((x.shape[0], k - 1, outf.shape[-1]), jnp.float32)
        yf = jnp.concatenate([outf, pad], axis=1)
        yb = jnp.concatenate([outb, pad], axis=1)
        return yf + yb[:, ::-1, :]

    def gau(x, prm):
        loc = _einsum("bpc,cd->bpd", x, prm["wl"]) + prm["bl"]
        s = _einsum("bpc,cd->bpd", x, prm["ws"]) + prm["bs"]
        scale = jnp.maximum(s, 0.0) + jnp.log(1.0 + jnp.exp(-jnp.abs(s)))
        return jnp.transpose(loc, (0, 2, 1)), jnp.transpose(scale, (0, 2, 1))

    X_t1 = btcn(X_T, params["TC1"], True)
    X_t2 = btcn(X_t1, params["TC2"], False)
    X_t3 = btcn(X_t2, params["TC3"], False)
    loc_t, scale_t = gau(X_t3, params["TGau"])

    X_s1 = dgcn(Xm, params["SC1"], ORD1, True)
    X_s2 = dgcn(X_s1, params["SC2"], ORD2, False)
    X_s3 = dgcn(X_s2, params["SC3"], ORD3, False)
    loc_s, scale_s = gau(X_s3, params["SGau"])

    loc_res = jnp.transpose(loc_t, (0, 2, 1)) * loc_s
    scale_res = jnp.transpose(scale_t, (0, 2, 1)) * scale_s
    return loc_res, scale_res


# ----------------------------------- main -------------------------------------
if __name__ == "__main__":
    key = jax.random.PRNGKey(0)
    k_x, k_adj, k_p = jax.random.split(key, 3)

    X = jax.random.normal(k_x, (B, N, T, 1), jnp.float32)
    adj = jax.random.uniform(k_adj, (N, N), jnp.float32, 0.0, 1.0)
    A_q = adj / jnp.sum(adj, axis=1, keepdims=True)        # forward random walk
    A_h = adj.T / jnp.sum(adj.T, axis=1, keepdims=True)    # backward random walk
    params = init_params(k_p)

    wslab = pack_params(params, A_q, A_h)                  # one-time host packing (1 operand)
    loc_res, scale_res = st_gau_forward(X, wslab)
    jax.block_until_ready((loc_res, scale_res))

    assert loc_res.shape == (B, T, N) and scale_res.shape == (B, T, N)
    assert bool(jnp.all(jnp.isfinite(loc_res))) and bool(jnp.all(jnp.isfinite(scale_res)))
    assert bool(jnp.all(scale_res >= 0.0))                 # softplus * softplus >= 0

    loc_ref, scale_ref = jax.jit(reference_forward)(X, A_q, A_h, params)
    assert bool(jnp.allclose(loc_res, loc_ref, rtol=1e-4, atol=1e-4)), \
        float(jnp.max(jnp.abs(loc_res - loc_ref)))
    assert bool(jnp.allclose(scale_res, scale_ref, rtol=1e-4, atol=1e-4)), \
        float(jnp.max(jnp.abs(scale_res - scale_ref)))

    print("KERNEL_OK")
</pallas_src>

<mosaic_0001>
module attributes {stable_mosaic.version = 11 : i64} {
  func.func @_st_gau_kernel(%arg0: memref<24x32xf32, #tpu.memory_space<vmem>>, %arg1: memref<536x192xf32, #tpu.memory_space<vmem>>, %arg2: memref<16x32xf32, #tpu.memory_space<vmem>>) attributes {dimension_semantics = [], scalar_prefetch = 0 : i64, scratch_operands = 0 : i64, tpu.core_type = #tpu.core_type<tc>} {
    %c0 = arith.constant 0 : index
    %c0_0 = arith.constant 0 : index
    %0 = vector.load %arg1[%c0, %c0_0] : memref<536x192xf32, #tpu.memory_space<vmem>>, vector<64x64xf32>
    %c0_1 = arith.constant 0 : index
    %c0_2 = arith.constant 0 : index
    %1 = vector.load %arg0[%c0_1, %c0_2] : memref<24x32xf32, #tpu.memory_space<vmem>>, vector<8x32xf32>
    %2 = tpu.concatenate %1, %1 in 1 : vector<8x32xf32>, vector<8x32xf32> -> vector<8x64xf32>
    %cst = arith.constant dense<0.000000e+00> : vector<8x64xf32>
    %3 = tpu.matmul %2, %0, %cst {dimension_numbers = #tpu.dot_dimension_numbers<[1], [0], [0], [1], [0, 0, 1, 1], [], []>, precision = #tpu.contract_precision<fp32>} : vector<8x64xf32>, vector<64x64xf32>, vector<8x64xf32> -> vector<8x64xf32>
    %cst_3 = arith.constant dense<0.000000e+00> : vector<8x64xf32>
    %4 = tpu.matmul %3, %0, %cst_3 {dimension_numbers = #tpu.dot_dimension_numbers<[1], [0], [0], [1], [0, 0, 1, 1], [], []>, precision = #tpu.contract_precision<fp32>} : vector<8x64xf32>, vector<64x64xf32>, vector<8x64xf32> -> vector<8x64xf32>
    %cst_4 = arith.constant 2.000000e+00 : f32
    %5 = vector.broadcast %cst_4 : f32 to vector<8x64xf32>
    %6 = arith.mulf %5, %4 : vector<8x64xf32>
    %7 = arith.subf %6, %2 : vector<8x64xf32>
    %cst_5 = arith.constant dense<0.000000e+00> : vector<8x64xf32>
    %8 = tpu.matmul %7, %0, %cst_5 {dimension_numbers = #tpu.dot_dimension_numbers<[1], [0], [0], [1], [0, 0, 1, 1], [], []>, precision = #tpu.contract_precision<fp32>} : vector<8x64xf32>, vector<64x64xf32>, vector<8x64xf32> -> vector<8x64xf32>
    %cst_6 = arith.constant 2.000000e+00 : f32
    %9 = vector.broadcast %cst_6 : f32 to vector<8x64xf32>
    %10 = arith.mulf %9, %8 : vector<8x64xf32>
    %11 = arith.subf %10, %3 : vector<8x64xf32>
    %12 = vector.extract_strided_slice %3 {offsets = [0, 0], sizes = [8, 32], strides = [1, 1]} : vector<8x64xf32> to vector<8x32xf32>
    %13 = vector.extract_strided_slice %7 {offsets = [0, 0], sizes = [8, 32], strides = [1, 1]} : vector<8x64xf32> to vector<8x32xf32>
    %14 = vector.extract_strided_slice %11 {offsets = [0, 0], sizes = [8, 32], strides = [1, 1]} : vector<8x64xf32> to vector<8x32xf32>
    %15 = vector.extract_strided_slice %3 {offsets = [0, 32], sizes = [8, 32], strides = [1, 1]} : vector<8x64xf32> to vector<8x32xf32>
    %16 = vector.extract_strided_slice %7 {offsets = [0, 32], sizes = [8, 32], strides = [1, 1]} : vector<8x64xf32> to vector<8x32xf32>
    %17 = vector.extract_strided_slice %11 {offsets = [0, 32], sizes = [8, 32], strides = [1, 1]} : vector<8x64xf32> to vector<8x32xf32>
    %18 = tpu.concatenate %1, %12, %13, %14, %15, %16, %17 in 0 : vector<8x32xf32>, vector<8x32xf32>, vector<8x32xf32>, vector<8x32xf32>, vector<8x32xf32>, vector<8x32xf32>, vector<8x32xf32> -> vector<56x32xf32>
    %c64 = arith.constant 64 : index
    %c0_7 = arith.constant 0 : index
    %19 = vector.load %arg1[%c64, %c0_7] : memref<536x192xf32, #tpu.memory_space<vmem>>, vector<32x56xf32>
    %cst_8 = arith.constant dense<0.000000e+00> : vector<32x32xf32>
    %20 = tpu.matmul %19, %18, %cst_8 {dimension_numbers = #tpu.dot_dimension_numbers<[1], [0], [0], [1], [0, 0, 1, 1], [], []>, precision = #tpu.contract_precision<fp32>} : vector<32x56xf32>, vector<56x32xf32>, vector<32x32xf32> -> vector<32x32xf32>
    %c96 = arith.constant 96 : index
    %c0_9 = arith.constant 0 : index
    %21 = vector.load %arg1[%c96, %c0_9] : memref<536x192xf32, #tpu.memory_space<vmem>>, vector<32x32xf32>
    %22 = arith.addf %20, %21 : vector<32x32xf32>
    %cst_10 = arith.constant 0.000000e+00 : f32
    %23 = vector.broadcast %cst_10 : f32 to vector<32x32xf32>
    %24 = arith.maximumf %22, %23 : vector<32x32xf32>
    %25 = tpu.concatenate %24, %24 in 1 : vector<32x32xf32>, vector<32x32xf32> -> vector<32x64xf32>
    %cst_11 = arith.constant dense<0.000000e+00> : vector<32x64xf32>
    %26 = tpu.matmul %25, %0, %cst_11 {dimension_numbers = #tpu.dot_dimension_numbers<[1], [0], [0], [1], [0, 0, 1, 1], [], []>, precision = #tpu.contract_precision<fp32>} : vector<32x64xf32>, vector<64x64xf32>, vector<32x64xf32> -> vector<32x64xf32>
    %cst_12 = arith.constant dense<0.000000e+00> : vector<32x64xf32>
    %27 = tpu.matmul %26, %0, %cst_12 {dimension_numbers = #tpu.dot_dimension_numbers<[1], [0], [0], [1], [0, 0, 1, 1], [], []>, precision = #tpu.contract_precision<fp32>} : vector<32x64xf32>, vector<64x64xf32>, vector<32x64xf32> -> vector<32x64xf32>
    %cst_13 = arith.constant 2.000000e+00 : f32
    %28 = vector.broadcast %cst_13 : f32 to vector<32x64xf32>
    %29 = arith.mulf %28, %27 : vector<32x64xf32>
    %30 = arith.subf %29, %25 : vector<32x64xf32>
    %31 = vector.extract_strided_slice %26 {offsets = [0, 0], sizes = [32, 32], strides = [1, 1]} : vector<32x64xf32> to vector<32x32xf32>
    %32 = vector.extract_strided_slice %30 {offsets = [0, 0], sizes = [32, 32], strides = [1, 1]} : vector<32x64xf32> to vector<32x32xf32>
    %33 = vector.extract_strided_slice %26 {offsets = [0, 32], sizes = [32, 32], strides = [1, 1]} : vector<32x64xf32> to vector<32x32xf32>
    %34 = vector.extract_strided_slice %30 {offsets = [0, 32], sizes = [32, 32], strides = [1, 1]} : vector<32x64xf32> to vector<32x32xf32>
    %35 = tpu.concatenate %24, %31, %32, %33, %34 in 0 : vector<32x32xf32>, vector<32x32xf32>, vector<32x32xf32>, vector<32x32xf32>, vector<32x32xf32> -> vector<160x32xf32>
    %c128 = arith.constant 128 : index
    %c0_14 = arith.constant 0 : index
    %36 = vector.load %arg1[%c128, %c0_14] : memref<536x192xf32, #tpu.memory_space<vmem>>, vector<8x160xf32>
    %cst_15 = arith.constant dense<0.000000e+00> : vector<8x32xf32>
    %37 = tpu.matmul %36, %35, %cst_15 {dimension_numbers = #tpu.dot_dimension_numbers<[1], [0], [0], [1], [0, 0, 1, 1], [], []>, precision = #tpu.contract_precision<fp32>} : vector<8x160xf32>, vector<160x32xf32>, vector<8x32xf32> -> vector<8x32xf32>
    %c136 = arith.constant 136 : index
    %c0_16 = arith.constant 0 : index
    %38 = vector.load %arg1[%c136, %c0_16] : memref<536x192xf32, #tpu.memory_space<vmem>>, vector<8x32xf32>
    %39 = arith.addf %37, %38 : vector<8x32xf32>
    %40 = tpu.concatenate %39, %39 in 1 : vector<8x32xf32>, vector<8x32xf32> -> vector<8x64xf32>
    %cst_17 = arith.constant dense<0.000000e+00> : vector<8x64xf32>
    %41 = tpu.matmul %40, %0, %cst_17 {dimension_numbers = #tpu.dot_dimension_numbers<[1], [0], [0], [1], [0, 0, 1, 1], [], []>, precision = #tpu.contract_precision<fp32>} : vector<8x64xf32>, vector<64x64xf32>, vector<8x64xf32> -> vector<8x64xf32>
    %cst_18 = arith.constant dense<0.000000e+00> : vector<8x64xf32>
    %42 = tpu.matmul %41, %0, %cst_18 {dimension_numbers = #tpu.dot_dimension_numbers<[1], [0], [0], [1], [0, 0, 1, 1], [], []>, precision = #tpu.contract_precision<fp32>} : vector<8x64xf32>, vector<64x64xf32>, vector<8x64xf32> -> vector<8x64xf32>
    %cst_19 = arith.constant 2.000000e+00 : f32
    %43 = vector.broadcast %cst_19 : f32 to vector<8x64xf32>
    %44 = arith.mulf %43, %42 : vector<8x64xf32>
    %45 = arith.subf %44, %40 : vector<8x64xf32>
    %46 = vector.extract_strided_slice %41 {offsets = [0, 0], sizes = [8, 32], strides = [1, 1]} : vector<8x64xf32> to vector<8x32xf32>
    %47 = vector.extract_strided_slice %45 {offsets = [0, 0], sizes = [8, 32], strides = [1, 1]} : vector<8x64xf32> to vector<8x32xf32>
    %48 = vector.extract_strided_slice %41 {offsets = [0, 32], sizes = [8, 32], strides = [1, 1]} : vector<8x64xf32> to vector<8x32xf32>
    %49 = vector.extract_strided_slice %45 {offsets = [0, 32], sizes = [8, 32], strides = [1, 1]} : vector<8x64xf32> to vector<8x32xf32>
    %50 = tpu.concatenate %39, %46, %47, %48, %49 in 0 : vector<8x32xf32>, vector<8x32xf32>, vector<8x32xf32>, vector<8x32xf32>, vector<8x32xf32> -> vector<40x32xf32>
    %c144 = arith.constant 144 : index
    %c0_20 = arith.constant 0 : index
    %51 = vector.load %arg1[%c144, %c0_20] : memref<536x192xf32, #tpu.memory_space<vmem>>, vector<32x40xf32>
    %cst_21 = arith.constant dense<0.000000e+00> : vector<32x32xf32>
    %52 = tpu.matmul %51, %50, %cst_21 {dimension_numbers = #tpu.dot_dimension_numbers<[1], [0], [0], [1], [0, 0, 1, 1], [], []>, precision = #tpu.contract_precision<fp32>} : vector<32x40xf32>, vector<40x32xf32>, vector<32x32xf32> -> vector<32x32xf32>
    %c176 = arith.constant 176 : index
    %c0_22 = arith.constant 0 : index
    %53 = vector.load %arg1[%c176, %c0_22] : memref<536x192xf32, #tpu.memory_space<vmem>>, vector<32x32xf32>
    %54 = arith.addf %52, %53 : vector<32x32xf32>
    %c208 = arith.constant 208 : index
    %c0_23 = arith.constant 0 : index
    %55 = vector.load %arg1[%c208, %c0_23] : memref<536x192xf32, #tpu.memory_space<vmem>>, vector<16x32xf32>
    %cst_24 = arith.constant dense<0.000000e+00> : vector<16x32xf32>
    %56 = tpu.matmul %55, %54, %cst_24 {dimension_numbers = #tpu.dot_dimension_numbers<[1], [0], [0], [1], [0, 0, 1, 1], [], []>, precision = #tpu.contract_precision<fp32>} : vector<16x32xf32>, vector<32x32xf32>, vector<16x32xf32> -> vector<16x32xf32>
    %c224 = arith.constant 224 : index
    %c0_25 = arith.constant 0 : index
    %57 = vector.load %arg1[%c224, %c0_25] : memref<536x192xf32, #tpu.memory_space<vmem>>, vector<16x32xf32>
    %58 = arith.addf %56, %57 : vector<16x32xf32>
    %c504 = arith.constant 504 : index
    %c0_26 = arith.constant 0 : index
    %59 = vector.load %arg1[%c504, %c0_26] : memref<536x192xf32, #tpu.memory_space<vmem>>, vector<16x32xf32>
    %c520 = arith.constant 520 : index
    %c0_27 = arith.constant 0 : index
    %60 = vector.load %arg1[%c520, %c0_27] : memref<536x192xf32, #tpu.memory_space<vmem>>, vector<16x32xf32>
    %c8 = arith.constant 8 : index
    %c0_28 = arith.constant 0 : index
    %61 = vector.load %arg0[%c8, %c0_28] : memref<24x32xf32, #tpu.memory_space<vmem>>, vector<16x16xf32>
    %62 = vector.extract_strided_slice %61 {offsets = [1, 0], sizes = [15, 16], strides = [1, 1]} : vector<16x16xf32> to vector<15x16xf32>
    %63 = vector.extract_strided_slice %61 {offsets = [0, 0], sizes = [1, 16], strides = [1, 1]} : vector<16x16xf32> to vector<1x16xf32>
    %64 = tpu.concatenate %62, %63 in 0 : vector<15x16xf32>, vector<1x16xf32> -> vector<16x16xf32>
    %65 = vector.extract_strided_slice %61 {offsets = [2, 0], sizes = [14, 16], strides = [1, 1]} : vector<16x16xf32> to vector<14x16xf32>
    %66 = vector.extract_strided_slice %61 {offsets = [0, 0], sizes = [2, 16], strides = [1, 1]} : vector<16x16xf32> to vector<2x16xf32>
    %67 = tpu.concatenate %65, %66 in 0 : vector<14x16xf32>, vector<2x16xf32> -> vector<16x16xf32>
    %68 = tpu.concatenate %61, %64, %67 in 1 : vector<16x16xf32>, vector<16x16xf32>, vector<16x16xf32> -> vector<16x48xf32>
    %c240 = arith.constant 240 : index
    %c0_29 = arith.constant 0 : index
    %69 = vector.load %arg1[%c240, %c0_29] : memref<536x192xf32, #tpu.memory_space<vmem>>, vector<48x192xf32>
    %cst_30 = arith.constant dense<0.000000e+00> : vector<16x192xf32>
    %70 = tpu.matmul %68, %69, %cst_30 {dimension_numbers = #tpu.dot_dimension_numbers<[1], [0], [0], [1], [0, 0, 1, 1], [], []>, precision = #tpu.contract_precision<fp32>} : vector<16x48xf32>, vector<48x192xf32>, vector<16x192xf32> -> vector<16x192xf32>
    %c288 = arith.constant 288 : index
    %c0_31 = arith.constant 0 : index
    %71 = vector.load %arg1[%c288, %c0_31] : memref<536x192xf32, #tpu.memory_space<vmem>>, vector<16x192xf32>
    %72 = arith.addf %70, %71 : vector<16x192xf32>
    %73 = vector.extract_strided_slice %72 {offsets = [0, 0], sizes = [16, 64], strides = [1, 1]} : vector<16x192xf32> to vector<16x64xf32>
    %74 = vector.extract_strided_slice %72 {offsets = [0, 64], sizes = [16, 64], strides = [1, 1]} : vector<16x192xf32> to vector<16x64xf32>
    %75 = arith.negf %74 : vector<16x64xf32>
    %76 = math.exp %75 : vector<16x64xf32>
    %cst_32 = arith.constant 1.000000e+00 : f32
    %77 = vector.broadcast %cst_32 : f32 to vector<16x64xf32>
    %78 = arith.addf %77, %76 : vector<16x64xf32>
    %79 = arith.divf %77, %78 : vector<16x64xf32>
    %80 = arith.mulf %73, %79 : vector<16x64xf32>
    %81 = vector.extract_strided_slice %72 {offsets = [0, 128], sizes = [16, 64], strides = [1, 1]} : vector<16x192xf32> to vector<16x64xf32>
    %82 = arith.addf %80, %81 : vector<16x64xf32>
    %cst_33 = arith.constant 0.000000e+00 : f32
    %83 = vector.broadcast %cst_33 : f32 to vector<16x64xf32>
    %84 = arith.maximumf %82, %83 : vector<16x64xf32>
    %85 = vector.extract_strided_slice %84 {offsets = [0, 0], sizes = [16, 32], strides = [1, 1]} : vector<16x64xf32> to vector<16x32xf32>
    %86 = vector.extract_strided_slice %84 {offsets = [14, 0], sizes = [2, 64], strides = [1, 1]} : vector<16x64xf32> to vector<2x64xf32>
    %87 = vector.extract_strided_slice %84 {offsets = [0, 0], sizes = [14, 64], strides = [1, 1]} : vector<16x64xf32> to vector<14x64xf32>
    %88 = tpu.concatenate %86, %87 in 0 : vector<2x64xf32>, vector<14x64xf32> -> vector<16x64xf32>
    %89 = vector.extract_strided_slice %88 {offsets = [0, 32], sizes = [16, 32], strides = [1, 1]} : vector<16x64xf32> to vector<16x32xf32>
    %90 = arith.mulf %85, %59 : vector<16x32xf32>
    %91 = arith.mulf %89, %60 : vector<16x32xf32>
    %92 = arith.addf %90, %91 : vector<16x32xf32>
    %93 = vector.extract_strided_slice %92 {offsets = [1, 0], sizes = [15, 32], strides = [1, 1]} : vector<16x32xf32> to vector<15x32xf32>
    %94 = vector.extract_strided_slice %92 {offsets = [0, 0], sizes = [1, 32], strides = [1, 1]} : vector<16x32xf32> to vector<1x32xf32>
    %95 = tpu.concatenate %93, %94 in 0 : vector<15x32xf32>, vector<1x32xf32> -> vector<16x32xf32>
    %96 = vector.extract_strided_slice %92 {offsets = [2, 0], sizes = [14, 32], strides = [1, 1]} : vector<16x32xf32> to vector<14x32xf32>
    %97 = vector.extract_strided_slice %92 {offsets = [0, 0], sizes = [2, 32], strides = [1, 1]} : vector<16x32xf32> to vector<2x32xf32>
    %98 = tpu.concatenate %96, %97 in 0 : vector<14x32xf32>, vector<2x32xf32> -> vector<16x32xf32>
    %99 = tpu.concatenate %92, %95, %98 in 1 : vector<16x32xf32>, vector<16x32xf32>, vector<16x32xf32> -> vector<16x96xf32>
    %c304 = arith.constant 304 : index
    %c0_34 = arith.constant 0 : index
    %100 = vector.load %arg1[%c304, %c0_34] : memref<536x192xf32, #tpu.memory_space<vmem>>, vector<96x48xf32>
    %cst_35 = arith.constant dense<0.000000e+00> : vector<16x48xf32>
    %101 = tpu.matmul %99, %100, %cst_35 {dimension_numbers = #tpu.dot_dimension_numbers<[1], [0], [0], [1], [0, 0, 1, 1], [], []>, precision = #tpu.contract_precision<fp32>} : vector<16x96xf32>, vector<96x48xf32>, vector<16x48xf32> -> vector<16x48xf32>
    %c400 = arith.constant 400 : index
    %c0_36 = arith.constant 0 : index
    %102 = vector.load %arg1[%c400, %c0_36] : memref<536x192xf32, #tpu.memory_space<vmem>>, vector<16x48xf32>
    %103 = arith.addf %101, %102 : vector<16x48xf32>
    %104 = vector.extract_strided_slice %103 {offsets = [0, 0], sizes = [16, 16], strides = [1, 1]} : vector<16x48xf32> to vector<16x16xf32>
    %105 = vector.extract_strided_slice %103 {offsets = [0, 16], sizes = [16, 16], strides = [1, 1]} : vector<16x48xf32> to vector<16x16xf32>
    %106 = arith.negf %105 : vector<16x16xf32>
    %107 = math.exp %106 : vector<16x16xf32>
    %cst_37 = arith.constant 1.000000e+00 : f32
    %108 = vector.broadcast %cst_37 : f32 to vector<16x16xf32>
    %109 = arith.addf %108, %107 : vector<16x16xf32>
    %110 = arith.divf %108, %109 : vector<16x16xf32>
    %111 = arith.mulf %104, %110 : vector<16x16xf32>
    %112 = vector.extract_strided_slice %103 {offsets = [0, 32], sizes = [16, 16], strides = [1, 1]} : vector<16x48xf32> to vector<16x16xf32>
    %113 = arith.addf %111, %112 : vector<16x16xf32>
    %114 = vector.extract_strided_slice %113 {offsets = [0, 0], sizes = [16, 8], strides = [1, 1]} : vector<16x16xf32> to vector<16x8xf32>
    %115 = vector.extract_strided_slice %113 {offsets = [14, 0], sizes = [2, 16], strides = [1, 1]} : vector<16x16xf32> to vector<2x16xf32>
    %116 = vector.extract_strided_slice %113 {offsets = [0, 0], sizes = [14, 16], strides = [1, 1]} : vector<16x16xf32> to vector<14x16xf32>
    %117 = tpu.concatenate %115, %116 in 0 : vector<2x16xf32>, vector<14x16xf32> -> vector<16x16xf32>
    %118 = vector.extract_strided_slice %117 {offsets = [0, 8], sizes = [16, 8], strides = [1, 1]} : vector<16x16xf32> to vector<16x8xf32>
    %119 = vector.extract_strided_slice %59 {offsets = [0, 0], sizes = [16, 8], strides = [1, 1]} : vector<16x32xf32> to vector<16x8xf32>
    %120 = arith.mulf %114, %119 : vector<16x8xf32>
    %121 = vector.extract_strided_slice %60 {offsets = [0, 0], sizes = [16, 8], strides = [1, 1]} : vector<16x32xf32> to vector<16x8xf32>
    %122 = arith.mulf %118, %121 : vector<16x8xf32>
    %123 = arith.addf %120, %122 : vector<16x8xf32>
    %124 = vector.extract_strided_slice %123 {offsets = [1, 0], sizes = [15, 8], strides = [1, 1]} : vector<16x8xf32> to vector<15x8xf32>
    %125 = vector.extract_strided_slice %123 {offsets = [0, 0], sizes = [1, 8], strides = [1, 1]} : vector<16x8xf32> to vector<1x8xf32>
    %126 = tpu.concatenate %124, %125 in 0 : vector<15x8xf32>, vector<1x8xf32> -> vector<16x8xf32>
    %127 = vector.extract_strided_slice %123 {offsets = [2, 0], sizes = [14, 8], strides = [1, 1]} : vector<16x8xf32> to vector<14x8xf32>
    %128 = vector.extract_strided_slice %123 {offsets = [0, 0], sizes = [2, 8], strides = [1, 1]} : vector<16x8xf32> to vector<2x8xf32>
    %129 = tpu.concatenate %127, %128 in 0 : vector<14x8xf32>, vector<2x8xf32> -> vector<16x8xf32>
    %130 = tpu.concatenate %123, %126, %129 in 1 : vector<16x8xf32>, vector<16x8xf32>, vector<16x8xf32> -> vector<16x24xf32>
    %c416 = arith.constant 416 : index
    %c0_38 = arith.constant 0 : index
    %131 = vector.load %arg1[%c416, %c0_38] : memref<536x192xf32, #tpu.memory_space<vmem>>, vector<24x192xf32>
    %cst_39 = arith.constant dense<0.000000e+00> : vector<16x192xf32>
    %132 = tpu.matmul %130, %131, %cst_39 {dimension_numbers = #tpu.dot_dimension_numbers<[1], [0], [0], [1], [0, 0, 1, 1], [], []>, precision = #tpu.contract_precision<fp32>} : vector<16x24xf32>, vector<24x192xf32>, vector<16x192xf32> -> vector<16x192xf32>
    %c440 = arith.constant 440 : index
    %c0_40 = arith.constant 0 : index
    %133 = vector.load %arg1[%c440, %c0_40] : memref<536x192xf32, #tpu.memory_space<vmem>>, vector<16x192xf32>
    %134 = arith.addf %132, %133 : vector<16x192xf32>
    %135 = vector.extract_strided_slice %134 {offsets = [0, 0], sizes = [16, 64], strides = [1, 1]} : vector<16x192xf32> to vector<16x64xf32>
    %136 = vector.extract_strided_slice %134 {offsets = [0, 64], sizes = [16, 64], strides = [1, 1]} : vector<16x192xf32> to vector<16x64xf32>
    %137 = arith.negf %136 : vector<16x64xf32>
    %138 = math.exp %137 : vector<16x64xf32>
    %cst_41 = arith.constant 1.000000e+00 : f32
    %139 = vector.broadcast %cst_41 : f32 to vector<16x64xf32>
    %140 = arith.addf %139, %138 : vector<16x64xf32>
    %141 = arith.divf %139, %140 : vector<16x64xf32>
    %142 = arith.mulf %135, %141 : vector<16x64xf32>
    %143 = vector.extract_strided_slice %134 {offsets = [0, 128], sizes = [16, 64], strides = [1, 1]} : vector<16x192xf32> to vector<16x64xf32>
    %144 = arith.addf %142, %143 : vector<16x64xf32>
    %145 = vector.extract_strided_slice %144 {offsets = [0, 0], sizes = [16, 32], strides = [1, 1]} : vector<16x64xf32> to vector<16x32xf32>
    %146 = vector.extract_strided_slice %144 {offsets = [14, 0], sizes = [2, 64], strides = [1, 1]} : vector<16x64xf32> to vector<2x64xf32>
    %147 = vector.extract_strided_slice %144 {offsets = [0, 0], sizes = [14, 64], strides = [1, 1]} : vector<16x64xf32> to vector<14x64xf32>
    %148 = tpu.concatenate %146, %147 in 0 : vector<2x64xf32>, vector<14x64xf32> -> vector<16x64xf32>
    %149 = vector.extract_strided_slice %148 {offsets = [0, 32], sizes = [16, 32], strides = [1, 1]} : vector<16x64xf32> to vector<16x32xf32>
    %150 = arith.mulf %145, %59 : vector<16x32xf32>
    %151 = arith.mulf %149, %60 : vector<16x32xf32>
    %152 = arith.addf %150, %151 : vector<16x32xf32>
    %c456 = arith.constant 456 : index
    %c0_42 = arith.constant 0 : index
    %153 = vector.load %arg1[%c456, %c0_42] : memref<536x192xf32, #tpu.memory_space<vmem>>, vector<32x32xf32>
    %cst_43 = arith.constant dense<0.000000e+00> : vector<16x32xf32>
    %154 = tpu.matmul %152, %153, %cst_43 {dimension_numbers = #tpu.dot_dimension_numbers<[1], [0], [0], [1], [0, 0, 1, 1], [], []>, precision = #tpu.contract_precision<fp32>} : vector<16x32xf32>, vector<32x32xf32>, vector<16x32xf32> -> vector<16x32xf32>
    %c488 = arith.constant 488 : index
    %c0_44 = arith.constant 0 : index
    %155 = vector.load %arg1[%c488, %c0_44] : memref<536x192xf32, #tpu.memory_space<vmem>>, vector<16x32xf32>
    %156 = arith.addf %154, %155 : vector<16x32xf32>
    %157 = vector.extract_strided_slice %58 {offsets = [0, 0], sizes = [8, 16], strides = [1, 1]} : vector<16x32xf32> to vector<8x16xf32>
    %158 = vector.extract_strided_slice %58 {offsets = [8, 0], sizes = [8, 16], strides = [1, 1]} : vector<16x32xf32> to vector<8x16xf32>
    %159 = tpu.concatenate %157, %158 in 1 : vector<8x16xf32>, vector<8x16xf32> -> vector<8x32xf32>
    %160 = vector.extract_strided_slice %58 {offsets = [0, 16], sizes = [8, 16], strides = [1, 1]} : vector<16x32xf32> to vector<8x16xf32>
    %161 = vector.extract_strided_slice %58 {offsets = [8, 16], sizes = [8, 16], strides = [1, 1]} : vector<16x32xf32> to vector<8x16xf32>
    %162 = tpu.concatenate %160, %161 in 1 : vector<8x16xf32>, vector<8x16xf32> -> vector<8x32xf32>
    %163 = tpu.concatenate %159, %162 in 0 : vector<8x32xf32>, vector<8x32xf32> -> vector<16x32xf32>
    %164 = tpu.iota {dimensions = array<i32: 1>} : vector<16x32xi32>
    %c16_i32 = arith.constant 16 : i32
    %165 = vector.broadcast %c16_i32 : i32 to vector<16x32xi32>
    %166 = arith.cmpi slt, %164, %165 : vector<16x32xi32>
    %cst_45 = arith.constant 0.000000e+00 : f32
    %167 = vector.broadcast %cst_45 : f32 to vector<16x32xf32>
    %168 = arith.maximumf %156, %167 : vector<16x32xf32>
    %169 = math.absf %156 : vector<16x32xf32>
    %cst_46 = arith.constant 0.000000e+00 : f32
    %170 = vector.broadcast %cst_46 : f32 to vector<16x32xf32>
    %171 = arith.subf %170, %169 : vector<16x32xf32>
    %172 = math.exp %171 : vector<16x32xf32>
    %cst_47 = arith.constant 1.000000e+00 : f32
    %173 = vector.broadcast %cst_47 : f32 to vector<16x32xf32>
    %174 = arith.addf %173, %172 : vector<16x32xf32>
    %175 = math.log %174 : vector<16x32xf32>
    %176 = arith.addf %168, %175 : vector<16x32xf32>
    %177 = arith.select %166, %156, %176 : vector<16x32xi1>, vector<16x32xf32>
    %c16_i32_48 = arith.constant 16 : i32
    %178 = vector.broadcast %c16_i32_48 : i32 to vector<16x32xi32>
    %179 = arith.cmpi slt, %164, %178 : vector<16x32xi32>
    %cst_49 = arith.constant 0.000000e+00 : f32
    %180 = vector.broadcast %cst_49 : f32 to vector<16x32xf32>
    %181 = arith.maximumf %163, %180 : vector<16x32xf32>
    %182 = math.absf %163 : vector<16x32xf32>
    %cst_50 = arith.constant 0.000000e+00 : f32
    %183 = vector.broadcast %cst_50 : f32 to vector<16x32xf32>
    %184 = arith.subf %183, %182 : vector<16x32xf32>
    %185 = math.exp %184 : vector<16x32xf32>
    %cst_51 = arith.constant 1.000000e+00 : f32
    %186 = vector.broadcast %cst_51 : f32 to vector<16x32xf32>
    %187 = arith.addf %186, %185 : vector<16x32xf32>
    %188 = math.log %187 : vector<16x32xf32>
    %189 = arith.addf %181, %188 : vector<16x32xf32>
    %190 = arith.select %179, %163, %189 : vector<16x32xi1>, vector<16x32xf32>
    %191 = arith.mulf %177, %190 : vector<16x32xf32>
    %c0_52 = arith.constant 0 : index
    %c0_53 = arith.constant 0 : index
    %192 = vector.load %arg2[%c0_52, %c0_53] : memref<16x32xf32, #tpu.memory_space<vmem>>, vector<16x32xf32>
    tpu.vector_store %arg2[%c0_52, %c0_53], %191 {strides = array<i32>} : memref<16x32xf32, #tpu.memory_space<vmem>>, vector<16x32xf32>,
    return
  }
}

</mosaic_0001>

<bundles_post_ra>
// kernel: st_gau_forward.1
= control target key start
LH: loop header
LB: loop body
LE: loop exit
PB: predicated region body
PF: predicated region fallthrough
CT: control target
= control target key end

     0   :  { %s5372_s11 = smov 32   ;;  %vm24_vm0 = vcmask 261120   ;;  %vm26_vm1 = vcmask 523264   ;;  %s5373_s28 = smov 96   ;;  %vm769_vm2 = vcmask 457728   ;;  %vm2877_vm3 = vcmask 326656   ;;  %s7211_s0 = inlined_call_operand.vmem [shape: f32[24,32], index: 0, kind: input, shape index: {}]   ;;  %s7212_s1 = inlined_call_operand.vmem [shape: f32[536,192], index: 1, kind: input, shape index: {}]   ;;  %s7213_s2 = inlined_call_operand.vmem [shape: f32[16,32], index: 2, kind: output, shape index: {}]  }
   0x1   :  { %v5397_v0 = vld [vmem:[%s7211_s0] sm:$0xff]  ;;  %v18_v1 = vld [vmem:[%s7212_s1 + $0x70] sm:$0xff]  ;;  %vm3415_vm4 = vcmask 1046528   ;;  %vm3422_vm5 = vcmask 1045504   ;;  %s5374_s9 = smov 16   ;;  %vm3443_vm6 = vcmask 130048  }
   0x2   :  { %21 = vrot.lane.b32.xlu0 %v5397_v0, %s5372_s11  ;;  %v17_v2 = vld [vmem:[%s7212_s1 + $0x60] sm:$0xff]  ;;  %v16_v3 = vld [vmem:[%s7212_s1 + $0x50] sm:$0xff]  ;;  %v5410_v4 = vand.u32 4294901760, %v18_v1  ;;  %vm3464_vm7 = vcmask 392192   ;;  %s5375_s3 = smov 64   ;;  %s5376_s17 = smov 8  }
   0x3   :  { %v5412_v5 = vand.u32 4294901760, %v17_v2  ;;  %v5414_v6 = vand.u32 4294901760, %v16_v3  ;;  %v15_v7 = vld [vmem:[%s7212_s1 + $0x40] sm:$0xff]  ;;  %v14_v8 = vld [vmem:[%s7212_s1 + $0x30] sm:$0xff]  ;;  %s5377_s18 = smov 112   ;;  %s5378_s19 = smov 120  }
   0x4   :  { %v13_v9 = vld [vmem:[%s7212_s1 + $0x20] sm:$0xff]  ;;  %v5425_v10 = vand.u32 4294901760, %v15_v7  ;;  %v5427_v11 = vand.u32 4294901760, %v14_v8  ;;  %v12_v13 = vld [vmem:[%s7212_s1 + $0x10] sm:$0xff]  ;;  %v5438_v15 = vsub.f32 %v18_v1, %v5410_v4  ;;  %39 = vmatpush.msra.mxu0 %v5410_v4  ;;  %171 = vmatpush.msra.mxu3 %v5410_v4 }
   0x5   :  { %v5429_v12 = vand.u32 4294901760, %v13_v9  ;;  %v11_v14 = vld [vmem:[%s7212_s1] sm:$0xff]  ;;  %v5441_v16 = vsub.f32 %v17_v2, %v5412_v5  ;;  %v5444_v17 = vsub.f32 %v16_v3, %v5414_v6  ;;  %v5448_v18 = vand.u32 4294901760, %v12_v13 }
   0x6   :  { %v5451_v19 = vsub.f32 %v15_v7, %v5425_v10  ;;  %v5454_v20 = vsub.f32 %v14_v8, %v5427_v11  ;;  %v5460_v22 = vand.u32 4294901760, %v5438_v15  ;;  %134 = vmatpush.msra.mxu2 %v5438_v15  ;;  %41 = vmatpush.msra.mxu0 %v5412_v5  ;;  %v5470_v25 = vand.u32 4294901760, %v11_v14 }
   0x7   :  { %7265 = vst [vmem:[#allocation2_spill] sm:$0xff] %v5429_v12  ;;  %v5457_v21 = vsub.f32 %v13_v9, %v5429_v12  ;;  %v5463_v23 = vand.u32 4294901760, %v5441_v16  ;;  %v5466_v24 = vand.u32 4294901760, %v5444_v17  ;;  %v5476_v27 = vsub.f32 %v12_v13, %v5448_v18  ;;  %173 = vmatpush.msra.mxu3 %v5412_v5 }
   0x8   :  { %7266 = vst [vmem:[#allocation3_spill] sm:$0xff] %v5448_v18  ;;  %v5473_v26 = vand.u32 4294901760, %v5451_v19  ;;  %v74_v28 = vsub.f32 %v5438_v15, %v5460_v22  ;;  %v5486_v31 = vand.u32 4294901760, %v5454_v20  ;;  %137 = vmatpush.msra.mxu2 %v5441_v16  ;;  %43 = vmatpush.msra.mxu0 %v5414_v6  ;;  %v5503_v36 = vsub.f32 %v11_v14, %v5470_v25 }
   0x9   :  { %7267 = vst [vmem:[#allocation4_spill] sm:$0xff] %v5460_v22  ;;  %v80_v29 = vsub.f32 %v5441_v16, %v5463_v23  ;;  %v86_v30 = vsub.f32 %v5444_v17, %v5466_v24  ;;  %v5491_v32 = vand.u32 4294901760, %v5457_v21  ;;  %175 = vmatpush.msra.mxu3 %v5414_v6  ;;  %v5512_v39 = vand.u32 4294901760, %v5476_v27 }
   0xa   :  { %7268 = vst [vmem:[#allocation5_spill] sm:$0xff] %v5463_v23  ;;  %v5494_v33 = vand.u32 4294901760, %v74_v28  ;;  %v92_v35 = vsub.f32 %v5451_v19, %v5473_v26  ;;  %140 = vmatpush.msra.mxu2 %v5444_v17  ;;  %45 = vmatpush.msra.mxu0 %v5425_v10  ;;  %v98_v38 = vsub.f32 %v5454_v20, %v5486_v31  ;;  %v5523_v42 = vand.u32 4294901760, %v5503_v36 }
   0xb   :  { %7269 = vst [vmem:[#allocation6_spill] sm:$0xff] %v5466_v24  ;;  %v5496_v34 = vand.u32 4294901760, %v80_v29  ;;  %177 = vmatpush.msra.mxu3 %v5425_v10  ;;  %v5507_v37 = vand.u32 4294901760, %v86_v30  ;;  %v104_v41 = vsub.f32 %v5457_v21, %v5491_v32  ;;  %v110_v44 = vsub.f32 %v5476_v27, %v5512_v39 }
   0xc   :  { %7270 = vst [vmem:[#allocation7_spill] sm:$0xff] %v5470_v25  ;;  %76 = vmatpush.msra.mxu1 %v5494_v33  ;;  %143 = vmatpush.msra.mxu2 %v5451_v19  ;;  %v5518_v40 = vand.u32 4294901760, %v92_v35  ;;  %v5529_v43 = vand.u32 4294901760, %v98_v38  ;;  %v116_v46 = vsub.f32 %v5503_v36, %v5523_v42 }
   0xd   :  { %7271 = vst [vmem:[#allocation8_spill] sm:$0xff] %v5473_v26  ;;  %47 = vmatpush.msra.mxu0 %v5427_v11  ;;  %179 = vmatpush.msra.mxu3 %v5427_v11  ;;  %v5537_v45 = vand.u32 4294901760, %v104_v41  ;;  %v5545_v47 = vand.u32 4294901760, %v110_v44 }
   0xe   :  { %7272 = vst [vmem:[#allocation9_spill] sm:$0xff] %v5476_v27  ;;  %82 = vmatpush.msra.mxu1 %v5496_v34  ;;  %146 = vmatpush.msra.mxu2 %v5454_v20  ;;  %v5551_v48 = vand.u32 4294901760, %v116_v46 }
   0xf   :  { %7273 = vst [vmem:[#allocation10_spill] sm:$0xff] %v5486_v31  ;;  %49 = vmatpush.msra.mxu0 %v5429_v12  ;;  %181 = vmatpush.msra.mxu3 %v5429_v12 }
  0x10   :  { %7274 = vst [vmem:[#allocation11_spill] sm:$0xff] %v5491_v32  ;;  %88 = vmatpush.msra.mxu1 %v5507_v37  ;;  %149 = vmatpush.msra.mxu2 %v5457_v21 }
  0x11   :  { %7275 = vst [vmem:[#allocation12_spill] sm:$0xff] %v5496_v34  ;;  %51 = vmatpush.msra.mxu0 %v5448_v18  ;;  %183 = vmatpush.msra.mxu3 %v5448_v18 }
  0x12   :  { %7276 = vst [vmem:[#allocation13_spill] sm:$0xff] %v5503_v36  ;;  %94 = vmatpush.msra.mxu1 %v5518_v40  ;;  %152 = vmatpush.msra.mxu2 %v5476_v27 }
  0x13   :  { %7277 = vst [vmem:[#allocation14_spill] sm:$0xff] %v5507_v37  ;;  %53 = vmatpush.msra.mxu0 %v5470_v25  ;;  %185 = vmatpush.msra.mxu3 %v5470_v25 }
  0x14   :  { %7278 = vst [vmem:[#allocation15_spill] sm:$0xff] %v5512_v39  ;;  %100 = vmatpush.msra.mxu1 %v5529_v43  ;;  %155 = vmatpush.msra.mxu2 %v5503_v36 }
  0x15   :  { %7279 = vst [vmem:[#allocation16_spill] sm:$0xff] %v5518_v40  ;;  %204 = vmatpush.msrb.mxu0 %v5460_v22  ;;  %316 = vmatpush.msrb.mxu3 %v5494_v33 }
  0x16   :  { %7280 = vst [vmem:[#allocation17_spill] sm:$0xff] %v5523_v42  ;;  %106 = vmatpush.msra.mxu1 %v5537_v45  ;;  %279 = vmatpush.msrb.mxu2 %v5410_v4 }
  0x17   :  { %7281 = vst [vmem:[#allocation18_spill] sm:$0xff] %v5529_v43  ;;  %208 = vmatpush.msrb.mxu0 %v5463_v23  ;;  %322 = vmatpush.msrb.mxu3 %v5496_v34 }
  0x18   :  { %7282 = vst [vmem:[#allocation19_spill] sm:$0xff] %v5537_v45  ;;  %112 = vmatpush.msra.mxu1 %v5545_v47  ;;  %281 = vmatpush.msrb.mxu2 %v5412_v5 }
  0x19   :  { %7283 = vst [vmem:[#allocation20_spill] sm:$0xff] %v5545_v47  ;;  %212 = vmatpush.msrb.mxu0 %v5466_v24  ;;  %328 = vmatpush.msrb.mxu3 %v5507_v37 }
  0x1a   :  { %7284 = vst [vmem:[#allocation21_spill] sm:$0xff] %v5551_v48  ;;  %118 = vmatpush.msra.mxu1 %v5551_v48  ;;  %283 = vmatpush.msrb.mxu2 %v5414_v6 }
  0x1b   :  { %216 = vmatpush.msrb.mxu0 %v5473_v26  ;;  %334 = vmatpush.msrb.mxu3 %v5518_v40 }
  0x1c   :  { %247 = vmatpush.msrb.mxu1 %v5410_v4  ;;  %285 = vmatpush.msrb.mxu2 %v5425_v10 }
  0x1d   :  { %220 = vmatpush.msrb.mxu0 %v5486_v31  ;;  %340 = vmatpush.msrb.mxu3 %v5529_v43 }
  0x1e   :  { %249 = vmatpush.msrb.mxu1 %v5412_v5  ;;  %287 = vmatpush.msrb.mxu2 %v5427_v11 }
  0x1f   :  { %224 = vmatpush.msrb.mxu0 %v5491_v32  ;;  %346 = vmatpush.msrb.mxu3 %v5537_v45 }
  0x20   :  { %251 = vmatpush.msrb.mxu1 %v5414_v6  ;;  %289 = vmatpush.msrb.mxu2 %v5429_v12 }
  0x21   :  { %228 = vmatpush.msrb.mxu0 %v5512_v39  ;;  %352 = vmatpush.msrb.mxu3 %v5545_v47 }
  0x22   :  { %253 = vmatpush.msrb.mxu1 %v5425_v10  ;;  %291 = vmatpush.msrb.mxu2 %v5448_v18 }
  0x23   :  { %232 = vmatpush.msrb.mxu0 %v5523_v42  ;;  %358 = vmatpush.msrb.mxu3 %v5551_v48 }
  0x24   :  { %255 = vmatpush.msrb.mxu1 %v5427_v11  ;;  %293 = vmatpush.msrb.mxu2 %v5470_v25 }
  0x26   :  { %257 = vmatpush.msrb.mxu1 %v5429_v12 }
  0x28   :  { %259 = vmatpush.msrb.mxu1 %v5448_v18 }
  0x2a   :  { %261 = vmatpush.msrb.mxu1 %v5470_v25 }
  0x74   :  { %v22_v49 = vpop.permute.xlu0 %21 }
  0x75   :  { %v5587_v50 = vsel %vm24_vm0, %v5397_v0, %v22_v49 }
  0x76   :  { %v28_v51 = vsel %vm26_vm1, %v5587_v50, 0 }
  0x77   :  { %v54_v52 = vand.u32 4294901760, %v28_v51 }
  0x79   :  { %v55_v53 = vsub.f32 %v28_v51, %v54_v52  ;;  %120 = vmatmul.f32.vlgmr.msra.gmra.mxu1 %v54_v52 }
  0x7a   :  { %411 = vmatpush.msra.mxu1 %v5410_v4 }
  0x7b   :  { %158 = vmatmul.f32.vlgmr.msra.gmra.mxu2 %v55_v53  ;;  %v56_v54 = vand.u32 4294901760, %v55_v53 }
  0x7c   :  { %413 = vmatpush.msra.mxu1 %v5412_v5  ;;  %444 = vmatpush.msra.mxu2 %v5460_v22 }
  0x7d   :  { %189 = vmatmul.f32.vlgmr.msra.gmra.mxu3 %v56_v54  ;;  %v57_v55 = vsub.f32 %v55_v53, %v56_v54 }
  0x7e   :  { %415 = vmatpush.msra.mxu1 %v5414_v6  ;;  %487 = vmatpush.msra.mxu3 %v5410_v4 }
  0x7f   :  { %v58_v56 = vand.u32 4294901760, %v57_v55  ;;  %448 = vmatpush.msra.mxu2 %v5463_v23 }
  0x80   :  { %417 = vmatpush.msra.mxu1 %v5425_v10  ;;  %489 = vmatpush.msra.mxu3 %v5412_v5 }
  0x81   :  { %59 = vmatmul.f32.vlgmr.msra.gmra.mxu0 %v58_v56  ;;  %263 = vmatmul.f32.vlgmr.msrb.gmra.mxu1 %v54_v52 }
  0x82   :  { %374 = vmatpush.msra.mxu0 %v5438_v15  ;;  %419 = vmatpush.msra.mxu1 %v5427_v11 }
  0x83   :  { %491 = vmatpush.msra.mxu3 %v5414_v6  ;;  %452 = vmatpush.msra.mxu2 %v5466_v24 }
  0x84   :  { %377 = vmatpush.msra.mxu0 %v5441_v16  ;;  %421 = vmatpush.msra.mxu1 %v5429_v12 }
  0x85   :  { %493 = vmatpush.msra.mxu3 %v5425_v10  ;;  %456 = vmatpush.msra.mxu2 %v5473_v26 }
  0x86   :  { %380 = vmatpush.msra.mxu0 %v5444_v17  ;;  %423 = vmatpush.msra.mxu1 %v5448_v18 }
  0x87   :  { %495 = vmatpush.msra.mxu3 %v5427_v11  ;;  %460 = vmatpush.msra.mxu2 %v5486_v31 }
  0x88   :  { %383 = vmatpush.msra.mxu0 %v5451_v19  ;;  %425 = vmatpush.msra.mxu1 %v5470_v25 }
  0x89   :  { %234 = vmatmul.f32.vlgmr.msrb.gmra.mxu0 %v54_v52  ;;  %497 = vmatpush.msra.mxu3 %v5429_v12 }
  0x8a   :  { %386 = vmatpush.msra.mxu0 %v5454_v20  ;;  %464 = vmatpush.msra.mxu2 %v5491_v32 }
  0x8b   :  { %499 = vmatpush.msra.mxu3 %v5448_v18  ;;  %558 = vmatpush.msrb.mxu1 %v5494_v33 }
  0x8c   :  { %389 = vmatpush.msra.mxu0 %v5457_v21  ;;  %468 = vmatpush.msra.mxu2 %v5512_v39 }
  0x8d   :  { %501 = vmatpush.msra.mxu3 %v5470_v25  ;;  %564 = vmatpush.msrb.mxu1 %v5496_v34 }
  0x8e   :  { %392 = vmatpush.msra.mxu0 %v5476_v27  ;;  %472 = vmatpush.msra.mxu2 %v5523_v42 }
  0x8f   :  { %570 = vmatpush.msrb.mxu1 %v5507_v37 }
  0x90   :  { %395 = vmatpush.msra.mxu0 %v5503_v36 }
  0x91   :  { %576 = vmatpush.msrb.mxu1 %v5518_v40 }
  0x92   :  { %521 = vmatpush.msrb.mxu0 %v5410_v4 }
  0x93   :  { %582 = vmatpush.msrb.mxu1 %v5529_v43 }
  0x94   :  { %523 = vmatpush.msrb.mxu0 %v5412_v5 }
  0x95   :  { %588 = vmatpush.msrb.mxu1 %v5537_v45 }
  0x96   :  { %525 = vmatpush.msrb.mxu0 %v5414_v6 }
  0x97   :  { %594 = vmatpush.msrb.mxu1 %v5545_v47 }
  0x98   :  { %527 = vmatpush.msrb.mxu0 %v5425_v10 }
  0x99   :  { %600 = vmatpush.msrb.mxu1 %v5551_v48 }
  0x9a   :  { %529 = vmatpush.msrb.mxu0 %v5427_v11 }
  0x9c   :  { %531 = vmatpush.msrb.mxu0 %v5429_v12 }
  0x9e   :  { %533 = vmatpush.msrb.mxu0 %v5448_v18 }
  0xa0   :  { %535 = vmatpush.msrb.mxu0 %v5470_v25 }
  0xf6   :  { %v121_v57 = vpop.f32.mrf.mxu1 }
  0xfe   :  { %v60_v58 = vpop.f32.mrf.mxu0  ;;  %v159_v60 = vpop.f32.mrf.mxu2 }
  0xff   :  { %v122_v59 = vadd.f32 %v121_v57, %v60_v58  ;;  %v264_v3 = vpop.f32.mrf.mxu1 }
 0x100   :  { %v190_v62 = vpop.f32.mrf.mxu3 }
 0x101   :  { %v160_v61 = vadd.f32 %v159_v60, %v122_v59 }
 0x103   :  { %v191_v63 = vadd.f32 %v190_v62, %v160_v61 }
 0x106   :  { %v235_v1 = vpop.f32.mrf.mxu0 }
 0x107   :  { %v236_v2 = vadd.f32 %v235_v1, %v191_v63 }
 0x109   :  { %v5639_v7 = vadd.f32 %v264_v3, %v236_v2 }
 0x10b   :  { %v268_v8 = vsel %vm26_vm1, %v5639_v7, 0 }
 0x10c   :  { %v294_v9 = vand.u32 4294901760, %v268_v8 }
 0x10e   :  { %360 = vmatmul.f32.vlgmr.msrb.gmra.mxu3 %v294_v9  ;;  %v295_v13 = vsub.f32 %v268_v8, %v294_v9 }
 0x10f   :  { %653 = vmatpush.msrb.mxu3 %v5410_v4 }
 0x110   :  { %398 = vmatmul.f32.vlgmr.msra.gmra.mxu0 %v295_v13  ;;  %v296_v14 = vand.u32 4294901760, %v295_v13 }
 0x111   :  { %655 = vmatpush.msrb.mxu3 %v5412_v5  ;;  %686 = vmatpush.msra.mxu0 %v5460_v22 }
 0x112   :  { %429 = vmatmul.f32.vlgmr.msra.gmra.mxu1 %v296_v14  ;;  %v297_v28 = vsub.f32 %v295_v13, %v296_v14 }
 0x113   :  { %657 = vmatpush.msrb.mxu3 %v5414_v6  ;;  %729 = vmatpush.msra.mxu1 %v5410_v4 }
 0x114   :  { %v298_v29 = vand.u32 4294901760, %v297_v28  ;;  %690 = vmatpush.msra.mxu0 %v5463_v23 }
 0x115   :  { %659 = vmatpush.msrb.mxu3 %v5425_v10  ;;  %731 = vmatpush.msra.mxu1 %v5412_v5 }
 0x116   :  { %299 = vmatmul.f32.vlgmr.msrb.gmra.mxu2 %v298_v29  ;;  %503 = vmatmul.f32.vlgmr.msra.gmra.mxu3 %v294_v9 }
 0x117   :  { %616 = vmatpush.msrb.mxu2 %v5438_v15  ;;  %661 = vmatpush.msrb.mxu3 %v5427_v11 }
 0x118   :  { %733 = vmatpush.msra.mxu1 %v5414_v6  ;;  %694 = vmatpush.msra.mxu0 %v5466_v24 }
 0x119   :  { %619 = vmatpush.msrb.mxu2 %v5441_v16  ;;  %663 = vmatpush.msrb.mxu3 %v5429_v12 }
 0x11a   :  { %735 = vmatpush.msra.mxu1 %v5425_v10  ;;  %698 = vmatpush.msra.mxu0 %v5473_v26 }
 0x11b   :  { %622 = vmatpush.msrb.mxu2 %v5444_v17  ;;  %665 = vmatpush.msrb.mxu3 %v5448_v18 }
 0x11c   :  { %737 = vmatpush.msra.mxu1 %v5427_v11  ;;  %702 = vmatpush.msra.mxu0 %v5486_v31 }
 0x11d   :  { %625 = vmatpush.msrb.mxu2 %v5451_v19  ;;  %667 = vmatpush.msrb.mxu3 %v5470_v25 }
 0x11e   :  { %474 = vmatmul.f32.vlgmr.msra.gmra.mxu2 %v294_v9  ;;  %739 = vmatpush.msra.mxu1 %v5429_v12 }
 0x11f   :  { %628 = vmatpush.msrb.mxu2 %v5454_v20  ;;  %706 = vmatpush.msra.mxu0 %v5491_v32 }
 0x120   :  { %741 = vmatpush.msra.mxu1 %v5448_v18 }
 0x121   :  { %631 = vmatpush.msrb.mxu2 %v5457_v21  ;;  %710 = vmatpush.msra.mxu0 %v5512_v39 }
 0x122   :  { %743 = vmatpush.msra.mxu1 %v5470_v25 }
 0x123   :  { %634 = vmatpush.msrb.mxu2 %v5476_v27  ;;  %714 = vmatpush.msra.mxu0 %v5523_v42 }
 0x125   :  { %637 = vmatpush.msrb.mxu2 %v5503_v36 }
 0x18d   :  { %v399_v41 = vpop.f32.mrf.mxu0 }
 0x18f   :  { %v430_v46 = vpop.f32.mrf.mxu1 }
 0x191   :  { %v361_v30 = vpop.f32.mrf.mxu3 }
 0x199   :  { %v300_v35 = vpop.f32.mrf.mxu2  ;;  %v504_v53 = vpop.f32.mrf.mxu3 }
 0x19a   :  { %v362_v38 = vadd.f32 %v361_v30, %v300_v35 }
 0x19c   :  { %v400_v44 = vadd.f32 %v399_v41, %v362_v38  ;;  %v761_v41 = vld [vmem:[%s7212_s1 + $0x80] sm:$0xff] }
 0x19e   :  { %v431_v49 = vadd.f32 %v430_v46, %v400_v44  ;;  %v771_v44 = vsel %vm769_vm2, %v761_v41, 0 }
 0x1a1   :  { %v475_v51 = vpop.f32.mrf.mxu2 }
 0x1a2   :  { %v476_v52 = vadd.f32 %v475_v51, %v431_v49  ;;  %v5688_v51 = vand.u32 4294901760, %v771_v44 }
 0x1a4   :  { %v505_v54 = vadd.f32 %v504_v53, %v476_v52  ;;  %v762_v53 = vld [vmem:[%s7212_s1 + $0x90] sm:$0xff] }
 0x1a6   :  { %v507_v55 = vmul.f32 2.0, %v505_v54 }
 0x1a8   :  { %v508_v56 = vsub.f32 %v507_v55, %v5587_v50 }
 0x1aa   :  { %754 = vrot.lane.b32.xlu1 %v508_v56, %s5373_s28  ;;  %v510_v57 = vsel %vm26_vm1, %v508_v56, 0 }
 0x1ab   :  { %v536_v58 = vand.u32 4294901760, %v510_v57 }
 0x1ad   :  { %602 = vmatmul.f32.vlgmr.msrb.gmra.mxu1 %v536_v58  ;;  %v537_v59 = vsub.f32 %v510_v57, %v536_v58 }
 0x1af   :  { %640 = vmatmul.f32.vlgmr.msrb.gmra.mxu2 %v537_v59  ;;  %v538_v60 = vand.u32 4294901760, %v537_v59 }
 0x1b1   :  { %671 = vmatmul.f32.vlgmr.msrb.gmra.mxu3 %v538_v60  ;;  %v539_v61 = vsub.f32 %v537_v59, %v538_v60 }
 0x1b2   :  { %751 = vrot.lane.b32.xlu1 %v5639_v7, %s5373_s28 }
 0x1b3   :  { %v540_v62 = vand.u32 4294901760, %v539_v61  ;;  %v5708_v61 = vand.u32 4294901760, %v508_v56 }
 0x1b5   :  { %541 = vmatmul.f32.vlgmr.msrb.gmra.mxu0 %v540_v62  ;;  %745 = vmatmul.f32.vlgmr.msra.gmra.mxu1 %v536_v58  ;;  %v774_v62 = vsel %vm769_vm2, %v762_v53, 0 }
 0x1bd   :  { %716 = vmatmul.f32.vlgmr.msra.gmra.mxu0 %v536_v58  ;;  %v5701_v58 = vsub.f32 %v771_v44, %v5688_v51 }
 0x21c   :  { %v755_v38 = vpop.permute.xlu1 %754 }
 0x21d   :  { %v5686_v49 = vand.u32 4294901760, %v755_v38 }
 0x21f   :  { %v5696_v54 = vsub.f32 %v755_v38, %v5686_v49 }
 0x224   :  { %v752_v46 = vpop.permute.xlu1 %751 }
 0x225   :  { %v5690_v52 = vand.u32 4294901760, %v752_v46 }
 0x227   :  { %v5704_v59 = vsub.f32 %v752_v46, %v5690_v52 }
 0x22a   :  { %v603_v50 = vpop.f32.mrf.mxu1 }
 0x232   :  { %v542_v63 = vpop.f32.mrf.mxu0  ;;  %v641_v2 = vpop.f32.mrf.mxu2 }
 0x233   :  { %v604_v1 = vadd.f32 %v603_v50, %v542_v63  ;;  %v746_v28 = vpop.f32.mrf.mxu1  ;;  %v5712_v50 = vand.u32 4294901760, %v5397_v0  ;;  %v7216_v63 = vand.u32 4294901760, %v5696_v54 }
 0x234   :  { %v672_v8 = vpop.f32.mrf.mxu3 }
 0x235   :  { %v642_v3 = vadd.f32 %v641_v2, %v604_v1 }
 0x237   :  { %v673_v9 = vadd.f32 %v672_v8, %v642_v3  ;;  %v5722_v3 = vand.u32 4294901760, %v5639_v7  ;;  %v7214_v8 = vand.u32 4294901760, %v5701_v58 }
 0x239   :  { %v5747_v38 = vsub.f32 %v5639_v7, %v5722_v3  ;;  %v808_v41 = vsub.f32 %v5701_v58, %v7214_v8 }
 0x23a   :  { %v717_v13 = vpop.f32.mrf.mxu0 }
 0x23b   :  { %v718_v14 = vadd.f32 %v717_v13, %v673_v9  ;;  %v5725_v9 = vand.u32 4294901760, %v774_v62  ;;  %v7215_v13 = vand.u32 4294901760, %v5704_v59 }
 0x23d   :  { %v747_v29 = vadd.f32 %v746_v28, %v718_v14  ;;  %v5730_v28 = vsub.f32 %v508_v56, %v5708_v61  ;;  %v856_v56 = vsub.f32 %v5696_v54, %v7216_v63  ;;  %v5755_v44 = vsub.f32 %v774_v62, %v5725_v9 }
 0x23f   :  { %v749_v30 = vmul.f32 2.0, %v747_v29  ;;  %v5734_v29 = vsub.f32 %v5397_v0, %v5712_v50  ;;  %v873_v53 = vand.u32 4294901760, %v5730_v28  ;;  %v857_v62 = vand.u32 4294901760, %v856_v56 }
 0x240   :  { %v815_v63 = vand.u32 4294901760, %v5755_v44 }
 0x241   :  { %v750_v35 = vsub.f32 %v749_v30, %v5639_v7  ;;  %v763_v30 = vld [vmem:[%s7212_s1 + $0xa0] sm:$0xff]  ;;  %v862_v7 = vsub.f32 %v5704_v59, %v7215_v13  ;;  %v885_v8 = vand.u32 4294901760, %v5734_v29  ;;  %v809_v13 = vand.u32 4294901760, %v808_v41 }
 0x242   :  { %v874_v56 = vsub.f32 %v5730_v28, %v873_v53 }
 0x243   :  { %758 = vrot.lane.b32.xlu0 %v750_v35, %s5373_s28  ;;  %v5698_v55 = vand.u32 4294901760, %v750_v35  ;;  %v886_v39 = vsub.f32 %v5734_v29, %v885_v8 }
 0x245   :  { %v5719_v2 = vsub.f32 %v750_v35, %v5698_v55 }
 0x247   :  { %v867_v0 = vand.u32 4294901760, %v5719_v2 }
 0x2b5   :  { %v759_v57 = vpop.permute.xlu0 %758 }
 0x2b6   :  { %v5706_v60 = vand.u32 4294901760, %v759_v57 }
 0x2b8   :  { %v848_v1 = vsub.f32 %v759_v57, %v5706_v60  ;;  %792 = vmatpush.msra.mxu2 %v5706_v60  ;;  %967 = vmatpush.msrb.mxu1 %v5706_v60  ;;  %v777_v57 = vsel %vm769_vm2, %v763_v30, 0 }
 0x2b9   :  { %v5772_v30 = vand.u32 4294901760, %v777_v57 }
 0x2ba   :  { %v849_v14 = vand.u32 4294901760, %v848_v1  ;;  %794 = vmatpush.msra.mxu2 %v5686_v49  ;;  %917 = vmatpush.msrb.mxu0 %v848_v1 }
 0x2bb   :  { %969 = vmatpush.msrb.mxu1 %v5686_v49 }
 0x2bc   :  { %v850_v35 = vsub.f32 %v848_v1, %v849_v14  ;;  %796 = vmatpush.msra.mxu2 %v5690_v52  ;;  %920 = vmatpush.msrb.mxu0 %v5696_v54  ;;  %v868_v1 = vsub.f32 %v5719_v2, %v867_v0 }
 0x2bd   :  { %971 = vmatpush.msrb.mxu1 %v5690_v52 }
 0x2be   :  { %v851_v46 = vand.u32 4294901760, %v850_v35  ;;  %798 = vmatpush.msra.mxu2 %v5698_v55  ;;  %923 = vmatpush.msrb.mxu0 %v5704_v59  ;;  %v879_v35 = vand.u32 4294901760, %v5747_v38  ;;  %v869_v41 = vand.u32 4294901760, %v868_v1  ;;  %v7285_v1 = vand.u32 4294901760, %v5696_v54 }
 0x2bf   :  { %973 = vmatpush.msrb.mxu1 %v5698_v55 }
 0x2c0   :  { %800 = vmatpush.msra.mxu2 %v5708_v61  ;;  %852 = vmatpush.msra.mxu3 %v851_v46  ;;  %v863_v46 = vand.u32 4294901760, %v862_v7  ;;  %v880_v42 = vsub.f32 %v5747_v38, %v879_v35  ;;  %v816_v7 = vsub.f32 %v5755_v44, %v815_v63 }
 0x2c1   :  { %926 = vmatpush.msrb.mxu0 %v5719_v2  ;;  %975 = vmatpush.msrb.mxu1 %v5708_v61  ;;  %v764_v2 = vld [vmem:[%s7212_s1 + $0xb0] sm:$0xff] }
 0x2c2   :  { %802 = vmatpush.msra.mxu2 %v5722_v3  ;;  %858 = vmatpush.msra.mxu3 %v857_v62  ;;  %v875_v62 = vand.u32 4294901760, %v874_v56  ;;  %v780_v32 = vsel %vm769_vm2, %v764_v2, 0  ;;  %v7287_v56 = vand.u32 4294901760, %v5704_v59  ;;  %vm4011_vm2 = vcmask 1041408  }
 0x2c3   :  { %929 = vmatpush.msrb.mxu0 %v5730_v28  ;;  %977 = vmatpush.msrb.mxu1 %v5722_v3  ;;  %v822_v28 = vsub.f32 %v777_v57, %v5772_v30  ;;  %v5795_v57 = vand.u32 4294901760, %v780_v32 }
 0x2c4   :  { %804 = vmatpush.msra.mxu2 %v5712_v50  ;;  %864 = vmatpush.msra.mxu3 %v863_v46  ;;  %v881_v46 = vand.u32 4294901760, %v880_v42 }
 0x2c5   :  { %932 = vmatpush.msrb.mxu0 %v5747_v38  ;;  %810 = vmatmul.f32.vlgmr.msra.gmra.mxu2 %v809_v13  ;;  %v887_v38 = vand.u32 4294901760, %v886_v39  ;;  %v817_v13 = vand.u32 4294901760, %v816_v7  ;;  %v823_v31 = vand.u32 4294901760, %v822_v28  ;;  %v830_v42 = vsub.f32 %v780_v32, %v5795_v57 }
 0x2c6   :  { %1017 = vmatpush.msrb.mxu2 %v849_v14  ;;  %870 = vmatpush.msra.mxu3 %v869_v41  ;;  %v7286_v14 = vand.u32 4294901760, %v5701_v58 }
 0x2c7   :  { %935 = vmatpush.msrb.mxu0 %v5734_v29  ;;  %979 = vmatpush.msrb.mxu1 %v5712_v50  ;;  %v824_v39 = vsub.f32 %v822_v28, %v823_v31 }
 0x2c8   :  { %1021 = vmatpush.msrb.mxu2 %v7285_v1  ;;  %876 = vmatpush.msra.mxu3 %v875_v62 }
 0x2c9   :  { %938 = vmatmul.f32.vlgmr.msrb.gmra.mxu0 %v5701_v58  ;;  %983 = vmatmul.f32.vlgmr.msrb.gmra.mxu1 %v7286_v14  ;;  %v825_v54 = vand.u32 4294901760, %v824_v39  ;;  %v831_v58 = vand.u32 4294901760, %v830_v42 }
 0x2ca   :  { %1025 = vmatpush.msrb.mxu2 %v7287_v56  ;;  %882 = vmatpush.msra.mxu3 %v881_v46  ;;  %v767_v46 = vld [vmem:[%s7212_s1 + $0xe0] sm:$0xff] }
 0x2cb   :  { %1205 = vmatpush.msra.mxu1 %v5494_v33  ;;  %1144 = vmatpush.msra.mxu0 %v5410_v4  ;;  %v832_v32 = vsub.f32 %v830_v42, %v831_v58 }
 0x2cc   :  { %1029 = vmatpush.msrb.mxu2 %v867_v0  ;;  %888 = vmatpush.msra.mxu3 %v887_v38 }
 0x2cd   :  { %818 = vmatmul.f32.gmra.mxu2 %v817_v13  ;;  %890 = vmatmul.f32.vlgmr.msra.gmra.mxu3 %v5688_v51 }
 0x2ce   :  { %1033 = vmatpush.msrb.mxu2 %v873_v53  ;;  %1069 = vmatpush.msrb.mxu3 %v5706_v60 }
 0x2cf   :  { %1211 = vmatpush.msra.mxu1 %v5496_v34  ;;  %1146 = vmatpush.msra.mxu0 %v5412_v5 }
 0x2d0   :  { %1037 = vmatpush.msrb.mxu2 %v879_v35  ;;  %1071 = vmatpush.msrb.mxu3 %v5686_v49  ;;  %v833_v49 = vand.u32 4294901760, %v832_v32  ;;  %v766_v35 = vld [vmem:[%s7212_s1 + $0xd0] sm:$0xff] }
 0x2d1   :  { %943 = vmatmul.f32.gmra.mxu0 %v5755_v44  ;;  %989 = vmatmul.f32.gmra.mxu1 %v815_v63 }
 0x2d2   :  { %1073 = vmatpush.msrb.mxu3 %v5690_v52  ;;  %1041 = vmatpush.msrb.mxu2 %v885_v8  ;;  %v7289_v52 = vld [vmem:[#allocation11_spill] sm:$0xff] }
 0x2d3   :  { %1217 = vmatpush.msra.mxu1 %v5507_v37  ;;  %1148 = vmatpush.msra.mxu0 %v5414_v6 }
 0x2d4   :  { %1275 = vmatpush.msra.mxu2 %v5438_v15  ;;  %1075 = vmatpush.msrb.mxu3 %v5698_v55  ;;  %v7291_v55 = vld [vmem:[#allocation17_spill] sm:$0xff] }
 0x2d5   :  { %826 = vmatmul.f32.gmra.mxu2 %v825_v54  ;;  %894 = vmatmul.f32.gmra.mxu3 %v5725_v9 }
 0x2d6   :  { %1077 = vmatpush.msrb.mxu3 %v5708_v61  ;;  %1278 = vmatpush.msra.mxu2 %v5441_v16 }
 0x2d7   :  { %1223 = vmatpush.msra.mxu1 %v5518_v40  ;;  %1150 = vmatpush.msra.mxu0 %v5425_v10 }
 0x2d8   :  { %1079 = vmatpush.msrb.mxu3 %v5722_v3  ;;  %1281 = vmatpush.msra.mxu2 %v5444_v17  ;;  %v765_v3 = vld [vmem:[%s7212_s1 + $0xc0] sm:$0xff] }
 0x2d9   :  { %948 = vmatmul.f32.gmra.mxu0 %v822_v28  ;;  %995 = vmatmul.f32.gmra.mxu1 %v823_v31  ;;  %v7288_v31 = vld [vmem:[#allocation10_spill] sm:$0xff] }
 0x2da   :  { %1081 = vmatpush.msrb.mxu3 %v5712_v50  ;;  %1229 = vmatpush.msra.mxu1 %v5529_v43 }
 0x2db   :  { %1284 = vmatpush.msra.mxu2 %v5451_v19  ;;  %1152 = vmatpush.msra.mxu0 %v5427_v11 }
 0x2dc   :  { %1327 = vmatpush.msra.mxu3 %v5410_v4  ;;  %1235 = vmatpush.msra.mxu1 %v5537_v45 }
 0x2dd   :  { %834 = vmatmul.f32.gmra.mxu2 %v833_v49  ;;  %898 = vmatmul.f32.gmra.mxu3 %v5772_v30 }
 0x2de   :  { %1329 = vmatpush.msra.mxu3 %v5412_v5  ;;  %1287 = vmatpush.msra.mxu2 %v5454_v20 }
 0x2df   :  { %1241 = vmatpush.msra.mxu1 %v5545_v47  ;;  %1154 = vmatpush.msra.mxu0 %v5429_v12 }
 0x2e0   :  { %1331 = vmatpush.msra.mxu3 %v5414_v6  ;;  %1290 = vmatpush.msra.mxu2 %v5457_v21 }
 0x2e1   :  { %953 = vmatmul.f32.gmra.mxu0 %v830_v42  ;;  %1001 = vmatmul.f32.gmra.mxu1 %v831_v58 }
 0x2e2   :  { %1333 = vmatpush.msra.mxu3 %v5425_v10  ;;  %1247 = vmatpush.msra.mxu1 %v5551_v48 }
 0x2e3   :  { %1293 = vmatpush.msra.mxu2 %v5476_v27  ;;  %1156 = vmatpush.msra.mxu0 %v5448_v18 }
 0x2e4   :  { %1335 = vmatpush.msra.mxu3 %v5427_v11  ;;  %1433 = vmatpush.msrb.mxu1 %v5410_v4 }
 0x2e5   :  { %902 = vmatmul.f32.gmra.mxu3 %v5795_v57  ;;  %1043 = vmatmul.f32.vlgmr.msrb.gmra.mxu2 %v5688_v51 }
 0x2e6   :  { %1337 = vmatpush.msra.mxu3 %v5429_v12  ;;  %1296 = vmatpush.msra.mxu2 %v5503_v36 }
 0x2e7   :  { %1158 = vmatpush.msra.mxu0 %v5470_v25  ;;  %1435 = vmatpush.msrb.mxu1 %v5412_v5 }
 0x2e8   :  { %1339 = vmatpush.msra.mxu3 %v5448_v18  ;;  %1486 = vmatpush.msrb.mxu2 %v5410_v4 }
 0x2e9   :  { %1378 = vmatpush.msrb.mxu0 %v5460_v22  ;;  %1437 = vmatpush.msrb.mxu1 %v5414_v6 }
 0x2ea   :  { %1341 = vmatpush.msra.mxu3 %v5470_v25  ;;  %1488 = vmatpush.msrb.mxu2 %v5412_v5 }
 0x2eb   :  { %1382 = vmatpush.msrb.mxu0 %v5463_v23  ;;  %1439 = vmatpush.msrb.mxu1 %v5425_v10 }
 0x2ec   :  { %1490 = vmatpush.msrb.mxu2 %v5414_v6 }
 0x2ed   :  { %1386 = vmatpush.msrb.mxu0 %v5466_v24  ;;  %1047 = vmatmul.f32.gmra.mxu2 %v5725_v9 }
 0x2ee   :  { %1083 = vmatmul.f32.vlgmr.msrb.gmra.mxu3 %v5688_v51  ;;  %1441 = vmatpush.msrb.mxu1 %v5427_v11  ;;  %v7290_v51 = vld [vmem:[#allocation15_spill] sm:$0xff] }
 0x2ef   :  { %1390 = vmatpush.msrb.mxu0 %v5473_v26  ;;  %1547 = vmatpush.msrb.mxu3 %v5494_v33 }
 0x2f0   :  { %1443 = vmatpush.msrb.mxu1 %v5429_v12  ;;  %1492 = vmatpush.msrb.mxu2 %v5425_v10 }
 0x2f1   :  { %1394 = vmatpush.msrb.mxu0 %v7288_v31  ;;  %1553 = vmatpush.msrb.mxu3 %v5496_v34 }
 0x2f2   :  { %1445 = vmatpush.msrb.mxu1 %v5448_v18  ;;  %1494 = vmatpush.msrb.mxu2 %v5427_v11 }
 0x2f3   :  { %1398 = vmatpush.msrb.mxu0 %v7289_v52  ;;  %1559 = vmatpush.msrb.mxu3 %v5507_v37 }
 0x2f4   :  { %1447 = vmatpush.msrb.mxu1 %v5470_v25  ;;  %1496 = vmatpush.msrb.mxu2 %v5429_v12 }
 0x2f5   :  { %1402 = vmatpush.msrb.mxu0 %v7290_v51  ;;  %1051 = vmatmul.f32.gmra.mxu2 %v5772_v30 }
 0x2f6   :  { %1087 = vmatmul.f32.gmra.mxu3 %v5725_v9  ;;  %1498 = vmatpush.msrb.mxu2 %v5448_v18 }
 0x2f7   :  { %1406 = vmatpush.msrb.mxu0 %v7291_v55  ;;  %1565 = vmatpush.msrb.mxu3 %v5518_v40 }
 0x2f8   :  { %1500 = vmatpush.msrb.mxu2 %v5470_v25 }
 0x2f9   :  { %1571 = vmatpush.msrb.mxu3 %v5529_v43 }
 0x2fb   :  { %1577 = vmatpush.msrb.mxu3 %v5537_v45 }
 0x2fd   :  { %1583 = vmatpush.msrb.mxu3 %v5545_v47  ;;  %1055 = vmatmul.f32.gmra.mxu2 %v5795_v57 }
 0x2fe   :  { %1091 = vmatmul.f32.gmra.mxu3 %v5772_v30 }
 0x2ff   :  { %1589 = vmatpush.msrb.mxu3 %v5551_v48 }
 0x306   :  { %1095 = vmatmul.f32.gmra.mxu3 %v5795_v57 }
 0x346   :  { %v939_v8 = vpop.f32.mrf.mxu0  ;;  %v984_v44 = vpop.f32.mrf.mxu1 }
 0x348   :  { %v811_v59 = vpop.f32.mrf.mxu2 }
 0x349   :  { %v812_v0 = vadd.f32 %v811_v59, %v765_v3  ;;  %v768_v59 = vld [vmem:[%s7212_s1 + $0xf0] sm:$0xff] }
 0x34e   :  { %v944_v28 = vpop.f32.mrf.mxu0  ;;  %v990_v38 = vpop.f32.mrf.mxu1 }
 0x350   :  { %v819_v60 = vpop.f32.mrf.mxu2  ;;  %v891_v61 = vpop.f32.mrf.mxu3 }
 0x351   :  { %v892_v53 = vadd.f32 %v891_v61, %v812_v0  ;;  %v820_v41 = vadd.f32 %v819_v60, %v766_v35 }
 0x353   :  { %v940_v7 = vadd.f32 %v939_v8, %v892_v53 }
 0x355   :  { %v985_v62 = vadd.f32 %v984_v44, %v940_v7 }
 0x356   :  { %v949_v58 = vpop.f32.mrf.mxu0  ;;  %v996_v61 = vpop.f32.mrf.mxu1 }
 0x358   :  { %v827_v50 = vpop.f32.mrf.mxu2  ;;  %v895_v63 = vpop.f32.mrf.mxu3 }
 0x359   :  { %v896_v1 = vadd.f32 %v895_v63, %v820_v41  ;;  %v828_v56 = vadd.f32 %v827_v50, %v767_v46 }
 0x35b   :  { %v945_v39 = vadd.f32 %v944_v28, %v896_v1 }
 0x35d   :  { %v991_v32 = vadd.f32 %v990_v38, %v945_v39 }
 0x360   :  { %v835_v9 = vpop.f32.mrf.mxu2  ;;  %v899_v29 = vpop.f32.mrf.mxu3 }
 0x361   :  { %v900_v49 = vadd.f32 %v899_v29, %v828_v56  ;;  %v836_v3 = vadd.f32 %v835_v9, %v768_v59  ;;  %v954_v29 = vpop.f32.mrf.mxu0 }
 0x363   :  { %v950_v8 = vadd.f32 %v949_v58, %v900_v49 }
 0x365   :  { %v997_v53 = vadd.f32 %v996_v61, %v950_v8 }
 0x368   :  { %v903_v30 = vpop.f32.mrf.mxu3  ;;  %v1044_v2 = vpop.f32.mrf.mxu2 }
 0x369   :  { %v1045_v13 = vadd.f32 %v1044_v2, %v985_v62  ;;  %v904_v35 = vadd.f32 %v903_v30, %v836_v3  ;;  %v1002_v62 = vpop.f32.mrf.mxu1 }
 0x36b   :  { %v955_v7 = vadd.f32 %v954_v29, %v904_v35 }
 0x36d   :  { %v1003_v9 = vadd.f32 %v1002_v62, %v955_v7 }
 0x370   :  { %v1048_v14 = vpop.f32.mrf.mxu2 }
 0x371   :  { %v1084_v57 = vpop.f32.mrf.mxu3  ;;  %v1049_v60 = vadd.f32 %v1048_v14, %v991_v32 }
 0x372   :  { %v1085_v42 = vadd.f32 %v1084_v57, %v1045_v13 }
 0x374   :  { %v5893_v54 = vmax.f32 %v1085_v42, 0.0 }
 0x376   :  { %1107 = vrot.lane.b32.xlu2 %v5893_v54, %s5372_s11 }
 0x378   :  { %v1052_v0 = vpop.f32.mrf.mxu2 }
 0x379   :  { %v1088_v63 = vpop.f32.mrf.mxu3  ;;  %v1053_v2 = vadd.f32 %v1052_v0, %v997_v53 }
 0x37a   :  { %v1089_v50 = vadd.f32 %v1088_v63, %v1049_v60 }
 0x37c   :  { %v5900_v44 = vmax.f32 %v1089_v50, 0.0 }
 0x37e   :  { %1109 = vrot.lane.b32.xlu2 %v5900_v44, %s5372_s11 }
 0x380   :  { %v1056_v46 = vpop.f32.mrf.mxu2 }
 0x381   :  { %v1092_v41 = vpop.f32.mrf.mxu3  ;;  %v1057_v38 = vadd.f32 %v1056_v46, %v1003_v9 }
 0x382   :  { %v1093_v28 = vadd.f32 %v1092_v41, %v1053_v2 }
 0x384   :  { %v5904_v1 = vmax.f32 %v1093_v28, 0.0 }
 0x386   :  { %1111 = vrot.lane.b32.xlu0 %v5904_v1, %s5372_s11 }
 0x389   :  { %v1096_v13 = vpop.f32.mrf.mxu3 }
 0x38a   :  { %v1097_v14 = vadd.f32 %v1096_v13, %v1057_v38 }
 0x38c   :  { %v5908_v30 = vmax.f32 %v1097_v14, 0.0 }
 0x38e   :  { %1113 = vrot.lane.b32.xlu1 %v5908_v30, %s5372_s11 }
 0x3d0   :  { %v1108_v57 = vpop.permute.xlu2 %1107 }
 0x3d1   :  { %v5914_v56 = vsel %vm24_vm0, %v5893_v54, %v1108_v57 }
 0x3d2   :  { %v1124_v39 = vsel %vm26_vm1, %v5914_v56, 0 }
 0x3d3   :  { %v5918_v42 = vand.u32 4294901760, %v1124_v39 }
 0x3d5   :  { %v1160_v58 = vsub.f32 %v1124_v39, %v5918_v42  ;;  %1249 = vmatmul.f32.vlgmr.msra.gmra.mxu1 %v5918_v42 }
 0x3d6   :  { %1669 = vmatpush.msra.mxu1 %v5410_v4 }
 0x3d7   :  { %1299 = vmatmul.f32.vlgmr.msra.gmra.mxu2 %v1160_v58  ;;  %v1161_v32 = vand.u32 4294901760, %v1160_v58 }
 0x3d8   :  { %v1110_v49 = vpop.permute.xlu2 %1109  ;;  %1671 = vmatpush.msra.mxu1 %v5412_v5  ;;  %1720 = vmatpush.msra.mxu2 %v5460_v22 }
 0x3d9   :  { %v5927_v59 = vsel %vm24_vm0, %v5900_v44, %v1110_v49  ;;  %1345 = vmatmul.f32.vlgmr.msra.gmra.mxu3 %v1161_v32  ;;  %v1162_v60 = vsub.f32 %v1160_v58, %v1161_v32 }
 0x3da   :  { %v1127_v61 = vsel %vm26_vm1, %v5927_v59, 0  ;;  %1673 = vmatpush.msra.mxu1 %v5414_v6  ;;  %1775 = vmatpush.msra.mxu3 %v5410_v4 }
 0x3db   :  { %v5933_v63 = vand.u32 4294901760, %v1127_v61  ;;  %v1163_v3 = vand.u32 4294901760, %v1162_v60  ;;  %1724 = vmatpush.msra.mxu2 %v5463_v23 }
 0x3dc   :  { %1675 = vmatpush.msra.mxu1 %v5425_v10  ;;  %1777 = vmatpush.msra.mxu3 %v5412_v5 }
 0x3dd   :  { %v1168_v8 = vsub.f32 %v1127_v61, %v5933_v63  ;;  %1164 = vmatmul.f32.vlgmr.msra.gmra.mxu0 %v1163_v3  ;;  %1253 = vmatmul.f32.gmra.mxu1 %v5933_v63 }
 0x3de   :  { %1617 = vmatpush.msra.mxu0 %v5438_v15  ;;  %1677 = vmatpush.msra.mxu1 %v5427_v11 }
 0x3df   :  { %1304 = vmatmul.f32.gmra.mxu2 %v1168_v8  ;;  %v1169_v50 = vand.u32 4294901760, %v1168_v8  ;;  %1779 = vmatpush.msra.mxu3 %v5414_v6 }
 0x3e0   :  { %1620 = vmatpush.msra.mxu0 %v5441_v16  ;;  %1679 = vmatpush.msra.mxu1 %v5429_v12 }
 0x3e1   :  { %1351 = vmatmul.f32.gmra.mxu3 %v1169_v50  ;;  %v1170_v0 = vsub.f32 %v1168_v8, %v1169_v50  ;;  %1728 = vmatpush.msra.mxu2 %v5466_v24 }
 0x3e2   :  { %1623 = vmatpush.msra.mxu0 %v5444_v17  ;;  %1681 = vmatpush.msra.mxu1 %v5448_v18 }
 0x3e3   :  { %v1171_v53 = vand.u32 4294901760, %v1170_v0  ;;  %1781 = vmatpush.msra.mxu3 %v5425_v10  ;;  %1732 = vmatpush.msra.mxu2 %v5473_v26 }
 0x3e4   :  { %1626 = vmatpush.msra.mxu0 %v5451_v19  ;;  %1683 = vmatpush.msra.mxu1 %v5470_v25 }
 0x3e5   :  { %1172 = vmatmul.f32.gmra.mxu0 %v1171_v53  ;;  %1783 = vmatpush.msra.mxu3 %v5427_v11 }
 0x3e6   :  { %1629 = vmatpush.msra.mxu0 %v5454_v20  ;;  %1736 = vmatpush.msra.mxu2 %v7288_v31 }
 0x3e7   :  { %1785 = vmatpush.msra.mxu3 %v5429_v12 }
 0x3e8   :  { %1632 = vmatpush.msra.mxu0 %v5457_v21  ;;  %1740 = vmatpush.msra.mxu2 %v7289_v52 }
 0x3e9   :  { %1787 = vmatpush.msra.mxu3 %v5448_v18 }
 0x3ea   :  { %1635 = vmatpush.msra.mxu0 %v5476_v27  ;;  %1744 = vmatpush.msra.mxu2 %v7290_v51 }
 0x3eb   :  { %1789 = vmatpush.msra.mxu3 %v5470_v25 }
 0x3ec   :  { %1638 = vmatpush.msra.mxu0 %v5503_v36  ;;  %1748 = vmatpush.msra.mxu2 %v7291_v55 }
 0x3f8   :  { %v1112_v35 = vpop.permute.xlu0 %1111 }
 0x3f9   :  { %v5966_v29 = vsel %vm24_vm0, %v5904_v1, %v1112_v35 }
 0x3fa   :  { %v1130_v2 = vsel %vm26_vm1, %v5966_v29, 0 }
 0x3fb   :  { %v1175_v41 = vand.u32 4294901760, %v1130_v2 }
 0x3fd   :  { %v1176_v7 = vsub.f32 %v1130_v2, %v1175_v41  ;;  %1257 = vmatmul.f32.gmra.mxu1 %v1175_v41 }
 0x3ff   :  { %1309 = vmatmul.f32.gmra.mxu2 %v1176_v7  ;;  %v1177_v28 = vand.u32 4294901760, %v1176_v7 }
 0x400   :  { %v1114_v62 = vpop.permute.xlu1 %1113 }
 0x401   :  { %v5972_v46 = vsel %vm24_vm0, %v5908_v30, %v1114_v62  ;;  %1357 = vmatmul.f32.gmra.mxu3 %v1177_v28  ;;  %v1178_v9 = vsub.f32 %v1176_v7, %v1177_v28 }
 0x402   :  { %v1133_v38 = vsel %vm26_vm1, %v5972_v46, 0 }
 0x403   :  { %v1183_v13 = vand.u32 4294901760, %v1133_v38  ;;  %v1179_v14 = vand.u32 4294901760, %v1178_v9 }
 0x405   :  { %v1184_v57 = vsub.f32 %v1133_v38, %v1183_v13  ;;  %1180 = vmatmul.f32.gmra.mxu0 %v1179_v14  ;;  %1261 = vmatmul.f32.gmra.mxu1 %v1183_v13 }
 0x407   :  { %1314 = vmatmul.f32.gmra.mxu2 %v1184_v57  ;;  %v1185_v39 = vand.u32 4294901760, %v1184_v57 }
 0x409   :  { %1363 = vmatmul.f32.gmra.mxu3 %v1185_v39  ;;  %v1186_v58 = vsub.f32 %v1184_v57, %v1185_v39 }
 0x40b   :  { %v1187_v32 = vand.u32 4294901760, %v1186_v58 }
 0x40d   :  { %1188 = vmatmul.f32.gmra.mxu0 %v1187_v32  ;;  %1449 = vmatmul.f32.vlgmr.msrb.gmra.mxu1 %v5918_v42 }
 0x415   :  { %1408 = vmatmul.f32.vlgmr.msrb.gmra.mxu0 %v5918_v42  ;;  %1453 = vmatmul.f32.gmra.mxu1 %v5933_v63 }
 0x41d   :  { %1412 = vmatmul.f32.gmra.mxu0 %v5933_v63  ;;  %1457 = vmatmul.f32.gmra.mxu1 %v1175_v41 }
 0x425   :  { %1416 = vmatmul.f32.gmra.mxu0 %v1175_v41  ;;  %1461 = vmatmul.f32.gmra.mxu1 %v1183_v13 }
 0x42d   :  { %1420 = vmatmul.f32.gmra.mxu0 %v1183_v13 }
 0x452   :  { %v1250_v49 = vpop.f32.mrf.mxu1 }
 0x45a   :  { %v1165_v60 = vpop.f32.mrf.mxu0  ;;  %v1254_v61 = vpop.f32.mrf.mxu1 }
 0x45b   :  { %v1300_v53 = vpop.f32.mrf.mxu2  ;;  %v1251_v35 = vadd.f32 %v1250_v49, %v1165_v60 }
 0x45c   :  { %v1346_v7 = vpop.f32.mrf.mxu3 }
 0x45d   :  { %v1301_v42 = vadd.f32 %v1300_v53, %v1251_v35 }
 0x45f   :  { %v1347_v62 = vadd.f32 %v1346_v7, %v1301_v42 }
 0x462   :  { %v1173_v3 = vpop.f32.mrf.mxu0 }
 0x463   :  { %v1255_v9 = vadd.f32 %v1254_v61, %v1173_v3  ;;  %v1305_v63 = vpop.f32.mrf.mxu2 }
 0x464   :  { %v1352_v57 = vpop.f32.mrf.mxu3 }
 0x465   :  { %v1306_v14 = vadd.f32 %v1305_v63, %v1255_v9 }
 0x467   :  { %v1353_v49 = vadd.f32 %v1352_v57, %v1306_v14 }
 0x47a   :  { %v1258_v8 = vpop.f32.mrf.mxu1 }
 0x482   :  { %v1181_v50 = vpop.f32.mrf.mxu0  ;;  %v1262_v0 = vpop.f32.mrf.mxu1 }
 0x483   :  { %v1259_v60 = vadd.f32 %v1258_v8, %v1181_v50  ;;  %v1310_v55 = vpop.f32.mrf.mxu2 }
 0x485   :  { %v1311_v7 = vadd.f32 %v1310_v55, %v1259_v60 }
 0x48a   :  { %v1189_v2 = vpop.f32.mrf.mxu0  ;;  %v1450_v28 = vpop.f32.mrf.mxu1 }
 0x492   :  { %v1409_v38 = vpop.f32.mrf.mxu0  ;;  %v1454_v58 = vpop.f32.mrf.mxu1 }
 0x493   :  { %v1410_v41 = vadd.f32 %v1409_v38, %v1347_v62  ;;  %v1263_v38 = vadd.f32 %v1262_v0, %v1189_v2 }
 0x495   :  { %v5980_v13 = vadd.f32 %v1450_v28, %v1410_v41  ;;  %v1358_v28 = vpop.f32.mrf.mxu3 }
 0x496   :  { %v1359_v63 = vadd.f32 %v1358_v28, %v1311_v7 }
 0x497   :  { %v1466_v39 = vsel %vm26_vm1, %v5980_v13, 0 }
 0x498   :  { %v5984_v32 = vand.u32 4294901760, %v1466_v39 }
 0x49a   :  { %v1413_v53 = vpop.f32.mrf.mxu0  ;;  %1591 = vmatmul.f32.vlgmr.msrb.gmra.mxu3 %v5984_v32  ;;  %v1502_v61 = vsub.f32 %v1466_v39, %v5984_v32  ;;  %v1458_v41 = vpop.f32.mrf.mxu1 }
 0x49b   :  { %v1414_v3 = vadd.f32 %v1413_v53, %v1353_v49  ;;  %v1315_v39 = vpop.f32.mrf.mxu2 }
 0x49c   :  { %1641 = vmatmul.f32.vlgmr.msra.gmra.mxu0 %v1502_v61  ;;  %v1503_v35 = vand.u32 4294901760, %v1502_v61  ;;  %v1316_v49 = vadd.f32 %v1315_v39, %v1263_v38 }
 0x49d   :  { %v5988_v42 = vadd.f32 %v1454_v58, %v1414_v3  ;;  %v1364_v2 = vpop.f32.mrf.mxu3 }
 0x49e   :  { %1687 = vmatmul.f32.vlgmr.msra.gmra.mxu1 %v1503_v35  ;;  %v1504_v62 = vsub.f32 %v1502_v61, %v1503_v35  ;;  %v1365_v35 = vadd.f32 %v1364_v2, %v1316_v49 }
 0x49f   :  { %1817 = vrot.lane.b32.xlu1 %v5988_v42, %s5373_s28  ;;  %v1469_v8 = vsel %vm26_vm1, %v5988_v42, 0 }
 0x4a0   :  { %v1505_v50 = vand.u32 4294901760, %v1504_v62  ;;  %v1509_v9 = vand.u32 4294901760, %v1469_v8 }
 0x4a2   :  { %v1417_v14 = vpop.f32.mrf.mxu0  ;;  %1506 = vmatmul.f32.vlgmr.msrb.gmra.mxu2 %v1505_v50  ;;  %1595 = vmatmul.f32.gmra.mxu3 %v1509_v9  ;;  %v1510_v55 = vsub.f32 %v1469_v8, %v1509_v9  ;;  %v1462_v8 = vpop.f32.mrf.mxu1 }
 0x4a3   :  { %v1418_v57 = vadd.f32 %v1417_v14, %v1359_v63 }
 0x4a4   :  { %1646 = vmatmul.f32.gmra.mxu0 %v1510_v55  ;;  %v1511_v58 = vand.u32 4294901760, %v1510_v55 }
 0x4a5   :  { %v5994_v60 = vadd.f32 %v1458_v41, %v1418_v57 }
 0x4a6   :  { %1693 = vmatmul.f32.gmra.mxu1 %v1511_v58  ;;  %v1512_v53 = vsub.f32 %v1510_v55, %v1511_v58 }
 0x4a7   :  { %1819 = vrot.lane.b32.xlu0 %v5994_v60, %s5373_s28  ;;  %v1472_v0 = vsel %vm26_vm1, %v5994_v60, 0 }
 0x4a8   :  { %v1513_v61 = vand.u32 4294901760, %v1512_v53  ;;  %v1517_v3 = vand.u32 4294901760, %v1472_v0 }
 0x4aa   :  { %v1421_v7 = vpop.f32.mrf.mxu0  ;;  %1514 = vmatmul.f32.gmra.mxu2 %v1513_v61  ;;  %1599 = vmatmul.f32.gmra.mxu3 %v1517_v3  ;;  %v1518_v28 = vsub.f32 %v1472_v0, %v1517_v3 }
 0x4ab   :  { %v1422_v62 = vadd.f32 %v1421_v7, %v1365_v35 }
 0x4ac   :  { %1651 = vmatmul.f32.gmra.mxu0 %v1518_v28  ;;  %v1519_v50 = vand.u32 4294901760, %v1518_v28 }
 0x4ad   :  { %v6000_v63 = vadd.f32 %v1462_v8, %v1422_v62 }
 0x4ae   :  { %1699 = vmatmul.f32.gmra.mxu1 %v1519_v50  ;;  %v1520_v38 = vsub.f32 %v1518_v28, %v1519_v50 }
 0x4af   :  { %1821 = vrot.lane.b32.xlu2 %v6000_v63, %s5373_s28  ;;  %v1475_v41 = vsel %vm26_vm1, %v6000_v63, 0 }
 0x4b0   :  { %v1521_v14 = vand.u32 4294901760, %v1520_v38  ;;  %v1525_v55 = vand.u32 4294901760, %v1475_v41 }
 0x4b2   :  { %1522 = vmatmul.f32.gmra.mxu2 %v1521_v14  ;;  %1603 = vmatmul.f32.gmra.mxu3 %v1525_v55  ;;  %v1526_v57 = vsub.f32 %v1475_v41, %v1525_v55 }
 0x4b4   :  { %1656 = vmatmul.f32.gmra.mxu0 %v1526_v57  ;;  %v1527_v39 = vand.u32 4294901760, %v1526_v57 }
 0x4b6   :  { %1705 = vmatmul.f32.gmra.mxu1 %v1527_v39  ;;  %v1528_v58 = vsub.f32 %v1526_v57, %v1527_v39 }
 0x4b7   :  { %1815 = vrot.lane.b32.xlu2 %v5980_v13, %s5373_s28 }
 0x4b8   :  { %v1529_v49 = vand.u32 4294901760, %v1528_v58 }
 0x4ba   :  { %1530 = vmatmul.f32.gmra.mxu2 %v1529_v49  ;;  %1791 = vmatmul.f32.vlgmr.msra.gmra.mxu3 %v5984_v32 }
 0x4c2   :  { %1750 = vmatmul.f32.vlgmr.msra.gmra.mxu2 %v5984_v32  ;;  %1795 = vmatmul.f32.gmra.mxu3 %v1509_v9 }
 0x4ca   :  { %1754 = vmatmul.f32.gmra.mxu2 %v1509_v9  ;;  %1799 = vmatmul.f32.gmra.mxu3 %v1517_v3 }
 0x4d2   :  { %1758 = vmatmul.f32.gmra.mxu2 %v1517_v3  ;;  %1803 = vmatmul.f32.gmra.mxu3 %v1525_v55 }
 0x4da   :  { %1762 = vmatmul.f32.gmra.mxu2 %v1525_v55 }
 0x509   :  { %v1822_v53 = vpop.permute.xlu2 %1821 }
 0x50a   :  { %v6010_v0 = vand.u32 4294901760, %v1822_v53 }
 0x50c   :  { %v6013_v2 = vsub.f32 %v1822_v53, %v6010_v0  ;;  %1850 = vmatpush.msrb.mxu0 %v6010_v0  ;;  %2046 = vmatpush.msrb.mxu3 %v6010_v0 }
 0x50e   :  { %v7227_v61 = vand.u32 4294901760, %v6013_v2  ;;  %1993 = vmatpush.msrb.mxu2 %v6013_v2 }
 0x510   :  { %v1893_v32 = vsub.f32 %v6013_v2, %v7227_v61 }
 0x511   :  { %v1818_v9 = vpop.permute.xlu1 %1817  ;;  %v1816_v35 = vpop.permute.xlu2 %1815 }
 0x512   :  { %v1894_v3 = vand.u32 4294901760, %v1893_v32  ;;  %v6022_v7 = vand.u32 4294901760, %v1818_v9  ;;  %v6024_v28 = vand.u32 4294901760, %v1816_v35 }
 0x514   :  { %1895 = vmatpush.msrb.mxu1 %v1894_v3  ;;  %v6027_v62 = vsub.f32 %v1818_v9, %v6022_v7  ;;  %v6030_v50 = vsub.f32 %v1816_v35, %v6024_v28 }
 0x516   :  { %v7229_v41 = vand.u32 4294901760, %v6027_v62  ;;  %v7242_v57 = vand.u32 4294901760, %v6030_v50 }
 0x518   :  { %v1905_v49 = vsub.f32 %v6027_v62, %v7229_v41  ;;  %v1911_v32 = vsub.f32 %v6030_v50, %v7242_v57 }
 0x519   :  { %v1820_v8 = vpop.permute.xlu0 %1819  ;;  %v1642_v52 = vpop.f32.mrf.mxu0 }
 0x51a   :  { %v6032_v38 = vand.u32 4294901760, %v1820_v8  ;;  %v1906_v9 = vand.u32 4294901760, %v1905_v49 }
 0x51b   :  { %v1688_v31 = vpop.f32.mrf.mxu1 }
 0x51c   :  { %v6036_v14 = vsub.f32 %v1820_v8, %v6032_v38  ;;  %1852 = vmatpush.msrb.mxu0 %v6032_v38  ;;  %2048 = vmatpush.msrb.mxu3 %v6032_v38  ;;  %v1912_v8 = vand.u32 4294901760, %v1911_v32 }
 0x51d   :  { %v1592_v55 = vpop.f32.mrf.mxu3 }
 0x51e   :  { %v7226_v39 = vand.u32 4294901760, %v6036_v14  ;;  %1854 = vmatpush.msrb.mxu0 %v6022_v7  ;;  %1996 = vmatpush.msrb.mxu2 %v6036_v14 }
 0x51f   :  { %2050 = vmatpush.msrb.mxu3 %v6022_v7 }
 0x520   :  { %1856 = vmatpush.msrb.mxu0 %v6024_v28  ;;  %1999 = vmatpush.msrb.mxu2 %v6027_v62  ;;  %v1899_v58 = vsub.f32 %v6036_v14, %v7226_v39 }
 0x521   :  { %2052 = vmatpush.msrb.mxu3 %v6024_v28 }
 0x522   :  { %2002 = vmatpush.msrb.mxu2 %v6030_v50  ;;  %v1900_v53 = vand.u32 4294901760, %v1899_v58  ;;  %v1647_v58 = vpop.f32.mrf.mxu0 }
 0x523   :  { %v1694_v45 = vpop.f32.mrf.mxu1 }
 0x524   :  { %1901 = vmatpush.msrb.mxu1 %v1900_v53 }
 0x525   :  { %v1507_v3 = vpop.f32.mrf.mxu2  ;;  %v1596_v35 = vpop.f32.mrf.mxu3 }
 0x526   :  { %1907 = vmatpush.msrb.mxu1 %v1906_v9  ;;  %v1593_v53 = vadd.f32 %v1592_v55, %v1507_v3  ;;  %v6091_v3 = vand.u32 4294901760, %v5994_v60 }
 0x528   :  { %1913 = vmatpush.msrb.mxu1 %v1912_v8  ;;  %v1643_v8 = vadd.f32 %v1642_v52, %v1593_v53 }
 0x52a   :  { %v1652_v9 = vpop.f32.mrf.mxu0  ;;  %v1689_v37 = vadd.f32 %v1688_v31, %v1643_v8  ;;  %v6107_v8 = vand.u32 4294901760, %v5980_v13 }
 0x52b   :  { %v1700_v36 = vpop.f32.mrf.mxu1 }
 0x52d   :  { %v1515_v39 = vpop.f32.mrf.mxu2  ;;  %v1600_v61 = vpop.f32.mrf.mxu3 }
 0x52e   :  { %v1597_v47 = vadd.f32 %v1596_v35, %v1515_v39 }
 0x530   :  { %v1648_v57 = vadd.f32 %v1647_v58, %v1597_v47 }
 0x532   :  { %v1695_v43 = vadd.f32 %v1694_v45, %v1648_v57  ;;  %v1657_v45 = vpop.f32.mrf.mxu0 }
 0x535   :  { %v1523_v51 = vpop.f32.mrf.mxu2  ;;  %v1604_v41 = vpop.f32.mrf.mxu3 }
 0x536   :  { %v1601_v23 = vadd.f32 %v1600_v61, %v1523_v51 }
 0x538   :  { %v1653_v40 = vadd.f32 %v1652_v9, %v1601_v23  ;;  %v1706_v23 = vpop.f32.mrf.mxu1  ;;  %v6102_v9 = vand.u32 4294901760, %v5988_v42 }
 0x53a   :  { %v1701_v12 = vadd.f32 %v1700_v36, %v1653_v40 }
 0x53d   :  { %v1531_v48 = vpop.f32.mrf.mxu2  ;;  %v1792_v26 = vpop.f32.mrf.mxu3 }
 0x53e   :  { %v1605_v27 = vadd.f32 %v1604_v41, %v1531_v48  ;;  %v6080_v41 = vand.u32 4294901760, %v6000_v63 }
 0x540   :  { %v1658_v51 = vadd.f32 %v1657_v45, %v1605_v27 }
 0x542   :  { %v1707_v57 = vadd.f32 %v1706_v23, %v1658_v51 }
 0x545   :  { %v1751_v24 = vpop.f32.mrf.mxu2  ;;  %v1796_v49 = vpop.f32.mrf.mxu3 }
 0x546   :  { %v1752_v34 = vadd.f32 %v1751_v24, %v1689_v37 }
 0x548   :  { %v1793_v61 = vadd.f32 %v1792_v26, %v1752_v34 }
 0x54d   :  { %v1755_v32 = vpop.f32.mrf.mxu2  ;;  %v1800_v35 = vpop.f32.mrf.mxu3 }
 0x54e   :  { %v1756_v22 = vadd.f32 %v1755_v32, %v1695_v43 }
 0x550   :  { %v1797_v25 = vadd.f32 %v1796_v49, %v1756_v22  ;;  %v1807_v22 = vmul.f32 2.0, %v1793_v61  ;;  %v6099_v49 = vsub.f32 %v6000_v63, %v6080_v41 }
 0x552   :  { %v1808_v18 = vmul.f32 2.0, %v1797_v25  ;;  %v1940_v61 = vand.u32 4294901760, %v6099_v49 }
 0x554   :  { %v1812_v39 = vsub.f32 %v1808_v18, %v5927_v59 }
 0x555   :  { %v1759_v47 = vpop.f32.mrf.mxu2  ;;  %v1804_v18 = vpop.f32.mrf.mxu3 }
 0x556   :  { %v1760_v55 = vadd.f32 %v1759_v47, %v1701_v12  ;;  %1833 = vrot.lane.b32.xlu2 %v1812_v39, %s5373_s28  ;;  %v1811_v12 = vsub.f32 %v1807_v22, %v5914_v56  ;;  %v6065_v27 = vand.u32 4294901760, %v1812_v39 }
 0x558   :  { %v1801_v52 = vadd.f32 %v1800_v35, %v1760_v55  ;;  %v6071_v31 = vand.u32 4294901760, %v1811_v12  ;;  %v6119_v35 = vsub.f32 %v5994_v60, %v6091_v3  ;;  %v6124_v55 = vand.u32 4294901760, %v5908_v30 }
 0x559   :  { %v6133_v60 = vsub.f32 %v5988_v42, %v6102_v9  ;;  %v6147_v42 = vsub.f32 %v5980_v13, %v6107_v8 }
 0x55a   :  { %v1809_v43 = vmul.f32 2.0, %v1801_v52  ;;  %v6139_v52 = vand.u32 4294901760, %v5904_v1  ;;  %v1946_v22 = vand.u32 4294901760, %v6119_v35  ;;  %v6161_v13 = vsub.f32 %v5908_v30, %v6124_v55 }
 0x55c   :  { %v1813_v25 = vsub.f32 %v1809_v43, %v5966_v29  ;;  %v6077_v29 = vsub.f32 %v1812_v39, %v6065_v27  ;;  %v6175_v30 = vsub.f32 %v5904_v1, %v6139_v52  ;;  %v1964_v1 = vand.u32 4294901760, %v6161_v13 }
 0x55d   :  { %v1763_v48 = vpop.f32.mrf.mxu2 }
 0x55e   :  { %v1764_v24 = vadd.f32 %v1763_v48, %v1707_v57  ;;  %1835 = vrot.lane.b32.xlu1 %v1813_v25, %s5373_s28  ;;  %v6062_v37 = vand.u32 4294901760, %v1813_v25  ;;  %v1928_v32 = vand.u32 4294901760, %v6077_v29  ;;  %v6153_v57 = vand.u32 4294901760, %v5900_v44 }
 0x55f   :  { %v1941_v48 = vsub.f32 %v6099_v49, %v1940_v61 }
 0x560   :  { %v1805_v36 = vadd.f32 %v1804_v18, %v1764_v24  ;;  %v6069_v34 = vsub.f32 %v1813_v25, %v6062_v37  ;;  %v1929_v51 = vsub.f32 %v6077_v29, %v1928_v32  ;;  %v1952_v24 = vand.u32 4294901760, %v6133_v60 }
 0x561   :  { %v6167_v18 = vand.u32 4294901760, %v5893_v54 }
 0x562   :  { %v1810_v40 = vmul.f32 2.0, %v1805_v36  ;;  %v1922_v58 = vand.u32 4294901760, %v6069_v34  ;;  %v1930_v25 = vand.u32 4294901760, %v1929_v51 }
 0x564   :  { %v1814_v26 = vsub.f32 %v1810_v40, %v5972_v46  ;;  %v6088_v46 = vsub.f32 %v1811_v12, %v6071_v31  ;;  %v1923_v63 = vsub.f32 %v6069_v34, %v1922_v58  ;;  %v1958_v40 = vand.u32 4294901760, %v6147_v42 }
 0x566   :  { %1837 = vrot.lane.b32.xlu0 %v1814_v26, %s5373_s28  ;;  %v6074_v59 = vand.u32 4294901760, %v1814_v26  ;;  %v1934_v47 = vand.u32 4294901760, %v6088_v46  ;;  %v1924_v43 = vand.u32 4294901760, %v1923_v63  ;;  %v6186_v63 = vsub.f32 %v5900_v44, %v6153_v57 }
 0x567   :  { %v1959_v51 = vsub.f32 %v6147_v42, %v1958_v40  ;;  %v1970_v44 = vand.u32 4294901760, %v6175_v30 }
 0x568   :  { %1858 = vmatpush.msrb.mxu0 %v6074_v59  ;;  %2054 = vmatpush.msrb.mxu3 %v6074_v59  ;;  %v6085_v56 = vsub.f32 %v1814_v26, %v6074_v59  ;;  %v1935_v23 = vsub.f32 %v6088_v46, %v1934_v47  ;;  %v1942_v26 = vand.u32 4294901760, %v1941_v48  ;;  %v1976_v48 = vand.u32 4294901760, %v6186_v63 }
 0x56a   :  { %1860 = vmatpush.msrb.mxu0 %v6062_v37  ;;  %2005 = vmatpush.msrb.mxu2 %v6085_v56  ;;  %v1916_v53 = vand.u32 4294901760, %v6085_v56  ;;  %v1936_v36 = vand.u32 4294901760, %v1935_v23 }
 0x56b   :  { %2056 = vmatpush.msrb.mxu3 %v6062_v37 }
 0x56c   :  { %1862 = vmatpush.msrb.mxu0 %v6065_v27  ;;  %2008 = vmatpush.msrb.mxu2 %v6069_v34  ;;  %v1917_v39 = vsub.f32 %v6085_v56, %v1916_v53 }
 0x56d   :  { %2058 = vmatpush.msrb.mxu3 %v6065_v27 }
 0x56e   :  { %1831 = vrot.lane.b32.xlu0 %v1811_v12, %s5373_s28  ;;  %1864 = vmatpush.msrb.mxu0 %v6071_v31  ;;  %v1918_v45 = vand.u32 4294901760, %v1917_v39  ;;  %v1947_v12 = vsub.f32 %v6119_v35, %v1946_v22  ;;  %v1953_v39 = vsub.f32 %v6133_v60, %v1952_v24 }
 0x56f   :  { %2011 = vmatpush.msrb.mxu2 %v6077_v29  ;;  %2060 = vmatpush.msrb.mxu3 %v6071_v31 }
 0x570   :  { %1866 = vmatpush.msrb.mxu0 %v6080_v41  ;;  %1919 = vmatpush.msrb.mxu1 %v1918_v45  ;;  %v1948_v45 = vand.u32 4294901760, %v1947_v12  ;;  %v1954_v23 = vand.u32 4294901760, %v1953_v39  ;;  %v1977_v39 = vsub.f32 %v6186_v63, %v1976_v48 }
 0x571   :  { %2014 = vmatpush.msrb.mxu2 %v6088_v46  ;;  %2062 = vmatpush.msrb.mxu3 %v6080_v41 }
 0x572   :  { %1868 = vmatpush.msrb.mxu0 %v6091_v3  ;;  %1925 = vmatpush.msrb.mxu1 %v1924_v43  ;;  %v1981_v43 = vsub.f32 %v5893_v54, %v6167_v18  ;;  %v1960_v54 = vand.u32 4294901760, %v1959_v51 }
 0x573   :  { %2017 = vmatpush.msrb.mxu2 %v6099_v49  ;;  %2064 = vmatpush.msrb.mxu3 %v6091_v3 }
 0x574   :  { %1870 = vmatpush.msrb.mxu0 %v6102_v9  ;;  %1931 = vmatpush.msrb.mxu1 %v1930_v25  ;;  %v1965_v25 = vsub.f32 %v6161_v13, %v1964_v1  ;;  %v1982_v12 = vand.u32 4294901760, %v1981_v43 }
 0x575   :  { %2020 = vmatpush.msrb.mxu2 %v6119_v35  ;;  %2066 = vmatpush.msrb.mxu3 %v6102_v9 }
 0x576   :  { %1872 = vmatpush.msrb.mxu0 %v6107_v8  ;;  %1937 = vmatpush.msrb.mxu1 %v1936_v36  ;;  %v1971_v36 = vsub.f32 %v6175_v30, %v1970_v44  ;;  %v1983_v51 = vsub.f32 %v1981_v43, %v1982_v12 }
 0x577   :  { %2023 = vmatpush.msrb.mxu2 %v6133_v60  ;;  %2068 = vmatpush.msrb.mxu3 %v6107_v8 }
 0x578   :  { %1874 = vmatpush.msrb.mxu0 %v6124_v55  ;;  %1943 = vmatpush.msrb.mxu1 %v1942_v26  ;;  %v1966_v26 = vand.u32 4294901760, %v1965_v25  ;;  %v7294_v25 = vand.u32 4294901760, %v6027_v62 }
 0x579   :  { %2026 = vmatpush.msrb.mxu2 %v6147_v42  ;;  %2070 = vmatpush.msrb.mxu3 %v6124_v55 }
 0x57a   :  { %1876 = vmatpush.msrb.mxu0 %v6139_v52  ;;  %1949 = vmatpush.msrb.mxu1 %v1948_v45  ;;  %v1972_v45 = vand.u32 4294901760, %v1971_v36  ;;  %v7299_v36 = vld [vmem:[#allocation3_spill] sm:$0xff] }
 0x57b   :  { %2029 = vmatpush.msrb.mxu2 %v6161_v13  ;;  %2072 = vmatpush.msrb.mxu3 %v6139_v52  ;;  %v7292_v13 = vand.u32 4294901760, %v6013_v2 }
 0x57c   :  { %1878 = vmatpush.msrb.mxu0 %v6153_v57  ;;  %1955 = vmatpush.msrb.mxu1 %v1954_v23  ;;  %v1978_v23 = vand.u32 4294901760, %v1977_v39  ;;  %v7302_v39 = vld [vmem:[#allocation7_spill] sm:$0xff] }
 0x57d   :  { %2032 = vmatpush.msrb.mxu2 %v6175_v30  ;;  %2074 = vmatpush.msrb.mxu3 %v6153_v57  ;;  %v7293_v30 = vand.u32 4294901760, %v6036_v14 }
 0x57e   :  { %1880 = vmatpush.msrb.mxu0 %v6167_v18  ;;  %1961 = vmatpush.msrb.mxu1 %v1960_v54  ;;  %v1984_v54 = vand.u32 4294901760, %v1983_v51  ;;  %v7305_v51 = vld [vmem:[#allocation18_spill] sm:$0xff] }
 0x57f   :  { %2035 = vmatpush.msrb.mxu2 %v6186_v63  ;;  %2076 = vmatpush.msrb.mxu3 %v6167_v18  ;;  %v7295_v63 = vand.u32 4294901760, %v6030_v50 }
 0x580   :  { %2087 = vmatpush.msra.mxu0 %v7292_v13  ;;  %1967 = vmatpush.msrb.mxu1 %v1966_v26  ;;  %v7301_v26 = vld [vmem:[#allocation13_spill] sm:$0xff]  ;;  %v7303_v13 = vld [vmem:[#allocation16_spill] sm:$0xff] }
 0x581   :  { %2038 = vmatpush.msrb.mxu2 %v1981_v43  ;;  %v7296_v43 = vld [vmem:[#allocation2_spill] sm:$0xff] }
 0x582   :  { %2091 = vmatpush.msra.mxu0 %v7293_v30  ;;  %1973 = vmatpush.msrb.mxu1 %v1972_v45  ;;  %v7304_v45 = vld [vmem:[#allocation4_spill] sm:$0xff]  ;;  %v7306_v30 = vld [vmem:[#allocation5_spill] sm:$0xff] }
 0x584   :  { %2095 = vmatpush.msra.mxu0 %v7294_v25  ;;  %1979 = vmatpush.msrb.mxu1 %v1978_v23  ;;  %v7307_v23 = vld [vmem:[#allocation19_spill] sm:$0xff]  ;;  %v7308_v25 = vld [vmem:[#allocation6_spill] sm:$0xff] }
 0x586   :  { %2099 = vmatpush.msra.mxu0 %v7295_v63  ;;  %1985 = vmatpush.msrb.mxu1 %v1984_v54  ;;  %v7309_v54 = vld [vmem:[#allocation20_spill] sm:$0xff]  ;;  %v7311_v63 = vld [vmem:[#allocation21_spill] sm:$0xff] }
 0x588   :  { %2154 = vmatpush.msra.mxu1 %v6010_v0  ;;  %2103 = vmatpush.msra.mxu0 %v1916_v53  ;;  %v1843_v0 = vld [vmem:[%s7212_s1 + $0x100] sm:$0xff] }
 0x589   :  { %v1881_v2 = vand.u32 4294901760, %v1843_v0 }
 0x58a   :  { %2156 = vmatpush.msra.mxu1 %v6032_v38  ;;  %2107 = vmatpush.msra.mxu0 %v1922_v58  ;;  %v1844_v38 = vld [vmem:[%s7212_s1 + $0x108] sm:$0xff] }
 0x58b   :  { %1987 = vmatmul.f32.vlgmr.msrb.gmra.mxu1 %v1881_v2  ;;  %v1847_v14 = vsel %vm24_vm0, %v1844_v38, 0 }
 0x58c   :  { %2158 = vmatpush.msra.mxu1 %v6022_v7  ;;  %2111 = vmatpush.msra.mxu0 %v1928_v32  ;;  %v1882_v7 = vsub.f32 %v1843_v0, %v1881_v2  ;;  %v2210_v34 = vand.u32 4294901760, %v1847_v14  ;;  %v7312_v0 = vld [vmem:[#allocation10_spill] sm:$0xff] }
 0x58e   :  { %2160 = vmatpush.msra.mxu1 %v6024_v28  ;;  %2115 = vmatpush.msra.mxu0 %v1934_v47  ;;  %v1883_v28 = vand.u32 4294901760, %v1882_v7  ;;  %v6260_v29 = vsub.f32 %v1847_v14, %v2210_v34 }
 0x58f   :  { %2041 = vmatmul.f32.vlgmr.msrb.gmra.mxu2 %v1882_v7 }
 0x590   :  { %2162 = vmatpush.msra.mxu1 %v6074_v59  ;;  %2119 = vmatpush.msra.mxu0 %v1940_v61  ;;  %v1884_v62 = vsub.f32 %v1882_v7, %v1883_v28  ;;  %v2212_v58 = vand.u32 4294901760, %v6260_v29  ;;  %v7314_v7 = vld [vmem:[#allocation15_spill] sm:$0xff] }
 0x591   :  { %2080 = vmatmul.f32.vlgmr.msrb.gmra.mxu3 %v1883_v28  ;;  %v7315_v28 = vld [vmem:[#allocation17_spill] sm:$0xff] }
 0x592   :  { %2164 = vmatpush.msra.mxu1 %v6062_v37  ;;  %2123 = vmatpush.msra.mxu0 %v1946_v22  ;;  %v1885_v50 = vand.u32 4294901760, %v1884_v62  ;;  %v1845_v62 = vld [vmem:[%s7212_s1 + $0x110] sm:$0xff] }
 0x594   :  { %2166 = vmatpush.msra.mxu1 %v6065_v27  ;;  %2127 = vmatpush.msra.mxu0 %v1952_v24 }
 0x595   :  { %1886 = vmatmul.f32.vlgmr.msrb.gmra.mxu0 %v1885_v50 }
 0x596   :  { %2168 = vmatpush.msra.mxu1 %v6071_v31  ;;  %2131 = vmatpush.msra.mxu0 %v1958_v40 }
 0x598   :  { %2170 = vmatpush.msra.mxu1 %v6080_v41  ;;  %2135 = vmatpush.msra.mxu0 %v1964_v1 }
 0x59a   :  { %2172 = vmatpush.msra.mxu1 %v6091_v3  ;;  %2139 = vmatpush.msra.mxu0 %v1970_v44  ;;  %v7297_v44 = vld [vmem:[#allocation12_spill] sm:$0xff] }
 0x59c   :  { %2174 = vmatpush.msra.mxu1 %v6102_v9  ;;  %2143 = vmatpush.msra.mxu0 %v1976_v48  ;;  %v7298_v48 = vld [vmem:[#allocation9_spill] sm:$0xff] }
 0x59e   :  { %2176 = vmatpush.msra.mxu1 %v6107_v8  ;;  %2147 = vmatpush.msra.mxu0 %v1982_v12  ;;  %v2213_v8 = vsub.f32 %v6260_v29, %v2212_v58  ;;  %v7300_v12 = vld [vmem:[#allocation14_spill] sm:$0xff] }
 0x59f   :  { %2149 = vmatmul.f32.vlgmr.msra.gmra.mxu0 %v1881_v2 }
 0x5a0   :  { %2178 = vmatpush.msra.mxu1 %v6124_v55  ;;  %v2214_v42 = vand.u32 4294901760, %v2213_v8 }
 0x5a2   :  { %2180 = vmatpush.msra.mxu1 %v6139_v52 }
 0x5a4   :  { %2182 = vmatpush.msra.mxu1 %v6153_v57 }
 0x5a6   :  { %2184 = vmatpush.msra.mxu1 %v6167_v18 }
 0x5a7   :  { %2186 = vmatmul.f32.vlgmr.msra.gmra.mxu1 %v1881_v2  ;;  %v7313_v2 = vld [vmem:[#allocation11_spill] sm:$0xff] }
 0x5b0   :  { %v1834_v27 = vpop.permute.xlu2 %1833 }
 0x5b1   :  { %v2206_v59 = vand.u32 4294901760, %v1834_v27 }
 0x5b3   :  { %v2244_v46 = vsub.f32 %v1834_v27, %v2206_v59 }
 0x5b5   :  { %v2245_v32 = vand.u32 4294901760, %v2244_v46 }
 0x5b7   :  { %v2246_v52 = vsub.f32 %v2244_v46, %v2245_v32 }
 0x5b9   :  { %v2247_v24 = vand.u32 4294901760, %v2246_v52 }
 0x5d0   :  { %v1836_v37 = vpop.permute.xlu1 %1835 }
 0x5d1   :  { %v2204_v31 = vand.u32 4294901760, %v1836_v37 }
 0x5d3   :  { %v2238_v41 = vsub.f32 %v1836_v37, %v2204_v31 }
 0x5d5   :  { %v2239_v49 = vand.u32 4294901760, %v2238_v41 }
 0x5d7   :  { %v2240_v47 = vsub.f32 %v2238_v41, %v2239_v49 }
 0x5d8   :  { %v1838_v56 = vpop.permute.xlu0 %1837 }
 0x5d9   :  { %v2202_v3 = vand.u32 4294901760, %v1838_v56  ;;  %v2241_v57 = vand.u32 4294901760, %v2240_v47 }
 0x5db   :  { %v2232_v53 = vsub.f32 %v1838_v56, %v2202_v3  ;;  %2203 = vmatpush.msra.mxu2 %v2202_v3  ;;  %2363 = vmatpush.msrb.mxu1 %v2202_v3 }
 0x5dd   :  { %v2233_v9 = vand.u32 4294901760, %v2232_v53  ;;  %2205 = vmatpush.msra.mxu2 %v2204_v31  ;;  %2365 = vmatpush.msrb.mxu1 %v2204_v31 }
 0x5df   :  { %v2234_v35 = vsub.f32 %v2232_v53, %v2233_v9  ;;  %2207 = vmatpush.msra.mxu2 %v2206_v59  ;;  %2332 = vmatpush.msrb.mxu0 %v2233_v9 }
 0x5e0   :  { %2367 = vmatpush.msrb.mxu1 %v2206_v59  ;;  %v1832_v55 = vpop.permute.xlu0 %1831 }
 0x5e1   :  { %v2235_v60 = vand.u32 4294901760, %v2234_v35  ;;  %v2208_v61 = vand.u32 4294901760, %v1832_v55  ;;  %2336 = vmatpush.msrb.mxu0 %v2239_v49 }
 0x5e3   :  { %v2250_v22 = vsub.f32 %v1832_v55, %v2208_v61  ;;  %2209 = vmatpush.msra.mxu2 %v2208_v61  ;;  %2236 = vmatpush.msra.mxu3 %v2235_v60 }
 0x5e4   :  { %2340 = vmatpush.msrb.mxu0 %v2245_v32  ;;  %2369 = vmatpush.msrb.mxu1 %v2208_v61 }
 0x5e5   :  { %2274 = vmatpush.msrb.mxu2 %v2232_v53  ;;  %2242 = vmatpush.msra.mxu3 %v2241_v57  ;;  %v2251_v18 = vand.u32 4294901760, %v2250_v22 }
 0x5e6   :  { %2215 = vmatmul.f32.vlgmr.msra.gmra.mxu2 %v2214_v42  ;;  %2371 = vmatmul.f32.vlgmr.msrb.gmra.mxu1 %v2210_v34 }
 0x5e7   :  { %2277 = vmatpush.msrb.mxu2 %v2238_v41  ;;  %2248 = vmatpush.msra.mxu3 %v2247_v24  ;;  %v2252_v40 = vsub.f32 %v2250_v22, %v2251_v18 }
 0x5e8   :  { %2344 = vmatpush.msrb.mxu0 %v2251_v18  ;;  %2524 = vmatpush.msra.mxu1 %v5410_v4 }
 0x5e9   :  { %2280 = vmatpush.msrb.mxu2 %v2244_v46  ;;  %v2253_v1 = vand.u32 4294901760, %v2252_v40  ;;  %2346 = vmatmul.f32.vlgmr.msrb.gmra.mxu0 %v2210_v34 }
 0x5ea   :  { %2487 = vmatpush.msra.mxu0 %v5438_v15  ;;  %2526 = vmatpush.msra.mxu1 %v5412_v5 }
 0x5eb   :  { %2283 = vmatpush.msrb.mxu2 %v2250_v22  ;;  %2254 = vmatpush.msra.mxu3 %v2253_v1 }
 0x5ec   :  { %2256 = vmatmul.f32.vlgmr.msra.gmra.mxu3 %v2210_v34  ;;  %2490 = vmatpush.msra.mxu0 %v5441_v16 }
 0x5ed   :  { %2392 = vmatpush.msra.mxu2 %v5410_v4  ;;  %2303 = vmatpush.msrb.mxu3 %v2202_v3 }
 0x5ee   :  { %2286 = vmatmul.f32.vlgmr.msrb.gmra.mxu2 %v6260_v29  ;;  %2528 = vmatpush.msra.mxu1 %v5414_v6 }
 0x5ef   :  { %2305 = vmatpush.msrb.mxu3 %v2204_v31  ;;  %2394 = vmatpush.msra.mxu2 %v5412_v5 }
 0x5f0   :  { %2493 = vmatpush.msra.mxu0 %v5444_v17  ;;  %2530 = vmatpush.msra.mxu1 %v5425_v10 }
 0x5f1   :  { %2307 = vmatpush.msrb.mxu3 %v2206_v59  ;;  %2396 = vmatpush.msra.mxu2 %v5414_v6 }
 0x5f2   :  { %2496 = vmatpush.msra.mxu0 %v5451_v19  ;;  %2532 = vmatpush.msra.mxu1 %v5427_v11 }
 0x5f3   :  { %2309 = vmatpush.msrb.mxu3 %v2208_v61  ;;  %2398 = vmatpush.msra.mxu2 %v5425_v10 }
 0x5f4   :  { %2313 = vmatmul.f32.vlgmr.msrb.gmra.mxu3 %v2212_v58  ;;  %2499 = vmatpush.msra.mxu0 %v5454_v20 }
 0x5f5   :  { %2429 = vmatpush.msra.mxu3 %v5494_v33  ;;  %2400 = vmatpush.msra.mxu2 %v5427_v11 }
 0x5f6   :  { %2502 = vmatpush.msra.mxu0 %v5457_v21  ;;  %2534 = vmatpush.msra.mxu1 %v7296_v43 }
 0x5f7   :  { %2435 = vmatpush.msra.mxu3 %v7297_v44  ;;  %2402 = vmatpush.msra.mxu2 %v7296_v43 }
 0x5f8   :  { %2505 = vmatpush.msra.mxu0 %v7298_v48  ;;  %2536 = vmatpush.msra.mxu1 %v7299_v36 }
 0x5f9   :  { %2441 = vmatpush.msra.mxu3 %v7300_v12  ;;  %2404 = vmatpush.msra.mxu2 %v7299_v36 }
 0x5fa   :  { %2508 = vmatpush.msra.mxu0 %v7301_v26  ;;  %2538 = vmatpush.msra.mxu1 %v7302_v39 }
 0x5fb   :  { %2447 = vmatpush.msra.mxu3 %v7303_v13  ;;  %2406 = vmatpush.msra.mxu2 %v7302_v39 }
 0x5fc   :  { %2669 = vmatpush.msrb.mxu1 %v5494_v33  ;;  %2632 = vmatpush.msrb.mxu0 %v5410_v4  ;;  %v7310_v33 = vld [vmem:[#allocation8_spill] sm:$0xff] }
 0x5fd   :  { %2557 = vmatpush.msrb.mxu2 %v7304_v45  ;;  %2453 = vmatpush.msra.mxu3 %v7305_v51 }
 0x5fe   :  { %2675 = vmatpush.msrb.mxu1 %v7297_v44  ;;  %2634 = vmatpush.msrb.mxu0 %v5412_v5 }
 0x5ff   :  { %2561 = vmatpush.msrb.mxu2 %v7306_v30  ;;  %2459 = vmatpush.msra.mxu3 %v7307_v23 }
 0x600   :  { %2681 = vmatpush.msrb.mxu1 %v7300_v12  ;;  %2636 = vmatpush.msrb.mxu0 %v5414_v6 }
 0x601   :  { %2565 = vmatpush.msrb.mxu2 %v7308_v25  ;;  %2465 = vmatpush.msra.mxu3 %v7309_v54 }
 0x602   :  { %2687 = vmatpush.msrb.mxu1 %v7303_v13  ;;  %2638 = vmatpush.msrb.mxu0 %v5425_v10 }
 0x603   :  { %2569 = vmatpush.msrb.mxu2 %v7310_v33  ;;  %2471 = vmatpush.msra.mxu3 %v7311_v63 }
 0x604   :  { %2693 = vmatpush.msrb.mxu1 %v7305_v51  ;;  %2640 = vmatpush.msrb.mxu0 %v5427_v11 }
 0x605   :  { %2600 = vmatpush.msrb.mxu3 %v5410_v4  ;;  %2573 = vmatpush.msrb.mxu2 %v7312_v0 }
 0x606   :  { %2699 = vmatpush.msrb.mxu1 %v7307_v23  ;;  %2642 = vmatpush.msrb.mxu0 %v7296_v43 }
 0x607   :  { %2602 = vmatpush.msrb.mxu3 %v5412_v5  ;;  %2577 = vmatpush.msrb.mxu2 %v7313_v2 }
 0x608   :  { %2705 = vmatpush.msrb.mxu1 %v7309_v54  ;;  %2644 = vmatpush.msrb.mxu0 %v7299_v36  ;;  %v1988_v14 = vpop.f32.mrf.mxu1 }
 0x609   :  { %2604 = vmatpush.msrb.mxu3 %v5414_v6  ;;  %2581 = vmatpush.msrb.mxu2 %v7314_v7 }
 0x60a   :  { %2711 = vmatpush.msrb.mxu1 %v7311_v63  ;;  %2646 = vmatpush.msrb.mxu0 %v7302_v39 }
 0x60b   :  { %2606 = vmatpush.msrb.mxu3 %v5425_v10  ;;  %2585 = vmatpush.msrb.mxu2 %v7315_v28 }
 0x60d   :  { %2608 = vmatpush.msrb.mxu3 %v5427_v11 }
 0x60f   :  { %2610 = vmatpush.msrb.mxu3 %v7296_v43 }
 0x611   :  { %2612 = vmatpush.msrb.mxu3 %v7299_v36 }
 0x612   :  { %v1887_v50 = vpop.f32.mrf.mxu0  ;;  %v2042_v27 = vpop.f32.mrf.mxu2 }
 0x613   :  { %2614 = vmatpush.msrb.mxu3 %v7302_v39  ;;  %v1888_v38 = vadd.f32 %v1887_v50, %v1845_v62 }
 0x614   :  { %v2081_v31 = vpop.f32.mrf.mxu3 }
 0x615   :  { %v1989_v37 = vadd.f32 %v1988_v14, %v1888_v38 }
 0x617   :  { %v2043_v34 = vadd.f32 %v2042_v27, %v1989_v37  ;;  %v2870_v37 = vld [vmem:[%s7212_s1 + $0x130] sm:$0xff] }
 0x619   :  { %v2082_v59 = vadd.f32 %v2081_v31, %v2043_v34  ;;  %v2882_v31 = vsel %vm2877_vm3, %v2870_v37, 0 }
 0x61c   :  { %v2150_v29 = vpop.f32.mrf.mxu0 }
 0x61d   :  { %v2151_v41 = vadd.f32 %v2150_v29, %v2082_v59 }
 0x624   :  { %v2187_v56 = vpop.f32.mrf.mxu1 }
 0x625   :  { %v2188_v3 = vadd.f32 %v2187_v56, %v2151_v41 }
 0x663   :  { %v2372_v55 = vpop.f32.mrf.mxu1 }
 0x666   :  { %v2347_v35 = vpop.f32.mrf.mxu0 }
 0x669   :  { %v2216_v46 = vpop.f32.mrf.mxu2 }
 0x66a   :  { %v2217_v58 = vadd.f32 %v2216_v46, %v2188_v3 }
 0x66f   :  { %v2257_v53 = vpop.f32.mrf.mxu3 }
 0x670   :  { %v2258_v49 = vadd.f32 %v2257_v53, %v2217_v58  ;;  %v6402_v53 = vand.u32 4294901760, %v2882_v31 }
 0x671   :  { %v2287_v9 = vpop.f32.mrf.mxu2 }
 0x672   :  { %v2288_v32 = vadd.f32 %v2287_v9, %v2258_v49 }
 0x677   :  { %v2314_v8 = vpop.f32.mrf.mxu3 }
 0x678   :  { %v2315_v47 = vadd.f32 %v2314_v8, %v2288_v32  ;;  %v2871_v8 = vld [vmem:[%s7212_s1 + $0x140] sm:$0xff] }
 0x67a   :  { %v2348_v60 = vadd.f32 %v2347_v35, %v2315_v47 }
 0x67c   :  { %v6332_v61 = vadd.f32 %v2372_v55, %v2348_v60 }
 0x67e   :  { %2376 = vrot.lane.b32.xlu1 %v6332_v61, %s5372_s11  ;;  %v6398_v46 = vand.u32 4294901760, %v6332_v61 }
 0x680   :  { %v2980_v35 = vsub.f32 %v6332_v61, %v6398_v46 }
 0x6f0   :  { %v2377_v52 = vpop.permute.xlu1 %2376 }
 0x6f1   :  { %v6338_v42 = vsel %vm24_vm0, %v6332_v61, %v2377_v52  ;;  %v2920_v52 = vsub.f32 %v2882_v31, %v6402_v53 }
 0x6f2   :  { %v2381_v22 = vsel %vm26_vm1, %v6338_v42, 0 }
 0x6f3   :  { %v2407_v57 = vand.u32 4294901760, %v2381_v22 }
 0x6f5   :  { %v2408_v24 = vsub.f32 %v2381_v22, %v2407_v57  ;;  %2473 = vmatmul.f32.vlgmr.msra.gmra.mxu3 %v2407_v57 }
 0x6f6   :  { %2764 = vmatpush.msra.mxu3 %v5410_v4 }
 0x6f7   :  { %v2409_v18 = vand.u32 4294901760, %v2408_v24  ;;  %2511 = vmatmul.f32.vlgmr.msra.gmra.mxu0 %v2408_v24 }
 0x6f8   :  { %2766 = vmatpush.msra.mxu3 %v5412_v5  ;;  %2797 = vmatpush.msra.mxu0 %v7304_v45 }
 0x6f9   :  { %v2410_v40 = vsub.f32 %v2408_v24, %v2409_v18  ;;  %2542 = vmatmul.f32.vlgmr.msra.gmra.mxu1 %v2409_v18  ;;  %v2981_v18 = vand.u32 4294901760, %v2980_v35 }
 0x6fa   :  { %2768 = vmatpush.msra.mxu3 %v5414_v6  ;;  %2840 = vmatpush.msra.mxu1 %v5410_v4 }
 0x6fb   :  { %v2411_v1 = vand.u32 4294901760, %v2410_v40  ;;  %2801 = vmatpush.msra.mxu0 %v7306_v30 }
 0x6fc   :  { %2770 = vmatpush.msra.mxu3 %v5425_v10  ;;  %2842 = vmatpush.msra.mxu1 %v5412_v5 }
 0x6fd   :  { %2412 = vmatmul.f32.vlgmr.msra.gmra.mxu2 %v2411_v1  ;;  %2616 = vmatmul.f32.vlgmr.msrb.gmra.mxu3 %v2407_v57 }
 0x6fe   :  { %2727 = vmatpush.msra.mxu2 %v5438_v15  ;;  %2772 = vmatpush.msra.mxu3 %v5427_v11 }
 0x6ff   :  { %2844 = vmatpush.msra.mxu1 %v5414_v6  ;;  %2805 = vmatpush.msra.mxu0 %v7308_v25 }
 0x700   :  { %2730 = vmatpush.msra.mxu2 %v5441_v16  ;;  %2774 = vmatpush.msra.mxu3 %v7296_v43 }
 0x701   :  { %2846 = vmatpush.msra.mxu1 %v5425_v10  ;;  %2809 = vmatpush.msra.mxu0 %v7310_v33 }
 0x702   :  { %2733 = vmatpush.msra.mxu2 %v5444_v17  ;;  %2776 = vmatpush.msra.mxu3 %v7299_v36 }
 0x703   :  { %2848 = vmatpush.msra.mxu1 %v5427_v11  ;;  %2813 = vmatpush.msra.mxu0 %v7312_v0 }
 0x704   :  { %2736 = vmatpush.msra.mxu2 %v5451_v19  ;;  %2778 = vmatpush.msra.mxu3 %v7302_v39 }
 0x705   :  { %2587 = vmatmul.f32.vlgmr.msrb.gmra.mxu2 %v2407_v57  ;;  %2850 = vmatpush.msra.mxu1 %v7296_v43 }
 0x706   :  { %2739 = vmatpush.msra.mxu2 %v5454_v20  ;;  %2817 = vmatpush.msra.mxu0 %v7313_v2 }
 0x707   :  { %2852 = vmatpush.msra.mxu1 %v7299_v36 }
 0x708   :  { %2742 = vmatpush.msra.mxu2 %v5457_v21  ;;  %2821 = vmatpush.msra.mxu0 %v7314_v7 }
 0x709   :  { %2854 = vmatpush.msra.mxu1 %v7302_v39 }
 0x70a   :  { %2745 = vmatpush.msra.mxu2 %v7298_v48  ;;  %2825 = vmatpush.msra.mxu0 %v7315_v28  ;;  %v2869_v28 = vld [vmem:[%s7212_s1 + $0x120] sm:$0xff] }
 0x70b   :  { %v2879_v62 = vsel %vm2877_vm3, %v2869_v28, 0 }
 0x70c   :  { %2748 = vmatpush.msra.mxu2 %v7301_v26  ;;  %v6382_v38 = vand.u32 4294901760, %v2879_v62 }
 0x70e   :  { %v2912_v34 = vsub.f32 %v2879_v62, %v6382_v38 }
 0x710   :  { %v2913_v58 = vand.u32 4294901760, %v2912_v34 }
 0x712   :  { %v2914_v60 = vsub.f32 %v2912_v34, %v2913_v58 }
 0x714   :  { %v2915_v1 = vand.u32 4294901760, %v2914_v60  ;;  %v2876_v60 = vld [vmem:[%s7212_s1 + $0x190] sm:$0xff] }
 0x774   :  { %v2512_v10 = vpop.f32.mrf.mxu0 }
 0x776   :  { %v2543_v15 = vpop.f32.mrf.mxu1 }
 0x778   :  { %v2474_v4 = vpop.f32.mrf.mxu3 }
 0x780   :  { %v2413_v5 = vpop.f32.mrf.mxu2  ;;  %v2617_v20 = vpop.f32.mrf.mxu3 }
 0x781   :  { %v2475_v6 = vadd.f32 %v2474_v4, %v2413_v5  ;;  %v2921_v4 = vand.u32 4294901760, %v2920_v52 }
 0x783   :  { %v2513_v11 = vadd.f32 %v2512_v10, %v2475_v6 }
 0x785   :  { %v2544_v16 = vadd.f32 %v2543_v15, %v2513_v11  ;;  %v2872_v11 = vld [vmem:[%s7212_s1 + $0x150] sm:$0xff] }
 0x788   :  { %v2588_v17 = vpop.f32.mrf.mxu2 }
 0x789   :  { %v2589_v19 = vadd.f32 %v2588_v17, %v2544_v16  ;;  %v2982_v16 = vsub.f32 %v2980_v35, %v2981_v18  ;;  %v2922_v17 = vsub.f32 %v2920_v52, %v2921_v4 }
 0x78b   :  { %v2618_v21 = vadd.f32 %v2617_v20, %v2589_v19  ;;  %v2888_v20 = vsel %vm2877_vm3, %v2872_v11, 0 }
 0x78d   :  { %v2621_v43 = vsel %vm26_vm1, %v2618_v21, 0  ;;  %2862 = vrot.lane.b32.xlu0 %v2618_v21, %s5373_s28  ;;  %v6394_v29 = vand.u32 4294901760, %v2618_v21 }
 0x78e   :  { %v2647_v44 = vand.u32 4294901760, %v2621_v43 }
 0x78f   :  { %v2974_v32 = vsub.f32 %v2618_v21, %v6394_v29 }
 0x790   :  { %2713 = vmatmul.f32.vlgmr.msrb.gmra.mxu1 %v2647_v44  ;;  %v2648_v48 = vsub.f32 %v2621_v43, %v2647_v44  ;;  %v2983_v43 = vand.u32 4294901760, %v2982_v16 }
 0x791   :  { %v2975_v24 = vand.u32 4294901760, %v2974_v32 }
 0x792   :  { %2751 = vmatmul.f32.vlgmr.msra.gmra.mxu2 %v2648_v48  ;;  %v2649_v36 = vand.u32 4294901760, %v2648_v48 }
 0x793   :  { %v2976_v10 = vsub.f32 %v2974_v32, %v2975_v24 }
 0x794   :  { %2782 = vmatmul.f32.vlgmr.msra.gmra.mxu3 %v2649_v36  ;;  %v2650_v12 = vsub.f32 %v2648_v48, %v2649_v36  ;;  %v2935_v36 = vand.u32 4294901760, %v2888_v20 }
 0x795   :  { %v2977_v21 = vand.u32 4294901760, %v2976_v10 }
 0x796   :  { %v2651_v26 = vand.u32 4294901760, %v2650_v12 }
 0x798   :  { %2652 = vmatmul.f32.vlgmr.msrb.gmra.mxu0 %v2651_v26  ;;  %2856 = vmatmul.f32.vlgmr.msra.gmra.mxu1 %v2647_v44  ;;  %v2936_v26 = vsub.f32 %v2888_v20, %v2935_v36 }
 0x7a0   :  { %2827 = vmatmul.f32.vlgmr.msra.gmra.mxu0 %v2647_v44  ;;  %v2923_v44 = vand.u32 4294901760, %v2922_v17 }
 0x7ff   :  { %v2863_v50 = vpop.permute.xlu0 %2862 }
 0x800   :  { %v6384_v14 = vand.u32 4294901760, %v2863_v50 }
 0x802   :  { %v2962_v59 = vsub.f32 %v2863_v50, %v6384_v14 }
 0x804   :  { %v2963_v49 = vand.u32 4294901760, %v2962_v59 }
 0x806   :  { %v2964_v57 = vsub.f32 %v2962_v59, %v2963_v49 }
 0x808   :  { %v2965_v6 = vand.u32 4294901760, %v2964_v57 }
 0x80d   :  { %v2714_v39 = vpop.f32.mrf.mxu1 }
 0x815   :  { %v2653_v13 = vpop.f32.mrf.mxu0  ;;  %v2752_v51 = vpop.f32.mrf.mxu2 }
 0x816   :  { %v2715_v45 = vadd.f32 %v2714_v39, %v2653_v13  ;;  %v2857_v63 = vpop.f32.mrf.mxu1  ;;  %v2937_v13 = vand.u32 4294901760, %v2936_v26 }
 0x817   :  { %v2783_v23 = vpop.f32.mrf.mxu3 }
 0x818   :  { %v2753_v30 = vadd.f32 %v2752_v51, %v2715_v45  ;;  %v2938_v45 = vsub.f32 %v2936_v26, %v2937_v13 }
 0x81a   :  { %v2784_v25 = vadd.f32 %v2783_v23, %v2753_v30  ;;  %v2939_v51 = vand.u32 4294901760, %v2938_v45  ;;  %v6441_v30 = vld [vmem:[%s7211_s0 + $0x8] sm:$0xff]  ;;  %v6446_v23 = vld [vmem:[%s7211_s0 + $0x10] sm:$0xff] }
 0x81d   :  { %v2828_v54 = vpop.f32.mrf.mxu0 }
 0x81e   :  { %v2829_v33 = vadd.f32 %v2828_v54, %v2784_v25  ;;  %v3416_v25 = vrot.slane %v6441_v30, 1  ;;  %v3417_v54 = vrot.slane %v6446_v23, 1 }
 0x820   :  { %v2858_v0 = vadd.f32 %v2857_v63, %v2829_v33  ;;  %v3423_v33 = vrot.slane %v6441_v30, 2  ;;  %v3424_v63 = vrot.slane %v6446_v23, 2 }
 0x822   :  { %v2860_v2 = vmul.f32 2.0, %v2858_v0  ;;  %v3418_v0 = vsel %vm3415_vm4, %v3416_v25, %v3417_v54  ;;  %v3428_v28 = vsel %vm3422_vm5, %v3424_v63, %v3423_v33 }
 0x823   :  { %3430 = vrot.lane.b32.xlu1 %v3418_v0, %s5374_s9 }
 0x824   :  { %v2861_v7 = vsub.f32 %v2860_v2, %v6338_v42  ;;  %v2885_v42 = vsel %vm2877_vm3, %v2871_v8, 0  ;;  %v3421_v2 = vsel %vm3415_vm4, %v3417_v54, %v3416_v25  ;;  %vm4085_vm3 = vcmask 785408  }
 0x825   :  { %v6420_v5 = vand.u32 4294901760, %v2885_v42  ;;  %3432 = vrot.lane.b32.xlu0 %v3421_v2, %s5374_s9 }
 0x826   :  { %2866 = vrot.lane.b32.xlu2 %v2861_v7, %s5373_s28  ;;  %v6389_v27 = vand.u32 4294901760, %v2861_v7 }
 0x827   :  { %v2928_v19 = vsub.f32 %v2885_v42, %v6420_v5 }
 0x828   :  { %v2968_v56 = vsub.f32 %v2861_v7, %v6389_v27  ;;  %v3425_v7 = vsel %vm3422_vm5, %v3423_v33, %v3424_v63 }
 0x829   :  { %v2929_v48 = vand.u32 4294901760, %v2928_v19 }
 0x82a   :  { %v2969_v47 = vand.u32 4294901760, %v2968_v56 }
 0x82b   :  { %v2930_v12 = vsub.f32 %v2928_v19, %v2929_v48  ;;  %3439 = vrot.lane.b32.xlu1 %v3428_v28, %s5372_s11 }
 0x82c   :  { %v2970_v61 = vsub.f32 %v2968_v56, %v2969_v47 }
 0x82d   :  { %v2931_v39 = vand.u32 4294901760, %v2930_v12 }
 0x82e   :  { %v2971_v15 = vand.u32 4294901760, %v2970_v61  ;;  %3437 = vrot.lane.b32.xlu2 %v3425_v7, %s5372_s11 }
 0x880   :  { %v2867_v41 = vpop.permute.xlu2 %2866 }
 0x881   :  { %v6400_v3 = vand.u32 4294901760, %v2867_v41 }
 0x883   :  { %v2956_v9 = vsub.f32 %v2867_v41, %v6400_v3  ;;  %2902 = vmatpush.msrb.mxu2 %v6400_v3  ;;  %3061 = vmatpush.msrb.mxu1 %v6400_v3 }
 0x885   :  { %v2957_v55 = vand.u32 4294901760, %v2956_v9  ;;  %2904 = vmatpush.msrb.mxu2 %v6384_v14  ;;  %3015 = vmatpush.msrb.mxu0 %v2956_v9 }
 0x886   :  { %3063 = vmatpush.msrb.mxu1 %v6384_v14 }
 0x887   :  { %v2958_v22 = vsub.f32 %v2956_v9, %v2957_v55  ;;  %2906 = vmatpush.msrb.mxu2 %v6389_v27  ;;  %3018 = vmatpush.msrb.mxu0 %v2962_v59 }
 0x888   :  { %3065 = vmatpush.msrb.mxu1 %v6389_v27 }
 0x889   :  { %v2959_v40 = vand.u32 4294901760, %v2958_v22  ;;  %2908 = vmatpush.msrb.mxu2 %v6394_v29  ;;  %3021 = vmatpush.msrb.mxu0 %v2968_v56 }
 0x88a   :  { %3067 = vmatpush.msrb.mxu1 %v6394_v29 }
 0x88b   :  { %2910 = vmatpush.msrb.mxu2 %v6398_v46  ;;  %2960 = vmatpush.msrb.mxu3 %v2959_v40  ;;  %v3181_v40 = vld [vmem:[%s7212_s1 + $0x1a0] sm:$0xff] }
 0x88c   :  { %3024 = vmatpush.msrb.mxu0 %v2974_v32  ;;  %3069 = vmatpush.msrb.mxu1 %v6398_v46  ;;  %v2873_v32 = vld [vmem:[%s7212_s1 + $0x160] sm:$0xff]  ;;  %v3186_v10 = vsel %vm24_vm0, %v3181_v40, 0 }
 0x88d   :  { %2916 = vmatmul.f32.vlgmr.msrb.gmra.mxu2 %v2915_v1  ;;  %2966 = vmatpush.msrb.mxu3 %v2965_v6 }
 0x88e   :  { %3109 = vmatpush.msra.mxu2 %v2957_v55  ;;  %3027 = vmatpush.msrb.mxu0 %v2980_v35 }
 0x88f   :  { %2972 = vmatpush.msrb.mxu3 %v2971_v15  ;;  %3030 = vmatmul.f32.vlgmr.msrb.gmra.mxu0 %v2912_v34 }
 0x890   :  { %3113 = vmatpush.msra.mxu2 %v2963_v49  ;;  %3073 = vmatmul.f32.vlgmr.msrb.gmra.mxu1 %v2913_v58  ;;  %v2874_v58 = vld [vmem:[%s7212_s1 + $0x170] sm:$0xff] }
 0x891   :  { %2978 = vmatpush.msrb.mxu3 %v2977_v21 }
 0x892   :  { %3117 = vmatpush.msra.mxu2 %v2969_v47 }
 0x893   :  { %2984 = vmatpush.msrb.mxu3 %v2983_v43 }
 0x894   :  { %3121 = vmatpush.msra.mxu2 %v2975_v24  ;;  %2986 = vmatmul.f32.vlgmr.msrb.gmra.mxu3 %v6382_v38 }
 0x895   :  { %2924 = vmatmul.f32.gmra.mxu2 %v2923_v44  ;;  %3155 = vmatpush.msra.mxu3 %v6400_v3 }
 0x896   :  { %3125 = vmatpush.msra.mxu2 %v2981_v18 }
 0x897   :  { %3157 = vmatpush.msra.mxu3 %v6384_v14  ;;  %3035 = vmatmul.f32.gmra.mxu0 %v2920_v52 }
 0x898   :  { %3079 = vmatmul.f32.gmra.mxu1 %v2921_v4 }
 0x899   :  { %3159 = vmatpush.msra.mxu3 %v6389_v27 }
 0x89b   :  { %3161 = vmatpush.msra.mxu3 %v6394_v29 }
 0x89c   :  { %2990 = vmatmul.f32.gmra.mxu3 %v6402_v53 }
 0x89d   :  { %2932 = vmatmul.f32.gmra.mxu2 %v2931_v39  ;;  %3163 = vmatpush.msra.mxu3 %v6398_v46  ;;  %v2875_v46 = vld [vmem:[%s7212_s1 + $0x180] sm:$0xff] }
 0x89f   :  { %3040 = vmatmul.f32.gmra.mxu0 %v2928_v19  ;;  %v6482_v19 = vand.u32 4294901760, %v3186_v10 }
 0x8a0   :  { %3085 = vmatmul.f32.gmra.mxu1 %v2929_v48 }
 0x8a4   :  { %2994 = vmatmul.f32.gmra.mxu3 %v6420_v5 }
 0x8a5   :  { %2940 = vmatmul.f32.gmra.mxu2 %v2939_v51 }
 0x8a7   :  { %3045 = vmatmul.f32.gmra.mxu0 %v2936_v26 }
 0x8a8   :  { %3091 = vmatmul.f32.gmra.mxu1 %v2937_v13  ;;  %v6488_v13 = vsub.f32 %v3186_v10, %v6482_v19  ;;  %v3454_v10 = vld [vmem:[%s7212_s1 + $0x210] sm:$0xff] }
 0x8aa   :  { %v3213_v2 = vand.u32 4294901760, %v6488_v13 }
 0x8ac   :  { %2998 = vmatmul.f32.gmra.mxu3 %v2935_v36 }
 0x8ad   :  { %3127 = vmatmul.f32.vlgmr.msra.gmra.mxu2 %v6382_v38 }
 0x8b4   :  { %3165 = vmatmul.f32.vlgmr.msra.gmra.mxu3 %v6382_v38 }
 0x8b5   :  { %3131 = vmatmul.f32.gmra.mxu2 %v6402_v53 }
 0x8bc   :  { %3169 = vmatmul.f32.gmra.mxu3 %v6402_v53 }
 0x8bd   :  { %3135 = vmatmul.f32.gmra.mxu2 %v6420_v5 }
 0x8c4   :  { %3173 = vmatmul.f32.gmra.mxu3 %v6420_v5 }
 0x8c5   :  { %3139 = vmatmul.f32.gmra.mxu2 %v2935_v36 }
 0x8cc   :  { %3177 = vmatmul.f32.gmra.mxu3 %v2935_v36  ;;  %v3182_v36 = vld [vmem:[%s7212_s1 + $0x1b0] sm:$0xff] }
 0x8cd   :  { %v3189_v54 = vsel %vm24_vm0, %v3182_v36, 0  ;;  %v6581_v36 = vand.u32 4294901760, %v3454_v10 }
 0x8ce   :  { %v6496_v7 = vand.u32 4294901760, %v3189_v54 }
 0x90c   :  { %v3031_v38 = vpop.f32.mrf.mxu0 }
 0x90d   :  { %v3074_v59 = vpop.f32.mrf.mxu1 }
 0x910   :  { %v2917_v62 = vpop.f32.mrf.mxu2 }
 0x911   :  { %v2918_v47 = vadd.f32 %v2917_v62, %v2873_v32  ;;  %v3459_v32 = vld [vmem:[%s7212_s1 + $0x238] sm:$0xff] }
 0x914   :  { %v3036_v56 = vpop.f32.mrf.mxu0 }
 0x915   :  { %v3080_v3 = vpop.f32.mrf.mxu1 }
 0x917   :  { %v2987_v50 = vpop.f32.mrf.mxu3 }
 0x918   :  { %v2925_v14 = vpop.f32.mrf.mxu2  ;;  %v2988_v57 = vadd.f32 %v2987_v50, %v2918_v47 }
 0x919   :  { %v2926_v8 = vadd.f32 %v2925_v14, %v2874_v58 }
 0x91a   :  { %v3032_v4 = vadd.f32 %v3031_v38, %v2988_v57  ;;  %v6508_v38 = vsub.f32 %v3189_v54, %v6496_v7  ;;  %v3451_v54 = vld [vmem:[%s7212_s1 + $0x1f8] sm:$0xff] }
 0x91c   :  { %v3041_v35 = vpop.f32.mrf.mxu0  ;;  %v3075_v20 = vadd.f32 %v3074_v59, %v3032_v4  ;;  %v3455_v4 = vld [vmem:[%s7212_s1 + $0x218] sm:$0xff] }
 0x91d   :  { %v3086_v42 = vpop.f32.mrf.mxu1 }
 0x91f   :  { %v2991_v37 = vpop.f32.mrf.mxu3 }
 0x920   :  { %v2933_v27 = vpop.f32.mrf.mxu2  ;;  %v2992_v52 = vadd.f32 %v2991_v37, %v2926_v8 }
 0x921   :  { %v2934_v49 = vadd.f32 %v2933_v27, %v2875_v46  ;;  %v3214_v27 = vsub.f32 %v6488_v13, %v3213_v2  ;;  %v3221_v46 = vand.u32 4294901760, %v6508_v38 }
 0x922   :  { %v3037_v1 = vadd.f32 %v3036_v56, %v2992_v52 }
 0x923   :  { %v3215_v56 = vand.u32 4294901760, %v3214_v27  ;;  %v3222_v52 = vsub.f32 %v6508_v38, %v3221_v46 }
 0x924   :  { %v3046_v11 = vpop.f32.mrf.mxu0  ;;  %v3081_v15 = vadd.f32 %v3080_v3, %v3037_v1  ;;  %v3431_v3 = vpop.permute.xlu1 %3430 }
 0x925   :  { %v3092_v48 = vpop.f32.mrf.mxu1  ;;  %v3444_v47 = vsel %vm3443_vm6, %v6441_v30, %v3431_v3 }
 0x927   :  { %v2995_v34 = vpop.f32.mrf.mxu3 }
 0x928   :  { %v2941_v31 = vpop.f32.mrf.mxu2  ;;  %v2996_v55 = vadd.f32 %v2995_v34, %v2934_v49 }
 0x929   :  { %v2942_v24 = vadd.f32 %v2941_v31, %v2876_v60  ;;  %v3456_v60 = vld [vmem:[%s7212_s1 + $0x220] sm:$0xff] }
 0x92a   :  { %v3042_v61 = vadd.f32 %v3041_v35, %v2996_v55  ;;  %v3438_v55 = vpop.permute.xlu2 %3437 }
 0x92c   :  { %v3087_v5 = vadd.f32 %v3086_v42, %v3042_v61  ;;  %v3446_v61 = vsel %vm24_vm0, %v3444_v47, %v3438_v55 }
 0x92f   :  { %v2999_v29 = vpop.f32.mrf.mxu3 }
 0x930   :  { %v3128_v41 = vpop.f32.mrf.mxu2  ;;  %v3000_v6 = vadd.f32 %v2999_v29, %v2942_v24  ;;  %v6544_v24 = vand.u32 4294901760, %v3459_v32 }
 0x931   :  { %v3129_v12 = vadd.f32 %v3128_v41, %v3075_v20  ;;  %v3452_v20 = vld [vmem:[%s7212_s1 + $0x200] sm:$0xff] }
 0x932   :  { %v3047_v21 = vadd.f32 %v3046_v11, %v3000_v6  ;;  %v3433_v11 = vpop.permute.xlu0 %3432 }
 0x934   :  { %v3093_v45 = vadd.f32 %v3092_v48, %v3047_v21 }
 0x937   :  { %v3166_v53 = vpop.f32.mrf.mxu3 }
 0x938   :  { %v3132_v9 = vpop.f32.mrf.mxu2  ;;  %v3167_v51 = vadd.f32 %v3166_v53, %v3129_v12  ;;  %v3450_v12 = vld [vmem:[%s7212_s1 + $0x1f0] sm:$0xff] }
 0x939   :  { %v3133_v43 = vadd.f32 %v3132_v9, %v3081_v15  ;;  %v3458_v9 = vld [vmem:[%s7212_s1 + $0x230] sm:$0xff] }
 0x93a   :  { %v6498_v28 = vand.u32 4294901760, %v3167_v51  ;;  %v6538_v42 = vand.u32 4294901760, %v3458_v9 }
 0x93c   :  { %v6511_v34 = vsub.f32 %v3167_v51, %v6498_v28  ;;  %v6556_v6 = vsub.f32 %v3458_v9, %v6538_v42 }
 0x93e   :  { %v3260_v49 = vand.u32 4294901760, %v6511_v34  ;;  %v3522_v21 = vand.u32 4294901760, %v6556_v6 }
 0x93f   :  { %v3170_v22 = vpop.f32.mrf.mxu3 }
 0x940   :  { %v3136_v18 = vpop.f32.mrf.mxu2  ;;  %v3171_v26 = vadd.f32 %v3170_v22, %v3133_v43  ;;  %v3457_v22 = vld [vmem:[%s7212_s1 + $0x228] sm:$0xff]  ;;  %v3261_v57 = vsub.f32 %v6511_v34, %v3260_v49  ;;  %v6572_v43 = vand.u32 4294901760, %v3455_v4 }
 0x941   :  { %v3137_v16 = vadd.f32 %v3136_v18, %v3087_v5  ;;  %v6548_v18 = vand.u32 4294901760, %v3456_v60  ;;  %v6550_v1 = vand.u32 4294901760, %v3457_v22  ;;  %v3223_v5 = vand.u32 4294901760, %v3222_v52 }
 0x942   :  { %v6493_v33 = vand.u32 4294901760, %v3171_v26  ;;  %v3262_v15 = vand.u32 4294901760, %v3261_v57  ;;  %v6619_v27 = vsub.f32 %v3455_v4, %v6572_v43 }
 0x943   :  { %v6579_v48 = vsub.f32 %v3456_v60, %v6548_v18 }
 0x944   :  { %v3253_v14 = vsub.f32 %v3171_v26, %v6493_v33  ;;  %v3445_v26 = vsel %vm3443_vm6, %v6446_v23, %v3433_v11  ;;  %v6602_v23 = vand.u32 4294901760, %v3452_v20 }
 0x946   :  { %v3254_v41 = vand.u32 4294901760, %v3253_v14 }
 0x947   :  { %v3174_v17 = vpop.f32.mrf.mxu3 }
 0x948   :  { %v3175_v44 = vadd.f32 %v3174_v17, %v3137_v16  ;;  %v3140_v39 = vpop.f32.mrf.mxu2  ;;  %v3255_v35 = vsub.f32 %v3253_v14, %v3254_v41  ;;  %v3466_v16 = vsel %vm3464_vm7, %v3446_v61, 0  ;;  %v6564_v17 = vsub.f32 %v3459_v32, %v6544_v24 }
 0x949   :  { %v3141_v63 = vadd.f32 %v3140_v39, %v3093_v45  ;;  %v3440_v39 = vpop.permute.xlu1 %3439  ;;  %v6589_v45 = vsub.f32 %v3457_v22, %v6550_v1  ;;  %v6592_v51 = vand.u32 4294901760, %v3466_v16 }
 0x94a   :  { %v6490_v25 = vand.u32 4294901760, %v3175_v44  ;;  %v3256_v40 = vand.u32 4294901760, %v3255_v35 }
 0x94c   :  { %v3247_v62 = vsub.f32 %v3175_v44, %v6490_v25  ;;  %v3453_v44 = vld [vmem:[%s7212_s1 + $0x208] sm:$0xff] }
 0x94e   :  { %v3248_v59 = vand.u32 4294901760, %v3247_v62 }
 0x94f   :  { %v3178_v0 = vpop.f32.mrf.mxu3 }
 0x950   :  { %v3179_v50 = vadd.f32 %v3178_v0, %v3141_v63  ;;  %v3249_v53 = vsub.f32 %v3247_v62, %v3248_v59  ;;  %v6600_v63 = vsub.f32 %v3454_v10, %v6581_v36  ;;  %v3448_v0 = vld [vmem:[%s7212_s1 + $0x1e0] sm:$0xff] }
 0x952   :  { %v6502_v37 = vand.u32 4294901760, %v3179_v50  ;;  %v3250_v30 = vand.u32 4294901760, %v3249_v53  ;;  %v3528_v53 = vand.u32 4294901760, %v6579_v48  ;;  %v3534_v47 = vand.u32 4294901760, %v6600_v63 }
 0x954   :  { %v3241_v31 = vsub.f32 %v3179_v50, %v6502_v37  ;;  %3204 = vmatpush.msra.mxu0 %v6502_v37  ;;  %3391 = vmatpush.msrb.mxu3 %v6502_v37  ;;  %v6611_v50 = vand.u32 4294901760, %v3450_v12  ;;  %v3529_v22 = vsub.f32 %v6579_v48, %v3528_v53  ;;  %v3535_v4 = vsub.f32 %v6600_v63, %v3534_v47 }
 0x956   :  { %v3242_v29 = vand.u32 4294901760, %v3241_v31  ;;  %3206 = vmatpush.msra.mxu0 %v6490_v25  ;;  %3393 = vmatpush.msrb.mxu3 %v6490_v25  ;;  %v3530_v11 = vand.u32 4294901760, %v3529_v22 }
 0x958   :  { %v3243_v58 = vsub.f32 %v3241_v31, %v3242_v29  ;;  %3208 = vmatpush.msra.mxu0 %v6493_v33  ;;  %3356 = vmatpush.msrb.mxu2 %v3242_v29  ;;  %v3449_v29 = vld [vmem:[%s7212_s1 + $0x1e8] sm:$0xff] }
 0x959   :  { %3395 = vmatpush.msrb.mxu3 %v6493_v33  ;;  %v6655_v32 = vand.u32 4294901760, %v3449_v29 }
 0x95a   :  { %3210 = vmatpush.msra.mxu0 %v6498_v28  ;;  %3360 = vmatpush.msrb.mxu2 %v3248_v59  ;;  %v3244_v8 = vand.u32 4294901760, %v3243_v58  ;;  %v6627_v59 = vand.u32 4294901760, %v3451_v54 }
 0x95b   :  { %3397 = vmatpush.msrb.mxu3 %v6498_v28  ;;  %3216 = vmatmul.f32.vlgmr.msra.gmra.mxu0 %v3215_v56  ;;  %v6639_v56 = vand.u32 4294901760, %v3448_v0  ;;  %v6688_v61 = vsub.f32 %v3449_v29, %v6655_v32 }
 0x95c   :  { %3287 = vmatpush.msrb.mxu0 %v3241_v31  ;;  %3245 = vmatpush.msra.mxu1 %v3244_v8  ;;  %v3770_v31 = vand.u32 4294901760, %v6589_v45  ;;  %v6667_v55 = vsub.f32 %v3451_v54, %v6627_v59 }
 0x95d   :  { %3364 = vmatpush.msrb.mxu2 %v3254_v41  ;;  %3399 = vmatmul.f32.vlgmr.msrb.gmra.mxu3 %v6482_v19  ;;  %v6633_v41 = vsub.f32 %v3466_v16, %v6592_v51  ;;  %v6660_v8 = vsub.f32 %v3448_v0, %v6639_v56 }
 0x95e   :  { %3290 = vmatpush.msrb.mxu0 %v3247_v62  ;;  %3251 = vmatpush.msra.mxu1 %v3250_v30  ;;  %v6608_v62 = vand.u32 4294901760, %v3453_v44  ;;  %v3771_v35 = vsub.f32 %v6589_v45, %v3770_v31 }
 0x95f   :  { %3368 = vmatpush.msrb.mxu2 %v3260_v49  ;;  %3615 = vmatpush.msra.mxu3 %v6538_v42  ;;  %v6670_v60 = vand.u32 4294901760, %v6633_v41  ;;  %v3552_v54 = vand.u32 4294901760, %v6660_v8 }
 0x960   :  { %3293 = vmatpush.msrb.mxu0 %v3253_v14  ;;  %3257 = vmatpush.msra.mxu1 %v3256_v40  ;;  %v3447_v14 = vsel %vm24_vm0, %v3445_v26, %v3440_v39  ;;  %v6650_v49 = vsub.f32 %v3453_v44, %v6608_v62  ;;  %v3772_v40 = vand.u32 4294901760, %v3771_v35  ;;  %v3536_v26 = vand.u32 4294901760, %v3535_v4 }
 0x961   :  { %3370 = vmatmul.f32.vlgmr.msrb.gmra.mxu2 %v6482_v19  ;;  %3617 = vmatpush.msra.mxu3 %v6548_v18  ;;  %v3469_v3 = vsel %vm3464_vm7, %v3447_v14, 0  ;;  %v3496_v0 = vsub.f32 %v6633_v41, %v6670_v60 }
 0x962   :  { %3296 = vmatpush.msrb.mxu0 %v6511_v34  ;;  %3263 = vmatpush.msra.mxu1 %v3262_v15  ;;  %v6624_v34 = vsub.f32 %v3452_v20, %v6602_v23  ;;  %v3782_v30 = vand.u32 4294901760, %v6650_v49 }
 0x963   :  { %3224 = vmatmul.f32.gmra.mxu0 %v3223_v5  ;;  %3265 = vmatmul.f32.vlgmr.msra.gmra.mxu1 %v6482_v19  ;;  %v3764_v19 = vand.u32 4294901760, %v6564_v17  ;;  %v3788_v5 = vand.u32 4294901760, %v6667_v55 }
 0x964   :  { %3321 = vmatpush.msrb.mxu1 %v6502_v37  ;;  %3577 = vmatpush.msra.mxu2 %v6556_v6  ;;  %v3523_v37 = vsub.f32 %v6556_v6, %v3522_v21  ;;  %v3540_v57 = vand.u32 4294901760, %v6624_v34  ;;  %v3783_v15 = vsub.f32 %v6650_v49, %v3782_v30 }
 0x965   :  { %3403 = vmatmul.f32.gmra.mxu3 %v6496_v7  ;;  %3482 = vmatpush.msra.mxu0 %v6538_v42  ;;  %v3765_v58 = vsub.f32 %v6564_v17, %v3764_v19  ;;  %v3789_v39 = vsub.f32 %v6667_v55, %v3788_v5 }
 0x966   :  { %3323 = vmatpush.msrb.mxu1 %v6490_v25  ;;  %3580 = vmatpush.msra.mxu2 %v6579_v48  ;;  %v6637_v25 = vsub.f32 %v3450_v12, %v6611_v50  ;;  %v3524_v9 = vand.u32 4294901760, %v3523_v37  ;;  %v3541_v16 = vsub.f32 %v6624_v34, %v3540_v57  ;;  %v3794_v12 = vand.u32 4294901760, %v6688_v61 }
 0x967   :  { %3619 = vmatpush.msra.mxu3 %v6581_v36  ;;  %3484 = vmatpush.msra.mxu0 %v6548_v18  ;;  %v3766_v52 = vand.u32 4294901760, %v3765_v58  ;;  %v3784_v37 = vand.u32 4294901760, %v3783_v15 }
 0x968   :  { %3325 = vmatpush.msrb.mxu1 %v6493_v33  ;;  %3583 = vmatpush.msra.mxu2 %v6600_v63  ;;  %v3776_v33 = vand.u32 4294901760, %v6619_v27  ;;  %v3546_v20 = vand.u32 4294901760, %v6637_v25  ;;  %v3542_v29 = vand.u32 4294901760, %v3541_v16  ;;  %v3795_v58 = vsub.f32 %v6688_v61, %v3794_v12 }
 0x969   :  { %3374 = vmatmul.f32.gmra.mxu2 %v6496_v7  ;;  %3621 = vmatpush.msra.mxu3 %v6602_v23 }
 0x96a   :  { %3327 = vmatpush.msrb.mxu1 %v6498_v28  ;;  %3586 = vmatpush.msra.mxu2 %v6624_v34  ;;  %v6674_v28 = vand.u32 4294901760, %v3469_v3  ;;  %v3796_v35 = vand.u32 4294901760, %v3795_v58 }
 0x96b   :  { %3269 = vmatmul.f32.gmra.mxu1 %v6496_v7  ;;  %3299 = vmatmul.f32.vlgmr.msrb.gmra.mxu0 %v6488_v13  ;;  %v3777_v7 = vsub.f32 %v6619_v27, %v3776_v33  ;;  %v3790_v13 = vand.u32 4294901760, %v3789_v39 }
 0x96c   :  { %3589 = vmatpush.msra.mxu2 %v6637_v25  ;;  %3623 = vmatpush.msra.mxu3 %v6611_v50  ;;  %v6697_v10 = vsub.f32 %v3469_v3, %v6674_v28  ;;  %v3547_v3 = vsub.f32 %v6637_v25, %v3546_v20 }
 0x96d   :  { %3486 = vmatpush.msra.mxu0 %v6581_v36  ;;  %3525 = vmatpush.msra.mxu1 %v3524_v9  ;;  %v3778_v44 = vand.u32 4294901760, %v3777_v7  ;;  %v3497_v9 = vand.u32 4294901760, %v3496_v0 }
 0x96e   :  { %3592 = vmatpush.msra.mxu2 %v6660_v8  ;;  %3625 = vmatpush.msra.mxu3 %v6639_v56  ;;  %v6723_v14 = vand.u32 4294901760, %v6697_v10  ;;  %v3548_v25 = vand.u32 4294901760, %v3547_v3 }
 0x96f   :  { %3629 = vmatmul.f32.vlgmr.msra.gmra.mxu3 %v6670_v60  ;;  %3488 = vmatpush.msra.mxu0 %v6602_v23 }
 0x970   :  { %3724 = vmatpush.msrb.mxu2 %v6544_v24  ;;  %3767 = vmatpush.msrb.mxu3 %v3766_v52 }
 0x971   :  { %3595 = vmatmul.f32.vlgmr.msra.gmra.mxu2 %v6633_v41  ;;  %3490 = vmatpush.msra.mxu0 %v6611_v50 }
 0x972   :  { %3726 = vmatpush.msrb.mxu2 %v6550_v1  ;;  %3773 = vmatpush.msrb.mxu3 %v3772_v40 }
 0x973   :  { %3304 = vmatmul.f32.gmra.mxu0 %v6508_v38  ;;  %3331 = vmatmul.f32.vlgmr.msrb.gmra.mxu1 %v3213_v2  ;;  %v3553_v2 = vsub.f32 %v6660_v8, %v3552_v54 }
 0x974   :  { %3492 = vmatpush.msra.mxu0 %v6639_v56  ;;  %3531 = vmatpush.msra.mxu1 %v3530_v11 }
 0x975   :  { %3728 = vmatpush.msrb.mxu2 %v6572_v43  ;;  %3779 = vmatpush.msrb.mxu3 %v3778_v44  ;;  %v3554_v6 = vand.u32 4294901760, %v3553_v2 }
 0x976   :  { %3537 = vmatpush.msra.mxu1 %v3536_v26  ;;  %3652 = vmatpush.msrb.mxu0 %v3522_v21  ;;  %v3504_v21 = vsub.f32 %v6697_v10, %v6723_v14 }
 0x977   :  { %3635 = vmatmul.f32.gmra.mxu3 %v6723_v14  ;;  %3730 = vmatpush.msrb.mxu2 %v6608_v62 }
 0x978   :  { %3785 = vmatpush.msrb.mxu3 %v3784_v37  ;;  %3543 = vmatpush.msra.mxu1 %v3542_v29  ;;  %v3505_v48 = vand.u32 4294901760, %v3504_v21 }
 0x979   :  { %3600 = vmatmul.f32.gmra.mxu2 %v6697_v10  ;;  %3656 = vmatpush.msrb.mxu0 %v3528_v53 }
 0x97a   :  { %3732 = vmatpush.msrb.mxu2 %v6627_v59  ;;  %3791 = vmatpush.msrb.mxu3 %v3790_v13 }
 0x97b   :  { %3337 = vmatmul.f32.gmra.mxu1 %v3221_v46  ;;  %3498 = vmatmul.f32.vlgmr.msra.gmra.mxu0 %v3497_v9  ;;  %v3183_v46 = vld [vmem:[%s7212_s1 + $0x1c0] sm:$0xff] }
 0x97c   :  { %3549 = vmatpush.msra.mxu1 %v3548_v25  ;;  %3734 = vmatpush.msrb.mxu2 %v6655_v32 }
 0x97d   :  { %3797 = vmatpush.msrb.mxu3 %v3796_v35  ;;  %3660 = vmatpush.msrb.mxu0 %v3534_v47  ;;  %v3460_v47 = vld [vmem:[%s7212_s1 + $0x240] sm:$0xff] }
 0x97e   :  { %3555 = vmatpush.msra.mxu1 %v3554_v6  ;;  %3894 = vmatpush.msra.mxu2 %v3764_v19 }
 0x97f   :  { %3799 = vmatmul.f32.vlgmr.msrb.gmra.mxu3 %v6592_v51  ;;  %3664 = vmatpush.msrb.mxu0 %v3540_v57 }
 0x980   :  { %3935 = vmatpush.msra.mxu3 %v6544_v24  ;;  %3693 = vmatpush.msrb.mxu1 %v6538_v42 }
 0x981   :  { %3740 = vmatmul.f32.vlgmr.msrb.gmra.mxu2 %v3497_v9  ;;  %3668 = vmatpush.msrb.mxu0 %v3546_v20 }
 0x982   :  { %3898 = vmatpush.msra.mxu2 %v3770_v31  ;;  %3937 = vmatpush.msra.mxu3 %v6550_v1 }
 0x983   :  { %3506 = vmatmul.f32.gmra.mxu0 %v3505_v48  ;;  %3557 = vmatmul.f32.vlgmr.msra.gmra.mxu1 %v6592_v51 }
 0x984   :  { %3672 = vmatpush.msrb.mxu0 %v3552_v54  ;;  %3695 = vmatpush.msrb.mxu1 %v6548_v18 }
 0x985   :  { %3902 = vmatpush.msra.mxu2 %v3776_v33  ;;  %3939 = vmatpush.msra.mxu3 %v6572_v43 }
 0x986   :  { %3697 = vmatpush.msrb.mxu1 %v6581_v36  ;;  %3819 = vmatpush.msra.mxu0 %v6564_v17  ;;  %v3184_v17 = vld [vmem:[%s7212_s1 + $0x1d0] sm:$0xff] }
 0x987   :  { %3803 = vmatmul.f32.gmra.mxu3 %v6674_v28  ;;  %3906 = vmatpush.msra.mxu2 %v3782_v30  ;;  %v3462_v30 = vld [vmem:[%s7212_s1 + $0x250] sm:$0xff] }
 0x988   :  { %3941 = vmatpush.msra.mxu3 %v6608_v62  ;;  %3699 = vmatpush.msrb.mxu1 %v6602_v23 }
 0x989   :  { %3748 = vmatmul.f32.gmra.mxu2 %v3505_v48  ;;  %3822 = vmatpush.msra.mxu0 %v6589_v45 }
 0x98a   :  { %3910 = vmatpush.msra.mxu2 %v3788_v5  ;;  %3943 = vmatpush.msra.mxu3 %v6627_v59 }
 0x98b   :  { %3561 = vmatmul.f32.gmra.mxu1 %v6674_v28  ;;  %3674 = vmatmul.f32.vlgmr.msrb.gmra.mxu0 %v6592_v51 }
 0x98c   :  { %3701 = vmatpush.msrb.mxu1 %v6611_v50  ;;  %3914 = vmatpush.msra.mxu2 %v3794_v12 }
 0x98d   :  { %3945 = vmatpush.msra.mxu3 %v6655_v32  ;;  %3825 = vmatpush.msra.mxu0 %v6619_v27 }
 0x98e   :  { %3703 = vmatpush.msrb.mxu1 %v6639_v56 }
 0x98f   :  { %3947 = vmatmul.f32.vlgmr.msra.gmra.mxu3 %v6592_v51  ;;  %3828 = vmatpush.msra.mxu0 %v6650_v49 }
 0x990   :  { %3857 = vmatpush.msra.mxu1 %v6544_v24 }
 0x991   :  { %3916 = vmatmul.f32.vlgmr.msra.gmra.mxu2 %v6592_v51  ;;  %3831 = vmatpush.msra.mxu0 %v6667_v55 }
 0x992   :  { %3859 = vmatpush.msra.mxu1 %v6550_v1 }
 0x993   :  { %3678 = vmatmul.f32.gmra.mxu0 %v6674_v28  ;;  %3705 = vmatmul.f32.vlgmr.msrb.gmra.mxu1 %v6592_v51 }
 0x994   :  { %3834 = vmatpush.msra.mxu0 %v6688_v61  ;;  %3861 = vmatpush.msra.mxu1 %v6572_v43 }
 0x996   :  { %3863 = vmatpush.msra.mxu1 %v6608_v62 }
 0x997   :  { %3951 = vmatmul.f32.gmra.mxu3 %v6674_v28 }
 0x998   :  { %3865 = vmatpush.msra.mxu1 %v6627_v59 }
 0x999   :  { %3920 = vmatmul.f32.gmra.mxu2 %v6674_v28 }
 0x99a   :  { %3867 = vmatpush.msra.mxu1 %v6655_v32 }
 0x99b   :  { %3709 = vmatmul.f32.gmra.mxu1 %v6674_v28  ;;  %3837 = vmatmul.f32.vlgmr.msra.gmra.mxu0 %v6633_v41 }
 0x9a3   :  { %3842 = vmatmul.f32.gmra.mxu0 %v6697_v10  ;;  %3871 = vmatmul.f32.vlgmr.msra.gmra.mxu1 %v6670_v60 }
 0x9ab   :  { %3877 = vmatmul.f32.gmra.mxu1 %v6723_v14  ;;  %v6823_v14 = vld [vmem:[%s7212_s1 + $0x410] sm:$0xff] }
 0x9ac   :  { %4021 = vrot.lane.b32.xlu1 %v6823_v14, %s5372_s11 }
 0x9d8   :  { %v3217_v38 = vpop.f32.mrf.mxu0 }
 0x9d9   :  { %v3218_v42 = vadd.f32 %v3217_v38, %v3183_v46 }
 0x9e0   :  { %v3225_v24 = vpop.f32.mrf.mxu0  ;;  %v3266_v18 = vpop.f32.mrf.mxu1 }
 0x9e1   :  { %v3267_v1 = vadd.f32 %v3266_v18, %v3218_v42  ;;  %v3226_v43 = vadd.f32 %v3225_v24, %v3184_v17  ;;  %v3400_v34 = vpop.f32.mrf.mxu3 }
 0x9e4   :  { %v3371_v23 = vpop.f32.mrf.mxu2 }
 0x9e8   :  { %v3270_v36 = vpop.f32.mrf.mxu1  ;;  %v3300_v45 = vpop.f32.mrf.mxu0 }
 0x9e9   :  { %v3271_v51 = vadd.f32 %v3270_v36, %v3226_v43  ;;  %v3301_v63 = vadd.f32 %v3300_v45, %v3267_v1  ;;  %v3404_v32 = vpop.f32.mrf.mxu3 }
 0x9ec   :  { %v3375_v49 = vpop.f32.mrf.mxu2 }
 0x9f0   :  { %v3305_v19 = vpop.f32.mrf.mxu0  ;;  %v3332_v62 = vpop.f32.mrf.mxu1 }
 0x9f1   :  { %v3306_v50 = vadd.f32 %v3305_v19, %v3271_v51  ;;  %v3333_v27 = vadd.f32 %v3332_v62, %v3301_v63  ;;  %v6834_v19 = vld [vmem:[%s7212_s1 + $0x420] sm:$0xff] }
 0x9f2   :  { %v3630_v61 = vpop.f32.mrf.mxu3 }
 0x9f3   :  { %v3372_v31 = vadd.f32 %v3371_v23, %v3333_v27 }
 0x9f4   :  { %v3596_v22 = vpop.f32.mrf.mxu2 }
 0x9f5   :  { %v6807_v59 = vadd.f32 %v3400_v34, %v3372_v31 }
 0x9f8   :  { %v3338_v41 = vpop.f32.mrf.mxu1  ;;  %v3499_v56 = vpop.f32.mrf.mxu0 }
 0x9f9   :  { %v3339_v53 = vadd.f32 %v3338_v41, %v3306_v50  ;;  %v3500_v28 = vadd.f32 %v3499_v56, %v3460_v47  ;;  %v3461_v41 = vld [vmem:[%s7212_s1 + $0x248] sm:$0xff] }
 0x9fa   :  { %v3636_v26 = vpop.f32.mrf.mxu3 }
 0x9fb   :  { %v3376_v33 = vadd.f32 %v3375_v49, %v3339_v53 }
 0x9fc   :  { %v3601_v15 = vpop.f32.mrf.mxu2 }
 0x9fd   :  { %v6809_v8 = vadd.f32 %v3404_v32, %v3376_v33  ;;  %v3463_v32 = vld [vmem:[%s7212_s1 + $0x258] sm:$0xff] }
 0xa00   :  { %v3507_v55 = vpop.f32.mrf.mxu0  ;;  %v3558_v60 = vpop.f32.mrf.mxu1 }
 0xa01   :  { %v3559_v52 = vadd.f32 %v3558_v60, %v3500_v28  ;;  %v3508_v4 = vadd.f32 %v3507_v55, %v3462_v30 }
 0xa02   :  { %v3800_v34 = vpop.f32.mrf.mxu3 }
 0xa03   :  { %v3597_v7 = vadd.f32 %v3596_v22, %v3559_v52 }
 0xa04   :  { %v3741_v27 = vpop.f32.mrf.mxu2 }
 0xa05   :  { %v3631_v10 = vadd.f32 %v3630_v61, %v3597_v7  ;;  %v3742_v33 = vadd.f32 %v3741_v27, %v3461_v41 }
 0xa07   :  { %v3801_v47 = vadd.f32 %v3800_v34, %v3742_v33 }
 0xa08   :  { %v3562_v57 = vpop.f32.mrf.mxu1  ;;  %v3675_v40 = vpop.f32.mrf.mxu0 }
 0xa09   :  { %v3563_v5 = vadd.f32 %v3562_v57, %v3508_v4  ;;  %v3676_v11 = vadd.f32 %v3675_v40, %v3631_v10 }
 0xa0a   :  { %v3804_v53 = vpop.f32.mrf.mxu3 }
 0xa0b   :  { %v3602_v20 = vadd.f32 %v3601_v15, %v3563_v5 }
 0xa0c   :  { %v3749_v31 = vpop.f32.mrf.mxu2 }
 0xa0d   :  { %v3637_v54 = vadd.f32 %v3636_v26, %v3602_v20  ;;  %v3750_v55 = vadd.f32 %v3749_v31, %v3463_v32 }
 0xa0f   :  { %v3805_v22 = vadd.f32 %v3804_v53, %v3750_v55 }
 0xa10   :  { %v3706_v16 = vpop.f32.mrf.mxu1  ;;  %v3679_v39 = vpop.f32.mrf.mxu0 }
 0xa11   :  { %v6817_v44 = vadd.f32 %v3706_v16, %v3676_v11  ;;  %v3680_v0 = vadd.f32 %v3679_v39, %v3637_v54 }
 0xa12   :  { %v3948_v57 = vpop.f32.mrf.mxu3 }
 0xa13   :  { %v5317_v12 = vmul.f32 -1.442695, %v6817_v44 }
 0xa14   :  { %v3917_v60 = vpop.f32.mrf.mxu2 }
 0xa15   :  { %5330 = vpow2.f32 %v5317_v12 }
 0xa18   :  { %v3710_v37 = vpop.f32.mrf.mxu1  ;;  %v3838_v56 = vpop.f32.mrf.mxu0 }
 0xa19   :  { %v6827_v29 = vadd.f32 %v3710_v37, %v3680_v0  ;;  %v3839_v28 = vadd.f32 %v3838_v56, %v3801_v47  ;;  %v4081_v56 = vld [vmem:[%s7212_s1 + $0x300] sm:$0xff] }
 0xa1a   :  { %v3952_v12 = vpop.f32.mrf.mxu3  ;;  %v6903_v53 = vand.u32 4294901760, %v4081_v56  ;;  %v4079_v47 = vld [vmem:[%s7212_s1 + $0x2e0] sm:$0xff] }
 0xa1b   :  { %v5331_v3 = vpop.eup %5330  ;;  %v5318_v58 = vmul.f32 -1.442695, %v6827_v29 }
 0xa1c   :  { %v3961_v13 = vadd.f32 1.0, %v5331_v3  ;;  %v3921_v11 = vpop.f32.mrf.mxu2  ;;  %v6909_v33 = vsub.f32 %v4081_v56, %v6903_v53 }
 0xa1d   :  { %5332 = vpow2.f32 %v5318_v58 }
 0xa1e   :  { %5334 = vrcp.f32 %v3961_v13  ;;  %v3974_v21 = vand.u32 2147483648, %v3961_v13  ;;  %v3972_v38 = vand.u32 2147483647, %v3961_v13  ;;  %vm3968_vm9 = vweird.f32 %v3961_v13 }
 0xa1f   :  { %v4149_v55 = vand.u32 4294901760, %v6909_v33 }
 0xa20   :  { %v3975_v24 = vor.u32 1.1754944e-38, %v3974_v21  ;;  %vm3973_vm11 = vcmp.eq.f32.partialorder %v3972_v38, 8.507059e+37  ;;  %v3872_v49 = vpop.f32.mrf.mxu1  ;;  %v3843_v52 = vpop.f32.mrf.mxu0 }
 0xa21   :  { %v3873_v30 = vadd.f32 %v3872_v49, %v3839_v28  ;;  %v3844_v61 = vadd.f32 %v3843_v52, %v3805_v22  ;;  %v4080_v49 = vld [vmem:[%s7212_s1 + $0x2f0] sm:$0xff]  ;;  %v6922_v28 = vand.u32 4294901760, %v4079_v47  ;;  %v4150_v22 = vsub.f32 %v6909_v33, %v4149_v55 }
 0xa22   :  { %v6911_v32 = vand.u32 4294901760, %v4080_v49  ;;  %v4078_v52 = vld [vmem:[%s7212_s1 + $0x2d0] sm:$0xff] }
 0xa23   :  { %v5333_v2 = vpop.eup %5332  ;;  %v3918_v4 = vadd.f32 %v3917_v60, %v3873_v30 }
 0xa24   :  { %v5335_v9 = vpop.eup %5334  ;;  %v3962_v25 = vadd.f32 1.0, %v5333_v2  ;;  %v6847_v2 = vpop.permute.xlu1 %4021  ;;  %v6920_v60 = vsub.f32 %v4080_v49, %v6911_v32 }
 0xa25   :  { %v3964_v35 = vmul.f32 %v5335_v9, %v3961_v13  ;;  %vm3969_vm8 = vweird.f32 %v5335_v9  ;;  %v3949_v16 = vadd.f32 %v3948_v57, %v3918_v4  ;;  %v6935_v57 = vsub.f32 %v4079_v47, %v6922_v28 }
 0xa26   :  { %5336 = vrcp.f32 %v3962_v25  ;;  %vm3970_vm10 = vmor %vm3968_vm9, %vm3969_vm8  ;;  %v3989_v36 = vand.u32 2147483648, %v3962_v25  ;;  %v3987_v51 = vand.u32 2147483647, %v3962_v25  ;;  %vm3983_vm13 = vweird.f32 %v3962_v25 }
 0xa27   :  { %v3965_v6 = vsub.f32 1.0, %v3964_v35  ;;  %v4155_v30 = vand.u32 4294901760, %v6920_v60 }
 0xa28   :  { %v3990_v23 = vor.u32 1.1754944e-38, %v3989_v36  ;;  %vm3988_vm15 = vcmp.eq.f32.partialorder %v3987_v51, 8.507059e+37  ;;  %v3878_v7 = vpop.f32.mrf.mxu1 }
 0xa29   :  { %v3966_v48 = vmul.f32 %v5335_v9, %v3965_v6  ;;  %v3879_v5 = vadd.f32 %v3878_v7, %v3844_v61  ;;  %v6937_v7 = vand.u32 4294901760, %v4078_v52  ;;  %v4077_v61 = vld [vmem:[%s7212_s1 + $0x2c0] sm:$0xff]  ;;  %v4156_v4 = vsub.f32 %v6920_v60, %v4155_v30 }
 0xa2b   :  { %v3967_v46 = vadd.f32 %v5335_v9, %v3966_v48  ;;  %v3922_v15 = vadd.f32 %v3921_v11, %v3879_v5  ;;  %v4161_v5 = vand.u32 4294901760, %v6935_v57  ;;  %v6954_v11 = vand.u32 4294901760, %v4077_v61 }
 0xa2c   :  { %v5337_v42 = vpop.eup %5336 }
 0xa2d   :  { %v3971_v18 = vsel %vm3970_vm10, %v5335_v9, %v3967_v46  ;;  %v3979_v1 = vmul.f32 %v5337_v42, %v3962_v25  ;;  %vm3984_vm12 = vweird.f32 %v5337_v42  ;;  %v3953_v39 = vadd.f32 %v3952_v12, %v3922_v15  ;;  %v4076_v15 = vld [vmem:[%s7212_s1 + $0x2b0] sm:$0xff] }
 0xa2e   :  { %v3976_v17 = vsel %vm3973_vm11, %v3975_v24, %v3971_v18  ;;  %vm3985_vm14 = vmor %vm3983_vm13, %vm3984_vm12  ;;  %v6875_v24 = vld [vmem:[%s7212_s1 + $0x3f0] sm:$0xff]  ;;  %v6880_v18 = vld [vmem:[%s7212_s1 + $0x400] sm:$0xff] }
 0xa2f   :  { %3995 = vrot.lane.b32.xlu2 %v3976_v17, %s5375_s3  ;;  %v3980_v43 = vsub.f32 1.0, %v3979_v1 }
 0xa31   :  { %v3981_v45 = vmul.f32 %v5337_v42, %v3980_v43 }
 0xa33   :  { %v3982_v63 = vadd.f32 %v5337_v42, %v3981_v45 }
 0xa35   :  { %v3986_v62 = vsel %vm3985_vm14, %v5337_v42, %v3982_v63 }
 0xa36   :  { %v3991_v50 = vsel %vm3988_vm15, %v3990_v23, %v3986_v62 }
 0xa37   :  { %3997 = vrot.lane.b32.xlu0 %v3991_v50, %s5375_s3  ;;  %4023 = vrot.lane.b32.xlu2 %v6834_v19, %s5372_s11 }
 0xa89   :  { %v3996_v40 = vpop.permute.xlu2 %3995 }
 0xa8a   :  { %v4001_v10 = vmul.f32 %v3996_v40, %v6817_v44  ;;  %v4151_v40 = vand.u32 4294901760, %v4150_v22 }
 0xa8c   :  { %v4003_v20 = vadd.f32 %v4001_v10, %v3949_v16  ;;  %v6950_v10 = vsub.f32 %v4078_v52, %v6937_v7  ;;  %v4157_v16 = vand.u32 4294901760, %v4156_v4 }
 0xa8e   :  { %v4005_v0 = vmax.f32 %v4003_v20, 0.0  ;;  %v4162_v20 = vsub.f32 %v6935_v57, %v4161_v5  ;;  %v4167_v12 = vand.u32 4294901760, %v6950_v10 }
 0xa90   :  { %v4012_v58 = vrot.slane %v4005_v0, 6  ;;  %v4017_v1 = vmul.f32 %v4005_v0, %v6875_v24  ;;  %v4163_v0 = vand.u32 4294901760, %v4162_v20 }
 0xa91   :  { %v6849_v9 = vpop.permute.xlu2 %4023 }
 0xaa9   :  { %v3998_v26 = vpop.permute.xlu0 %3997 }
 0xaaa   :  { %v4002_v54 = vmul.f32 %v3998_v26, %v6827_v29  ;;  %v4082_v29 = vld [vmem:[%s7212_s1 + $0x310] sm:$0xff]  ;;  %v6964_v26 = vand.u32 4294901760, %v4076_v15 }
 0xaab   :  { %v6860_v21 = vand.u32 4294901760, %v4082_v29 }
 0xaac   :  { %v4004_v37 = vadd.f32 %v4002_v54, %v3953_v39  ;;  %v6968_v39 = vsub.f32 %v4077_v61, %v6954_v11  ;;  %v4075_v54 = vld [vmem:[%s7212_s1 + $0x2a0] sm:$0xff] }
 0xaad   :  { %v6863_v48 = vsub.f32 %v4082_v29, %v6860_v21  ;;  %4097 = vmatpush.msrb.mxu0 %v6860_v21  ;;  %4278 = vmatpush.msrb.mxu3 %v6860_v21 }
 0xaae   :  { %v4006_v3 = vmax.f32 %v4004_v37, 0.0  ;;  %v4168_v37 = vsub.f32 %v6950_v10, %v4167_v12 }
 0xaaf   :  { %v4143_v38 = vand.u32 4294901760, %v6863_v48  ;;  %4228 = vmatpush.msrb.mxu2 %v6863_v48  ;;  %4099 = vmatpush.msrb.mxu0 %v6903_v53 }
 0xab0   :  { %v4008_v13 = vrot.slane %v4006_v3, 6  ;;  %v4018_v17 = vmul.f32 %v4006_v3, %v6880_v18  ;;  %4280 = vmatpush.msrb.mxu3 %v6903_v53  ;;  %v6979_v3 = vsub.f32 %v4076_v15, %v6964_v26 }
 0xab1   :  { %v4144_v46 = vsub.f32 %v6863_v48, %v4143_v38  ;;  %4231 = vmatpush.msrb.mxu2 %v6909_v33  ;;  %4101 = vmatpush.msrb.mxu0 %v6911_v32 }
 0xab2   :  { %v4016_v44 = vsel %vm4011_vm2, %v4008_v13, %v4012_v58  ;;  %v4013_v25 = vsel %vm4011_vm2, %v4012_v58, %v4008_v13  ;;  %4282 = vmatpush.msrb.mxu3 %v6911_v32  ;;  %v6981_v58 = vand.u32 4294901760, %v4075_v54  ;;  %v4173_v13 = vand.u32 4294901760, %v6968_v39 }
 0xab3   :  { %v4027_v35 = vmul.f32 %v6847_v2, %v4016_v44  ;;  %v4028_v6 = vmul.f32 %v6849_v9, %v4013_v25  ;;  %v4145_v42 = vand.u32 4294901760, %v4144_v46  ;;  %4234 = vmatpush.msrb.mxu2 %v6920_v60  ;;  %4103 = vmatpush.msrb.mxu0 %v6922_v28  ;;  %v4074_v44 = vld [vmem:[%s7212_s1 + $0x290] sm:$0xff]  ;;  %v4169_v25 = vand.u32 4294901760, %v4168_v37  ;;  %v4073_v46 = vld [vmem:[%s7212_s1 + $0x280] sm:$0xff] }
 0xab4   :  { %4284 = vmatpush.msrb.mxu3 %v6922_v28  ;;  %v6993_v29 = vand.u32 4294901760, %v4074_v44 }
 0xab5   :  { %4031 = vrot.lane.b32.xlu0 %v4027_v35, %s5373_s28  ;;  %4033 = vrot.lane.b32.xlu1 %v4028_v6, %s5373_s28  ;;  %v4179_v35 = vand.u32 4294901760, %v6979_v3  ;;  %v6991_v6 = vsub.f32 %v4075_v54, %v6981_v58 }
 0xab6   :  { %4146 = vmatpush.msrb.mxu1 %v4145_v42  ;;  %4237 = vmatpush.msrb.mxu2 %v6935_v57  ;;  %v4072_v42 = vld [vmem:[%s7212_s1 + $0x270] sm:$0xff] }
 0xab7   :  { %4105 = vmatpush.msrb.mxu0 %v6937_v7  ;;  %4286 = vmatpush.msrb.mxu3 %v6937_v7 }
 0xab8   :  { %4152 = vmatpush.msrb.mxu1 %v4151_v40  ;;  %4240 = vmatpush.msrb.mxu2 %v6950_v10 }
 0xab9   :  { %4107 = vmatpush.msrb.mxu0 %v6954_v11  ;;  %4288 = vmatpush.msrb.mxu3 %v6954_v11 }
 0xaba   :  { %4158 = vmatpush.msrb.mxu1 %v4157_v16  ;;  %4243 = vmatpush.msrb.mxu2 %v6968_v39 }
 0xabb   :  { %4109 = vmatpush.msrb.mxu0 %v6964_v26  ;;  %4290 = vmatpush.msrb.mxu3 %v6964_v26 }
 0xabc   :  { %4164 = vmatpush.msrb.mxu1 %v4163_v0  ;;  %4246 = vmatpush.msrb.mxu2 %v6979_v3 }
 0xabd   :  { %4111 = vmatpush.msrb.mxu0 %v6981_v58  ;;  %4292 = vmatpush.msrb.mxu3 %v6981_v58 }
 0xabe   :  { %4170 = vmatpush.msrb.mxu1 %v4169_v25  ;;  %4249 = vmatpush.msrb.mxu2 %v6991_v6 }
 0xabf   :  { %4113 = vmatpush.msrb.mxu0 %v6993_v29  ;;  %4294 = vmatpush.msrb.mxu3 %v6993_v29 }
 0xb27   :  { %v4032_v43 = vpop.permute.xlu0 %4031  ;;  %v4034_v36 = vpop.permute.xlu1 %4033 }
 0xb28   :  { %v6884_v45 = vadd.f32 %v4032_v43, %v4017_v1  ;;  %v6886_v51 = vadd.f32 %v4034_v36, %v4018_v17  ;;  %v4071_v1 = vld [vmem:[%s7212_s1 + $0x260] sm:$0xff]  ;;  %v4174_v17 = vsub.f32 %v6968_v39, %v4173_v13  ;;  %v7008_v43 = vand.u32 4294901760, %v4073_v46 }
 0xb29   :  { %v7010_v36 = vand.u32 4294901760, %v4072_v42 }
 0xb2a   :  { %v4041_v63 = vrot.slane %v6884_v45, 1  ;;  %v4047_v23 = vrot.slane %v6884_v45, 2  ;;  %v4042_v62 = vrot.slane %v6886_v51, 1  ;;  %v4048_v50 = vrot.slane %v6886_v51, 2  ;;  %4115 = vmatpush.msrb.mxu0 %v7008_v43  ;;  %4296 = vmatpush.msrb.mxu3 %v7008_v43 }
 0xb2c   :  { %v4049_v27 = vsel %vm3422_vm5, %v4047_v23, %v4048_v50  ;;  %v4046_v34 = vsel %vm3415_vm4, %v4042_v62, %v4041_v63  ;;  %v4043_v31 = vsel %vm3415_vm4, %v4041_v63, %v4042_v62  ;;  %v4052_v41 = vsel %vm3422_vm5, %v4048_v50, %v4047_v23  ;;  %4117 = vmatpush.msrb.mxu0 %v7010_v36 }
 0xb2d   :  { %4061 = vrot.lane.b32.xlu0 %v4049_v27, %s5375_s3  ;;  %4056 = vrot.lane.b32.xlu1 %v4046_v34, %s5372_s11  ;;  %v7014_v63 = vand.u32 4294901760, %v4071_v1  ;;  %v4180_v23 = vsub.f32 %v6979_v3, %v4179_v35  ;;  %v4185_v62 = vand.u32 4294901760, %v6991_v6  ;;  %v4190_v50 = vsub.f32 %v4074_v44, %v6993_v29 }
 0xb2e   :  { %4054 = vrot.lane.b32.xlu2 %v4043_v31, %s5372_s11  ;;  %v4175_v27 = vand.u32 4294901760, %v4174_v17  ;;  %v4196_v34 = vsub.f32 %v4073_v46, %v7008_v43  ;;  %v4202_v31 = vsub.f32 %v4072_v42, %v7010_v36  ;;  %4298 = vmatpush.msrb.mxu3 %v7010_v36  ;;  %v4084_v46 = vld [vmem:[%s7212_s1 + $0x330] sm:$0xff] }
 0xb2f   :  { %v4181_v56 = vand.u32 4294901760, %v4180_v23  ;;  %v4186_v49 = vsub.f32 %v6991_v6, %v4185_v62  ;;  %v4191_v47 = vand.u32 4294901760, %v4190_v50  ;;  %4252 = vmatpush.msrb.mxu2 %v4190_v50  ;;  %4119 = vmatpush.msrb.mxu0 %v7014_v63 }
 0xb30   :  { %4176 = vmatpush.msrb.mxu1 %v4175_v27  ;;  %v4197_v52 = vand.u32 4294901760, %v4196_v34  ;;  %v4203_v22 = vand.u32 4294901760, %v4202_v31  ;;  %4300 = vmatpush.msrb.mxu3 %v7014_v63 }
 0xb31   :  { %v4187_v40 = vand.u32 4294901760, %v4186_v49  ;;  %v4192_v4 = vsub.f32 %v4190_v50, %v4191_v47  ;;  %4255 = vmatpush.msrb.mxu2 %v4196_v34  ;;  %4321 = vmatpush.msra.mxu0 %v4143_v38 }
 0xb32   :  { %4182 = vmatpush.msrb.mxu1 %v4181_v56  ;;  %v4198_v15 = vsub.f32 %v4196_v34, %v4197_v52  ;;  %v4204_v16 = vsub.f32 %v4202_v31, %v4203_v22 }
 0xb33   :  { %v4193_v20 = vand.u32 4294901760, %v4192_v4  ;;  %4258 = vmatpush.msrb.mxu2 %v4202_v31  ;;  %4325 = vmatpush.msra.mxu0 %v4149_v55 }
 0xb34   :  { %4188 = vmatpush.msrb.mxu1 %v4187_v40  ;;  %v4199_v54 = vand.u32 4294901760, %v4198_v15  ;;  %v4205_v37 = vand.u32 4294901760, %v4204_v16 }
 0xb35   :  { %4329 = vmatpush.msra.mxu0 %v4155_v30 }
 0xb36   :  { %4063 = vrot.lane.b32.xlu2 %v4052_v41, %s5375_s3  ;;  %v4208_v41 = vsub.f32 %v4071_v1, %v7014_v63  ;;  %4194 = vmatpush.msrb.mxu1 %v4193_v20 }
 0xb37   :  { %4333 = vmatpush.msra.mxu0 %v4161_v5 }
 0xb38   :  { %v4209_v61 = vand.u32 4294901760, %v4208_v41  ;;  %4261 = vmatpush.msrb.mxu2 %v4208_v41  ;;  %4200 = vmatpush.msrb.mxu1 %v4199_v54 }
 0xb39   :  { %4337 = vmatpush.msra.mxu0 %v4167_v12 }
 0xb3a   :  { %v4210_v0 = vsub.f32 %v4208_v41, %v4209_v61  ;;  %4206 = vmatpush.msrb.mxu1 %v4205_v37 }
 0xb3b   :  { %4341 = vmatpush.msra.mxu0 %v4173_v13 }
 0xb3c   :  { %v4211_v44 = vand.u32 4294901760, %v4210_v0 }
 0xb3d   :  { %4345 = vmatpush.msra.mxu0 %v4179_v35 }
 0xb3e   :  { %4212 = vmatpush.msrb.mxu1 %v4211_v44 }
 0xb3f   :  { %4349 = vmatpush.msra.mxu0 %v4185_v62 }
 0xb40   :  { %4380 = vmatpush.msra.mxu1 %v6860_v21 }
 0xb41   :  { %4353 = vmatpush.msra.mxu0 %v4191_v47 }
 0xb42   :  { %4382 = vmatpush.msra.mxu1 %v6903_v53 }
 0xb43   :  { %4357 = vmatpush.msra.mxu0 %v4197_v52 }
 0xb44   :  { %4384 = vmatpush.msra.mxu1 %v6911_v32 }
 0xb45   :  { %4361 = vmatpush.msra.mxu0 %v4203_v22 }
 0xb46   :  { %4386 = vmatpush.msra.mxu1 %v6922_v28 }
 0xb47   :  { %4365 = vmatpush.msra.mxu0 %v4209_v61 }
 0xb48   :  { %4388 = vmatpush.msra.mxu1 %v6937_v7 }
 0xb4a   :  { %4390 = vmatpush.msra.mxu1 %v6954_v11 }
 0xb4c   :  { %4392 = vmatpush.msra.mxu1 %v6964_v26 }
 0xb4e   :  { %4394 = vmatpush.msra.mxu1 %v6981_v58  ;;  %v4083_v58 = vld [vmem:[%s7212_s1 + $0x320] sm:$0xff] }
 0xb50   :  { %4396 = vmatpush.msra.mxu1 %v6993_v29 }
 0xb52   :  { %4398 = vmatpush.msra.mxu1 %v7008_v43 }
 0xb54   :  { %4400 = vmatpush.msra.mxu1 %v7010_v36 }
 0xb56   :  { %4402 = vmatpush.msra.mxu1 %v7014_v63 }
 0xb88   :  { %v4055_v21 = vpop.permute.xlu2 %4054 }
 0xb89   :  { %v4067_v48 = vsel %vm24_vm0, %v6884_v45, %v4055_v21 }
 0xb90   :  { %v4064_v33 = vpop.permute.xlu2 %4063 }
 0xb9f   :  { %v4062_v38 = vpop.permute.xlu0 %4061  ;;  %v4057_v53 = vpop.permute.xlu1 %4056 }
 0xba0   :  { %v4069_v32 = vsel %vm26_vm1, %v4067_v48, %v4062_v38  ;;  %v4068_v55 = vsel %vm24_vm0, %v6886_v51, %v4057_v53 }
 0xba1   :  { %v4087_v60 = vsel %vm4085_vm3, %v4069_v32, 0  ;;  %v4070_v28 = vsel %vm26_vm1, %v4068_v55, %v4064_v33 }
 0xba2   :  { %v4120_v30 = vand.u32 4294901760, %v4087_v60  ;;  %v4090_v57 = vsel %vm4085_vm3, %v4070_v28, 0 }
 0xba3   :  { %v4128_v7 = vand.u32 4294901760, %v4090_v57 }
 0xba4   :  { %v4121_v5 = vsub.f32 %v4087_v60, %v4120_v30  ;;  %4214 = vmatmul.f32.vlgmr.msrb.gmra.mxu1 %v4120_v30 }
 0xba5   :  { %v4129_v11 = vsub.f32 %v4090_v57, %v4128_v7 }
 0xba6   :  { %v4122_v10 = vand.u32 4294901760, %v4121_v5  ;;  %4264 = vmatmul.f32.vlgmr.msrb.gmra.mxu2 %v4121_v5 }
 0xba7   :  { %v4130_v26 = vand.u32 4294901760, %v4129_v11 }
 0xba8   :  { %v4123_v45 = vsub.f32 %v4121_v5, %v4122_v10  ;;  %4304 = vmatmul.f32.vlgmr.msrb.gmra.mxu3 %v4122_v10 }
 0xba9   :  { %v4131_v39 = vsub.f32 %v4129_v11, %v4130_v26 }
 0xbaa   :  { %v4124_v12 = vand.u32 4294901760, %v4123_v45 }
 0xbab   :  { %v4132_v51 = vand.u32 4294901760, %v4131_v39 }
 0xbac   :  { %4125 = vmatmul.f32.vlgmr.msrb.gmra.mxu0 %v4124_v12  ;;  %4218 = vmatmul.f32.gmra.mxu1 %v4128_v7 }
 0xbae   :  { %4269 = vmatmul.f32.gmra.mxu2 %v4129_v11 }
 0xbb0   :  { %4310 = vmatmul.f32.gmra.mxu3 %v4130_v26 }
 0xbb4   :  { %4133 = vmatmul.f32.gmra.mxu0 %v4132_v51  ;;  %4404 = vmatmul.f32.vlgmr.msra.gmra.mxu1 %v4120_v30 }
 0xbbc   :  { %4367 = vmatmul.f32.vlgmr.msra.gmra.mxu0 %v4120_v30  ;;  %4408 = vmatmul.f32.gmra.mxu1 %v4128_v7 }
 0xbc4   :  { %4371 = vmatmul.f32.gmra.mxu0 %v4128_v7 }
 0xc21   :  { %v4215_v3 = vpop.f32.mrf.mxu1 }
 0xc29   :  { %v4126_v13 = vpop.f32.mrf.mxu0  ;;  %v4219_v35 = vpop.f32.mrf.mxu1 }
 0xc2a   :  { %v4127_v25 = vadd.f32 %v4126_v13, %v4083_v58  ;;  %v4265_v29 = vpop.f32.mrf.mxu2 }
 0xc2b   :  { %v4305_v43 = vpop.f32.mrf.mxu3 }
 0xc2c   :  { %v4216_v6 = vadd.f32 %v4215_v3, %v4127_v25 }
 0xc2e   :  { %v4266_v1 = vadd.f32 %v4265_v29, %v4216_v6 }
 0xc30   :  { %v4306_v36 = vadd.f32 %v4305_v43, %v4266_v1 }
 0xc31   :  { %v4134_v42 = vpop.f32.mrf.mxu0  ;;  %v4405_v23 = vpop.f32.mrf.mxu1 }
 0xc32   :  { %v4135_v17 = vadd.f32 %v4134_v42, %v4084_v46  ;;  %v4270_v27 = vpop.f32.mrf.mxu2 }
 0xc33   :  { %v4311_v56 = vpop.f32.mrf.mxu3 }
 0xc34   :  { %v4220_v63 = vadd.f32 %v4219_v35, %v4135_v17 }
 0xc36   :  { %v4271_v34 = vadd.f32 %v4270_v27, %v4220_v63 }
 0xc38   :  { %v4312_v49 = vadd.f32 %v4311_v56, %v4271_v34 }
 0xc39   :  { %v4368_v62 = vpop.f32.mrf.mxu0  ;;  %v4409_v22 = vpop.f32.mrf.mxu1 }
 0xc3a   :  { %v4369_v50 = vadd.f32 %v4368_v62, %v4306_v36 }
 0xc3c   :  { %v4406_v31 = vadd.f32 %v4405_v23, %v4369_v50 }
 0xc3e   :  { %v5319_v41 = vmul.f32 -1.442695, %v4406_v31  ;;  %4462 = vrot.lane.b32.xlu2 %v4406_v31, %s5373_s28 }
 0xc40   :  { %5338 = vpow2.f32 %v5319_v41 }
 0xc41   :  { %v4372_v47 = vpop.f32.mrf.mxu0 }
 0xc42   :  { %v4373_v52 = vadd.f32 %v4372_v47, %v4312_v49  ;;  %v4536_v49 = vld [vmem:[%s7212_s1 + $0x360] sm:$0xff] }
 0xc43   :  { %v4562_v47 = vand.u32 4294901760, %v4536_v49 }
 0xc44   :  { %v4410_v61 = vadd.f32 %v4409_v22, %v4373_v52 }
 0xc45   :  { %v4599_v52 = vsub.f32 %v4536_v49, %v4562_v47  ;;  %4672 = vmatpush.msrb.mxu1 %v4562_v47  ;;  %4563 = vmatpush.msra.mxu2 %v4562_v47 }
 0xc46   :  { %v5339_v40 = vpop.eup %5338  ;;  %v5320_v4 = vmul.f32 -1.442695, %v4410_v61  ;;  %4483 = vrot.lane.b32.xlu2 %v6834_v19, %s5376_s17 }
 0xc47   :  { %v4418_v15 = vadd.f32 1.0, %v5339_v40  ;;  %v4600_v22 = vand.u32 4294901760, %v4599_v52  ;;  %4640 = vmatpush.msrb.mxu0 %v4599_v52 }
 0xc48   :  { %5340 = vpow2.f32 %v5320_v4  ;;  %v4534_v4 = vld [vmem:[%s7212_s1 + $0x350] sm:$0xff] }
 0xc49   :  { %5342 = vrcp.f32 %v4418_v15  ;;  %v4431_v44 = vand.u32 2147483648, %v4418_v15  ;;  %v4429_v48 = vand.u32 2147483647, %v4418_v15  ;;  %vm4425_vm7 = vweird.f32 %v4418_v15 }
 0xc4b   :  { %v4432_v33 = vor.u32 1.1754944e-38, %v4431_v44  ;;  %vm4430_vm9 = vcmp.eq.f32.partialorder %v4429_v48, 8.507059e+37 }
 0xc4e   :  { %v5341_v16 = vpop.eup %5340 }
 0xc4f   :  { %v5343_v20 = vpop.eup %5342  ;;  %v4419_v54 = vadd.f32 1.0, %v5341_v16  ;;  %v4532_v16 = vld [vmem:[%s7212_s1 + $0x340] sm:$0xff] }
 0xc50   :  { %v4421_v0 = vmul.f32 %v5343_v20, %v4418_v15  ;;  %vm4426_vm1 = vweird.f32 %v5343_v20  ;;  %v4564_v15 = vand.u32 4294901760, %v4534_v4 }
 0xc51   :  { %5344 = vrcp.f32 %v4419_v54  ;;  %vm4427_vm8 = vmor %vm4425_vm7, %vm4426_vm1  ;;  %v4446_v28 = vand.u32 2147483648, %v4419_v54  ;;  %v4444_v57 = vand.u32 2147483647, %v4419_v54  ;;  %vm4440_vm11 = vweird.f32 %v4419_v54 }
 0xc52   :  { %v4422_v37 = vsub.f32 1.0, %v4421_v0  ;;  %4674 = vmatpush.msrb.mxu1 %v4564_v15  ;;  %4565 = vmatpush.msra.mxu2 %v4564_v15 }
 0xc53   :  { %v4447_v5 = vor.u32 1.1754944e-38, %v4446_v28  ;;  %vm4445_vm13 = vcmp.eq.f32.partialorder %v4444_v57, 8.507059e+37  ;;  %v4533_v28 = vld [vmem:[%s7212_s1 + $0x348] sm:$0xff] }
 0xc54   :  { %v4423_v21 = vmul.f32 %v5343_v20, %v4422_v37  ;;  %v4769_v57 = vand.u32 4294901760, %v4533_v28 }
 0xc56   :  { %v4424_v38 = vadd.f32 %v5343_v20, %v4423_v21 }
 0xc57   :  { %v5345_v53 = vpop.eup %5344 }
 0xc58   :  { %v4428_v32 = vsel %vm4427_vm8, %v5343_v20, %v4424_v38  ;;  %v4436_v19 = vmul.f32 %v5345_v53, %v4419_v54  ;;  %vm4441_vm10 = vweird.f32 %v5345_v53  ;;  %v4605_v20 = vsub.f32 %v4534_v4, %v4564_v15 }
 0xc59   :  { %v4433_v55 = vsel %vm4430_vm9, %v4432_v33, %v4428_v32  ;;  %vm4442_vm12 = vmor %vm4440_vm11, %vm4441_vm10  ;;  %v4566_v54 = vand.u32 4294901760, %v4532_v16  ;;  %v4537_v33 = vld [vmem:[%s7212_s1 + $0x368] sm:$0xff] }
 0xc5a   :  { %4452 = vrot.lane.b32.xlu0 %v4433_v55, %s5377_s18  ;;  %v4437_v60 = vsub.f32 1.0, %v4436_v19  ;;  %v4606_v0 = vand.u32 4294901760, %v4605_v20  ;;  %4643 = vmatpush.msrb.mxu0 %v4605_v20  ;;  %v4765_v32 = vand.u32 4294901760, %v4537_v33  ;;  %v4535_v19 = vld [vmem:[%s7212_s1 + $0x358] sm:$0xff] }
 0xc5b   :  { %v4611_v37 = vsub.f32 %v4532_v16, %v4566_v54  ;;  %4676 = vmatpush.msrb.mxu1 %v4566_v54  ;;  %4567 = vmatpush.msra.mxu2 %v4566_v54 }
 0xc5c   :  { %v4438_v30 = vmul.f32 %v5345_v53, %v4437_v60  ;;  %v4607_v44 = vsub.f32 %v4605_v20, %v4606_v0  ;;  %v4802_v55 = vsub.f32 %v4537_v33, %v4765_v32  ;;  %v4767_v60 = vand.u32 4294901760, %v4535_v19 }
 0xc5d   :  { %v4612_v21 = vand.u32 4294901760, %v4611_v37  ;;  %4646 = vmatpush.msrb.mxu0 %v4611_v37  ;;  %4706 = vmatpush.msrb.mxu2 %v4600_v22 }
 0xc5e   :  { %v4439_v7 = vadd.f32 %v5345_v53, %v4438_v30  ;;  %v4608_v48 = vand.u32 4294901760, %v4607_v44  ;;  %v4803_v30 = vand.u32 4294901760, %v4802_v55 }
 0xc5f   :  { %v4613_v38 = vsub.f32 %v4611_v37, %v4612_v21  ;;  %4710 = vmatpush.msrb.mxu2 %v4606_v0  ;;  %4766 = vmatpush.msra.mxu0 %v4765_v32 }
 0xc60   :  { %v4443_v10 = vsel %vm4442_vm12, %v5345_v53, %v4439_v7  ;;  %v4808_v7 = vsub.f32 %v4535_v19, %v4767_v60 }
 0xc61   :  { %v4448_v11 = vsel %vm4445_vm13, %v4447_v5, %v4443_v10  ;;  %v4614_v53 = vand.u32 4294901760, %v4613_v38  ;;  %4714 = vmatpush.msrb.mxu2 %v4612_v21  ;;  %4768 = vmatpush.msra.mxu0 %v4767_v60  ;;  %v4804_v5 = vsub.f32 %v4802_v55, %v4803_v30 }
 0xc62   :  { %4464 = vrot.lane.b32.xlu0 %v4410_v61, %s5373_s28  ;;  %4454 = vrot.lane.b32.xlu1 %v4448_v11, %s5377_s18  ;;  %v4809_v10 = vand.u32 4294901760, %v4808_v7  ;;  %v4814_v11 = vsub.f32 %v4533_v28, %v4769_v57 }
 0xc63   :  { %4770 = vmatpush.msra.mxu0 %v4769_v57 }
 0xc6a   :  { %4481 = vrot.lane.b32.xlu1 %v6823_v14, %s5376_s17 }
 0xc98   :  { %v4463_v12 = vpop.permute.xlu2 %4462 }
 0xca0   :  { %v4484_v6 = vpop.permute.xlu2 %4483 }
 0xccc   :  { %v4453_v45 = vpop.permute.xlu0 %4452 }
 0xccd   :  { %v4458_v26 = vmul.f32 %v4453_v45, %v4406_v31  ;;  %v4805_v45 = vand.u32 4294901760, %v4804_v5 }
 0xccf   :  { %v4468_v51 = vadd.f32 %v4463_v12, %v4458_v26  ;;  %v4810_v12 = vsub.f32 %v4808_v7, %v4809_v10  ;;  %v4815_v26 = vand.u32 4294901760, %v4814_v11  ;;  %4806 = vmatpush.msra.mxu1 %v4805_v45 }
 0xcd1   :  { %v4474_v25 = vrot.slane %v4468_v51, 6  ;;  %v4479_v36 = vmul.f32 %v4468_v51, %v6875_v24  ;;  %v4811_v51 = vand.u32 4294901760, %v4810_v12 }
 0xcd3   :  { %4812 = vmatpush.msra.mxu1 %v4811_v51 }
 0xcd4   :  { %v4455_v39 = vpop.permute.xlu1 %4454  ;;  %v4465_v58 = vpop.permute.xlu0 %4464 }
 0xcd5   :  { %v4459_v3 = vmul.f32 %v4455_v39, %v4410_v61  ;;  %v4601_v61 = vsub.f32 %v4599_v52, %v4600_v22  ;;  %v4540_v22 = vld [vmem:[%s7212_s1 + $0x380] sm:$0xff] }
 0xcd7   :  { %v4469_v13 = vadd.f32 %v4465_v58, %v4459_v3  ;;  %v4602_v40 = vand.u32 4294901760, %v4601_v61  ;;  %v4816_v3 = vsub.f32 %v4814_v11, %v4815_v26 }
 0xcd9   :  { %v4471_v35 = vrot.slane %v4469_v13, 6  ;;  %v4480_v14 = vmul.f32 %v4469_v13, %v6880_v18  ;;  %4603 = vmatpush.msra.mxu3 %v4602_v40  ;;  %v4817_v58 = vand.u32 4294901760, %v4816_v3 }
 0xcdb   :  { %v4475_v29 = vsel %vm4011_vm2, %v4474_v25, %v4471_v35  ;;  %v4478_v46 = vsel %vm4011_vm2, %v4471_v35, %v4474_v25  ;;  %4609 = vmatpush.msra.mxu3 %v4608_v48  ;;  %4818 = vmatpush.msra.mxu1 %v4817_v58 }
 0xcdc   :  { %v4488_v42 = vmul.f32 %v4484_v6, %v4475_v29  ;;  %v4482_v1 = vpop.permute.xlu1 %4481 }
 0xcdd   :  { %v4487_v17 = vmul.f32 %v4482_v1, %v4478_v46  ;;  %4615 = vmatpush.msra.mxu3 %v4614_v53 }
 0xcde   :  { %4493 = vrot.lane.b32.xlu1 %v4488_v42, %s5378_s19 }
 0xcdf   :  { %4491 = vrot.lane.b32.xlu0 %v4487_v17, %s5378_s19  ;;  %4738 = vmatpush.msrb.mxu3 %v4562_v47 }
 0xce1   :  { %4740 = vmatpush.msrb.mxu3 %v4564_v15 }
 0xce3   :  { %4742 = vmatpush.msrb.mxu3 %v4566_v54 }
 0xd50   :  { %v4494_v43 = vpop.permute.xlu1 %4493 }
 0xd51   :  { %v7085_v63 = vadd.f32 %v4494_v43, %v4480_v14  ;;  %v4492_v23 = vpop.permute.xlu0 %4491 }
 0xd52   :  { %v7087_v62 = vadd.f32 %v4492_v23, %v4479_v36 }
 0xd53   :  { %v4502_v50 = vrot.slane %v7085_v63, 1  ;;  %v4508_v27 = vrot.slane %v7085_v63, 2 }
 0xd54   :  { %v4501_v34 = vrot.slane %v7087_v62, 1  ;;  %v4507_v31 = vrot.slane %v7087_v62, 2 }
 0xd56   :  { %v4509_v41 = vsel %vm3422_vm5, %v4507_v31, %v4508_v27  ;;  %v4506_v18 = vsel %vm3415_vm4, %v4502_v50, %v4501_v34  ;;  %v4503_v56 = vsel %vm3415_vm4, %v4501_v34, %v4502_v50  ;;  %v4512_v24 = vsel %vm3422_vm5, %v4508_v27, %v4507_v31 }
 0xd57   :  { %4521 = vrot.lane.b32.xlu0 %v4509_v41, %s5374_s9  ;;  %4516 = vrot.lane.b32.xlu1 %v4506_v18, %s5376_s17  ;;  %vm4527_vm4 = vcmask 64512   ;;  %vm4542_vm5 = vcmask 195584   ;;  %v4538_v18 = vld [vmem:[%s7212_s1 + $0x370] sm:$0xff] }
 0xd58   :  { %4514 = vrot.lane.b32.xlu2 %v4503_v56, %s5376_s17 }
 0xd60   :  { %4523 = vrot.lane.b32.xlu2 %v4512_v24, %s5374_s9 }
 0xdb2   :  { %v4515_v39 = vpop.permute.xlu2 %4514 }
 0xdb3   :  { %v4528_v13 = vsel %vm4527_vm4, %v7087_v62, %v4515_v39 }
 0xdba   :  { %v4524_v6 = vpop.permute.xlu2 %4523 }
 0xdc9   :  { %v4522_v25 = vpop.permute.xlu0 %4521  ;;  %v4517_v35 = vpop.permute.xlu1 %4516 }
 0xdca   :  { %v4530_v29 = vsel %vm3443_vm6, %v4528_v13, %v4522_v25  ;;  %v4529_v46 = vsel %vm4527_vm4, %v7085_v63, %v4517_v35 }
 0xdcb   :  { %v4544_v42 = vsel %vm4542_vm5, %v4530_v29, 0  ;;  %v4531_v1 = vsel %vm3443_vm6, %v4529_v46, %v4524_v6 }
 0xdcc   :  { %v4568_v17 = vand.u32 4294901760, %v4544_v42  ;;  %v4547_v14 = vsel %vm4542_vm5, %v4531_v1, 0 }
 0xdcd   :  { %v4576_v43 = vand.u32 4294901760, %v4547_v14 }
 0xdce   :  { %v4569_v36 = vsub.f32 %v4544_v42, %v4568_v17  ;;  %4617 = vmatmul.f32.vlgmr.msra.gmra.mxu3 %v4568_v17 }
 0xdcf   :  { %4875 = vmatpush.msra.mxu3 %v4765_v32  ;;  %v4577_v50 = vsub.f32 %v4547_v14, %v4576_v43 }
 0xdd0   :  { %v4570_v23 = vand.u32 4294901760, %v4569_v36  ;;  %4649 = vmatmul.f32.vlgmr.msrb.gmra.mxu0 %v4569_v36 }
 0xdd1   :  { %4877 = vmatpush.msra.mxu3 %v4767_v60  ;;  %4909 = vmatpush.msrb.mxu0 %v4803_v30  ;;  %v4578_v63 = vand.u32 4294901760, %v4577_v50 }
 0xdd2   :  { %v4571_v62 = vsub.f32 %v4569_v36, %v4570_v23  ;;  %4680 = vmatmul.f32.vlgmr.msrb.gmra.mxu1 %v4570_v23 }
 0xdd3   :  { %4879 = vmatpush.msra.mxu3 %v4769_v57  ;;  %4913 = vmatpush.msrb.mxu0 %v4809_v10  ;;  %v4579_v34 = vsub.f32 %v4577_v50, %v4578_v63 }
 0xdd4   :  { %v4572_v27 = vand.u32 4294901760, %v4571_v62  ;;  %4941 = vmatpush.msrb.mxu1 %v4765_v32 }
 0xdd5   :  { %4917 = vmatpush.msrb.mxu0 %v4815_v26  ;;  %v4580_v31 = vand.u32 4294901760, %v4579_v34 }
 0xdd6   :  { %4573 = vmatmul.f32.vlgmr.msra.gmra.mxu2 %v4572_v27  ;;  %4621 = vmatmul.f32.gmra.mxu3 %v4576_v43 }
 0xdd7   :  { %4943 = vmatpush.msrb.mxu1 %v4767_v60  ;;  %4843 = vmatpush.msra.mxu2 %v4802_v55 }
 0xdd8   :  { %4654 = vmatmul.f32.gmra.mxu0 %v4577_v50 }
 0xdd9   :  { %4945 = vmatpush.msrb.mxu1 %v4769_v57  ;;  %4846 = vmatpush.msra.mxu2 %v4808_v7 }
 0xdda   :  { %4686 = vmatmul.f32.gmra.mxu1 %v4578_v63 }
 0xddb   :  { %4849 = vmatpush.msra.mxu2 %v4814_v11 }
 0xdde   :  { %4581 = vmatmul.f32.gmra.mxu2 %v4580_v31  ;;  %4744 = vmatmul.f32.vlgmr.msrb.gmra.mxu3 %v4568_v17 }
 0xde0   :  { %4776 = vmatmul.f32.vlgmr.msra.gmra.mxu0 %v4572_v27  ;;  %v4539_v27 = vld [vmem:[%s7212_s1 + $0x378] sm:$0xff] }
 0xde2   :  { %4820 = vmatmul.f32.vlgmr.msra.gmra.mxu1 %v4568_v17 }
 0xde6   :  { %4716 = vmatmul.f32.vlgmr.msrb.gmra.mxu2 %v4568_v17  ;;  %4748 = vmatmul.f32.gmra.mxu3 %v4576_v43 }
 0xde8   :  { %4784 = vmatmul.f32.gmra.mxu0 %v4580_v31 }
 0xdea   :  { %4824 = vmatmul.f32.gmra.mxu1 %v4576_v43 }
 0xdee   :  { %4720 = vmatmul.f32.gmra.mxu2 %v4576_v43  ;;  %4883 = vmatmul.f32.vlgmr.msra.gmra.mxu3 %v4570_v23 }
 0xdf0   :  { %4919 = vmatmul.f32.vlgmr.msrb.gmra.mxu0 %v4568_v17 }
 0xdf2   :  { %4947 = vmatmul.f32.vlgmr.msrb.gmra.mxu1 %v4568_v17 }
 0xdf6   :  { %4852 = vmatmul.f32.vlgmr.msra.gmra.mxu2 %v4569_v36  ;;  %4889 = vmatmul.f32.gmra.mxu3 %v4578_v63  ;;  %v4541_v63 = vld [vmem:[%s7212_s1 + $0x388] sm:$0xff] }
 0xdf8   :  { %4923 = vmatmul.f32.gmra.mxu0 %v4576_v43 }
 0xdfa   :  { %4951 = vmatmul.f32.gmra.mxu1 %v4576_v43 }
 0xdfe   :  { %4857 = vmatmul.f32.gmra.mxu2 %v4577_v50 }
 0xe4d   :  { %v4650_v52 = vpop.f32.mrf.mxu0 }
 0xe4f   :  { %v4681_v15 = vpop.f32.mrf.mxu1 }
 0xe51   :  { %v4618_v41 = vpop.f32.mrf.mxu3 }
 0xe55   :  { %v4655_v44 = vpop.f32.mrf.mxu0 }
 0xe57   :  { %v4687_v53 = vpop.f32.mrf.mxu1 }
 0xe59   :  { %v4574_v56 = vpop.f32.mrf.mxu2  ;;  %v4622_v49 = vpop.f32.mrf.mxu3 }
 0xe5a   :  { %v4575_v24 = vadd.f32 %v4574_v56, %v4538_v18 }
 0xe5c   :  { %v4619_v47 = vadd.f32 %v4618_v41, %v4575_v24 }
 0xe5d   :  { %v4777_v36 = vpop.f32.mrf.mxu0 }
 0xe5e   :  { %v4651_v4 = vadd.f32 %v4650_v52, %v4619_v47  ;;  %v4778_v31 = vadd.f32 %v4777_v36, %v4539_v27  ;;  %v5370_v36 = vld [vmem:[%s7212_s1 + $0x3f0] sm:$0xff] }
 0xe5f   :  { %v4821_v23 = vpop.f32.mrf.mxu1 }
 0xe60   :  { %v4682_v20 = vadd.f32 %v4681_v15, %v4651_v4  ;;  %v4822_v56 = vadd.f32 %v4821_v23, %v4778_v31 }
 0xe61   :  { %v4582_v61 = vpop.f32.mrf.mxu2  ;;  %v4745_v54 = vpop.f32.mrf.mxu3 }
 0xe62   :  { %v4583_v40 = vadd.f32 %v4582_v61, %v4540_v22 }
 0xe64   :  { %v4623_v16 = vadd.f32 %v4622_v49, %v4583_v40 }
 0xe65   :  { %v4785_v50 = vpop.f32.mrf.mxu0 }
 0xe66   :  { %v4656_v48 = vadd.f32 %v4655_v44, %v4623_v16  ;;  %v4786_v18 = vadd.f32 %v4785_v50, %v4541_v63 }
 0xe67   :  { %v4825_v34 = vpop.f32.mrf.mxu1 }
 0xe68   :  { %v4688_v33 = vadd.f32 %v4687_v53, %v4656_v48  ;;  %v4826_v47 = vadd.f32 %v4825_v34, %v4786_v18 }
 0xe69   :  { %v4717_v0 = vpop.f32.mrf.mxu2  ;;  %v4749_v55 = vpop.f32.mrf.mxu3 }
 0xe6a   :  { %v4718_v37 = vadd.f32 %v4717_v0, %v4682_v20 }
 0xe6c   :  { %v7129_v21 = vadd.f32 %v4745_v54, %v4718_v37 }
 0xe6d   :  { %v4920_v24 = vpop.f32.mrf.mxu0 }
 0xe6e   :  { %v5321_v38 = vmul.f32 -1.442695, %v7129_v21 }
 0xe6f   :  { %v4948_v61 = vpop.f32.mrf.mxu1 }
 0xe70   :  { %5346 = vpow2.f32 %v5321_v38 }
 0xe71   :  { %v4721_v32 = vpop.f32.mrf.mxu2  ;;  %v4884_v41 = vpop.f32.mrf.mxu3 }
 0xe72   :  { %v4722_v19 = vadd.f32 %v4721_v32, %v4688_v33 }
 0xe74   :  { %v7132_v60 = vadd.f32 %v4749_v55, %v4722_v19  ;;  %v5031_v55 = vld [vmem:[%s7212_s1 + $0x3c0] sm:$0xff] }
 0xe75   :  { %v4924_v54 = vpop.f32.mrf.mxu0 }
 0xe76   :  { %v5347_v28 = vpop.eup %5346  ;;  %v5322_v30 = vmul.f32 -1.442695, %v7132_v60 }
 0xe77   :  { %v4961_v57 = vadd.f32 1.0, %v5347_v28  ;;  %v4952_v48 = vpop.f32.mrf.mxu1 }
 0xe78   :  { %5348 = vpow2.f32 %v5322_v30 }
 0xe79   :  { %5350 = vrcp.f32 %v4961_v57  ;;  %v4974_v12 = vand.u32 2147483648, %v4961_v57  ;;  %v4972_v39 = vand.u32 2147483647, %v4961_v57  ;;  %vm4968_vm15 = vweird.f32 %v4961_v57  ;;  %v4853_v62 = vpop.f32.mrf.mxu2  ;;  %v4890_v4 = vpop.f32.mrf.mxu3 }
 0xe7a   :  { %v4854_v52 = vadd.f32 %v4853_v62, %v4822_v56  ;;  %v5371_v56 = vld [vmem:[%s7212_s1 + $0x400] sm:$0xff] }
 0xe7b   :  { %v4975_v58 = vor.u32 1.1754944e-38, %v4974_v12  ;;  %vm4973_vm1 = vcmp.eq.f32.partialorder %v4972_v39, 8.507059e+37 }
 0xe7c   :  { %v4885_v40 = vadd.f32 %v4884_v41, %v4854_v52 }
 0xe7e   :  { %v5349_v7 = vpop.eup %5348  ;;  %v4921_v20 = vadd.f32 %v4920_v24, %v4885_v40 }
 0xe7f   :  { %v5351_v5 = vpop.eup %5350  ;;  %v4962_v10 = vadd.f32 1.0, %v5349_v7 }
 0xe80   :  { %v4964_v11 = vmul.f32 %v5351_v5, %v4961_v57  ;;  %vm4969_vm14 = vweird.f32 %v5351_v5  ;;  %v4949_v44 = vadd.f32 %v4948_v61, %v4921_v20  ;;  %v5052_v57 = vand.u32 4294901760, %v5031_v55 }
 0xe81   :  { %5352 = vrcp.f32 %v4962_v10  ;;  %vm4970_vm3 = vmor %vm4968_vm15, %vm4969_vm14  ;;  %v4989_v29 = vand.u32 2147483648, %v4962_v10  ;;  %v4987_v42 = vand.u32 2147483647, %v4962_v10  ;;  %vm4983_vm8 = vweird.f32 %v4962_v10  ;;  %v4858_v49 = vpop.f32.mrf.mxu2 }
 0xe82   :  { %v4965_v45 = vsub.f32 1.0, %v4964_v11  ;;  %v4859_v22 = vadd.f32 %v4858_v49, %v4826_v47  ;;  %5170 = vmatpush.msra.mxu1 %v5052_v57  ;;  %5053 = vmatpush.msrb.mxu2 %v5052_v57 }
 0xe83   :  { %v4990_v17 = vor.u32 1.1754944e-38, %v4989_v29  ;;  %vm4988_vm10 = vcmp.eq.f32.partialorder %v4987_v42, 8.507059e+37 }
 0xe84   :  { %v4966_v26 = vmul.f32 %v5351_v5, %v4965_v45  ;;  %v4891_v15 = vadd.f32 %v4890_v4, %v4859_v22 }
 0xe86   :  { %v4967_v51 = vadd.f32 %v5351_v5, %v4966_v26  ;;  %v4925_v0 = vadd.f32 %v4924_v54, %v4891_v15  ;;  %v5030_v26 = vld [vmem:[%s7212_s1 + $0x3b0] sm:$0xff] }
 0xe87   :  { %v5353_v3 = vpop.eup %5352  ;;  %v5054_v39 = vand.u32 4294901760, %v5030_v26  ;;  %v5032_v54 = vld [vmem:[%s7212_s1 + $0x3d0] sm:$0xff] }
 0xe88   :  { %v4971_v13 = vsel %vm4970_vm3, %v5351_v5, %v4967_v51  ;;  %v4979_v25 = vmul.f32 %v5353_v3, %v4962_v10  ;;  %vm4984_vm7 = vweird.f32 %v5353_v3  ;;  %v4953_v33 = vadd.f32 %v4952_v48, %v4925_v0 }
 0xe89   :  { %v4976_v35 = vsel %vm4973_vm1, %v4975_v58, %v4971_v13  ;;  %vm4985_vm9 = vmor %vm4983_vm8, %vm4984_vm7  ;;  %v5090_v5 = vsub.f32 %v5031_v55, %v5052_v57  ;;  %5172 = vmatpush.msra.mxu1 %v5054_v39  ;;  %5055 = vmatpush.msrb.mxu2 %v5054_v39 }
 0xe8a   :  { %4995 = vrot.lane.b32.xlu0 %v4976_v35, %s5375_s3  ;;  %v4980_v6 = vsub.f32 1.0, %v4979_v25 }
 0xe8b   :  { %v5091_v11 = vand.u32 4294901760, %v5090_v5  ;;  %5136 = vmatpush.msra.mxu0 %v5090_v5 }
 0xe8c   :  { %v4981_v46 = vmul.f32 %v5353_v3, %v4980_v6 }
 0xe8d   :  { %v5092_v45 = vsub.f32 %v5090_v5, %v5091_v11 }
 0xe8e   :  { %v4982_v1 = vadd.f32 %v5353_v3, %v4981_v46 }
 0xe8f   :  { %v5093_v12 = vand.u32 4294901760, %v5092_v45 }
 0xe90   :  { %v4986_v14 = vsel %vm4985_vm9, %v5353_v3, %v4982_v1  ;;  %v5028_v3 = vld [vmem:[%s7212_s1 + $0x390] sm:$0xff] }
 0xe91   :  { %v4991_v43 = vsel %vm4988_vm10, %v4990_v17, %v4986_v14  ;;  %5094 = vmatpush.msrb.mxu3 %v5093_v12  ;;  %v5058_v25 = vand.u32 4294901760, %v5028_v3 }
 0xe92   :  { %4997 = vrot.lane.b32.xlu1 %v4991_v43, %s5375_s3 }
 0xe93   :  { %v5108_v29 = vsub.f32 %v5028_v3, %v5058_v25 }
 0xe95   :  { %v5109_v1 = vand.u32 4294901760, %v5108_v29 }
 0xe97   :  { %v5110_v14 = vsub.f32 %v5108_v29, %v5109_v1 }
 0xe99   :  { %v5111_v43 = vand.u32 4294901760, %v5110_v14 }
 0xe9a   :  { %5257 = vrot.lane.b32.xlu1 %v6809_v8, %s5374_s9 }
 0xefc   :  { %v4996_v16 = vpop.permute.xlu0 %4995 }
 0xefd   :  { %v5001_v37 = vmul.f32 %v4996_v16, %v7129_v21 }
 0xeff   :  { %v5003_v53 = vadd.f32 %v5001_v37, %v4949_v44 }
 0xf01   :  { %v5009_v28 = vrot.slane %v5003_v53, 6  ;;  %v5014_v23 = vmul.f32 %v5370_v36, %v5003_v53 }
 0xf04   :  { %v4998_v38 = vpop.permute.xlu1 %4997 }
 0xf05   :  { %v5002_v32 = vmul.f32 %v4998_v38, %v7132_v60 }
 0xf07   :  { %v7147_v19 = vadd.f32 %v5002_v32, %v4953_v33  ;;  %v5033_v32 = vld [vmem:[%s7212_s1 + $0x3e0] sm:$0xff] }
 0xf09   :  { %v5006_v30 = vrot.slane %v7147_v19, 6  ;;  %v5015_v24 = vmul.f32 %v5371_v56, %v7147_v19 }
 0xf0b   :  { %v5013_v7 = vsel %vm4011_vm2, %v5006_v30, %v5009_v28  ;;  %v5010_v21 = vsel %vm4011_vm2, %v5009_v28, %v5006_v30 }
 0xf0c   :  { %v5016_v10 = vmul.f32 %v5013_v7, %v6847_v2  ;;  %v5017_v60 = vmul.f32 %v5010_v21, %v6849_v9  ;;  %v5029_v2 = vld [vmem:[%s7212_s1 + $0x3a0] sm:$0xff]  ;;  %v5096_v9 = vsub.f32 %v5030_v26, %v5054_v39  ;;  %v5258_v20 = vpop.permute.xlu1 %5257 }
 0xf0d   :  { %v5056_v51 = vand.u32 4294901760, %v5029_v2  ;;  %v7184_v37 = vsel %vm3443_vm6, %v6807_v59, %v5258_v20 }
 0xf0e   :  { %5020 = vrot.lane.b32.xlu2 %v5016_v10, %s5373_s28  ;;  %5022 = vrot.lane.b32.xlu0 %v5017_v60, %s5373_s28  ;;  %v5097_v58 = vand.u32 4294901760, %v5096_v9  ;;  %v5291_v48 = vand.u32 2147483647, %v7184_v37 }
 0xf0f   :  { %v5102_v13 = vsub.f32 %v5029_v2, %v5056_v51  ;;  %5139 = vmatpush.msra.mxu0 %v5096_v9  ;;  %5174 = vmatpush.msra.mxu1 %v5056_v51 }
 0xf10   :  { %5057 = vmatpush.msrb.mxu2 %v5056_v51  ;;  %v5098_v35 = vsub.f32 %v5096_v9, %v5097_v58  ;;  %v5293_v55 = vsub.f32 0.0, %v5291_v48 }
 0xf11   :  { %v5103_v6 = vand.u32 4294901760, %v5102_v13  ;;  %5142 = vmatpush.msra.mxu0 %v5102_v13  ;;  %5176 = vmatpush.msra.mxu1 %v5058_v25 }
 0xf12   :  { %5059 = vmatpush.msrb.mxu2 %v5058_v25  ;;  %v5099_v46 = vand.u32 4294901760, %v5098_v35  ;;  %v5295_v7 = vmul.f32 1.442695, %v5293_v55 }
 0xf13   :  { %v5104_v42 = vsub.f32 %v5102_v13, %v5103_v6  ;;  %5145 = vmatpush.msra.mxu0 %v5108_v29 }
 0xf14   :  { %5205 = vmatpush.msra.mxu2 %v5091_v11  ;;  %5100 = vmatpush.msrb.mxu3 %v5099_v46  ;;  %5354 = vpow2.f32 %v5295_v7 }
 0xf15   :  { %v5105_v17 = vand.u32 4294901760, %v5104_v42 }
 0xf16   :  { %5262 = vrot.lane.b32.xlu2 %v6807_v59, %s5377_s18  ;;  %5209 = vmatpush.msra.mxu2 %v5097_v58 }
 0xf17   :  { %5106 = vmatpush.msrb.mxu3 %v5105_v17 }
 0xf18   :  { %5213 = vmatpush.msra.mxu2 %v5103_v6 }
 0xf19   :  { %5112 = vmatpush.msrb.mxu3 %v5111_v43 }
 0xf1a   :  { %5217 = vmatpush.msra.mxu2 %v5109_v1  ;;  %v5355_v58 = vpop.eup %5354 }
 0xf1b   :  { %5240 = vmatpush.msra.mxu3 %v5052_v57  ;;  %v5299_v46 = vadd.f32 1.0, %v5355_v58 }
 0xf1d   :  { %5242 = vmatpush.msra.mxu3 %v5054_v39 }
 0xf1f   :  { %5244 = vmatpush.msra.mxu3 %v5056_v51 }
 0xf21   :  { %5246 = vmatpush.msra.mxu3 %v5058_v25 }
 0xf68   :  { %v5021_v50 = vpop.permute.xlu2 %5020 }
 0xf69   :  { %v5026_v62 = vadd.f32 %v5021_v50, %v5014_v23 }
 0xf6b   :  { %v5035_v27 = vsel %vm24_vm0, %v5026_v62, 0 }
 0xf6c   :  { %v5060_v63 = vand.u32 4294901760, %v5035_v27 }
 0xf6e   :  { %v5061_v34 = vsub.f32 %v5035_v27, %v5060_v63  ;;  %5114 = vmatmul.f32.vlgmr.msrb.gmra.mxu3 %v5060_v63 }
 0xf70   :  { %v5062_v31 = vand.u32 4294901760, %v5061_v34  ;;  %5148 = vmatmul.f32.vlgmr.msra.gmra.mxu0 %v5061_v34  ;;  %v5263_v53 = vpop.permute.xlu2 %5262 }
 0xf71   :  { %v7192_v28 = vsel %vm3443_vm6, %v5263_v53, %v6809_v8 }
 0xf72   :  { %v5063_v41 = vsub.f32 %v5061_v34, %v5062_v31  ;;  %5180 = vmatmul.f32.vlgmr.msra.gmra.mxu1 %v5062_v31  ;;  %v5292_v21 = vand.u32 2147483647, %v7192_v28  ;;  %v5290_v20 = vmax.f32 %v7192_v28, 0.0 }
 0xf74   :  { %v5064_v18 = vand.u32 4294901760, %v5063_v41  ;;  %v5294_v12 = vsub.f32 0.0, %v5292_v21 }
 0xf76   :  { %5065 = vmatmul.f32.vlgmr.msrb.gmra.mxu2 %v5064_v18  ;;  %v5297_v51 = vmul.f32 1.442695, %v5294_v12  ;;  %v5289_v18 = vmax.f32 %v7184_v37, 0.0 }
 0xf78   :  { %5356 = vpow2.f32 %v5297_v51 }
 0xf7e   :  { %v5357_v14 = vpop.eup %5356 }
 0xf7f   :  { %v5300_v50 = vadd.f32 1.0, %v5357_v14 }
 0xf80   :  { %v5023_v49 = vpop.permute.xlu0 %5022 }
 0xf81   :  { %v5027_v47 = vadd.f32 %v5023_v49, %v5015_v24 }
 0xf83   :  { %v5038_v52 = vsel %vm24_vm0, %v5027_v47, 0 }
 0xf84   :  { %v5068_v22 = vand.u32 4294901760, %v5038_v52 }
 0xf86   :  { %v5069_v61 = vsub.f32 %v5038_v52, %v5068_v22  ;;  %5118 = vmatmul.f32.gmra.mxu3 %v5068_v22 }
 0xf88   :  { %5153 = vmatmul.f32.gmra.mxu0 %v5069_v61  ;;  %v5070_v40 = vand.u32 4294901760, %v5069_v61 }
 0xf8a   :  { %5186 = vmatmul.f32.gmra.mxu1 %v5070_v40  ;;  %v5071_v4 = vsub.f32 %v5069_v61, %v5070_v40 }
 0xf8c   :  { %v5072_v15 = vand.u32 4294901760, %v5071_v4 }
 0xf8e   :  { %5073 = vmatmul.f32.gmra.mxu2 %v5072_v15  ;;  %5248 = vmatmul.f32.vlgmr.msra.gmra.mxu3 %v5060_v63 }
 0xf96   :  { %5219 = vmatmul.f32.vlgmr.msra.gmra.mxu2 %v5060_v63  ;;  %5252 = vmatmul.f32.gmra.mxu3 %v5068_v22  ;;  %v5266_v63 = vlaneseq }
 0xf98   :  { %v5267_v31 = vand.u32 127, %v5266_v63 }
 0xf9a   :  { %vm5268_vm6 = vcmp.lt.s32.totalorder %v5267_v31, 16 }
 0xf9e   :  { %5223 = vmatmul.f32.gmra.mxu2 %v5068_v22 }
 0xfed   :  { %v5149_v30 = vpop.f32.mrf.mxu0 }
 0xfef   :  { %v5181_v5 = vpop.f32.mrf.mxu1 }
 0xff1   :  { %v5115_v16 = vpop.f32.mrf.mxu3 }
 0xff9   :  { %v5066_v0 = vpop.f32.mrf.mxu2 }
 0xffa   :  { %v5067_v44 = vadd.f32 %v5066_v0, %v5032_v54 }
 0xffc   :  { %v5116_v33 = vadd.f32 %v5115_v16, %v5067_v44 }
 0xffe   :  { %v5150_v59 = vadd.f32 %v5149_v30, %v5116_v33 }
0x1000   :  { %v5182_v60 = vadd.f32 %v5181_v5, %v5150_v59 }
0x1005   :  { %v5154_v39 = vpop.f32.mrf.mxu0 }
0x1007   :  { %v5187_v3 = vpop.f32.mrf.mxu1 }
0x1009   :  { %v5119_v38 = vpop.f32.mrf.mxu3 }
0x1011   :  { %v5074_v19 = vpop.f32.mrf.mxu2  ;;  %v5249_v11 = vpop.f32.mrf.mxu3 }
0x1012   :  { %v5075_v57 = vadd.f32 %v5074_v19, %v5033_v32 }
0x1014   :  { %v5120_v10 = vadd.f32 %v5119_v38, %v5075_v57 }
0x1016   :  { %v5155_v9 = vadd.f32 %v5154_v39, %v5120_v10 }
0x1018   :  { %v5188_v25 = vadd.f32 %v5187_v3, %v5155_v9 }
0x1019   :  { %v5220_v45 = vpop.f32.mrf.mxu2  ;;  %v5253_v42 = vpop.f32.mrf.mxu3 }
0x101a   :  { %v5221_v26 = vadd.f32 %v5220_v45, %v5182_v60 }
0x101c   :  { %v5250_v2 = vadd.f32 %v5249_v11, %v5221_v26 }
0x101e   :  { %v5271_v8 = vand.u32 2147483647, %v5250_v2  ;;  %v5269_v47 = vmax.f32 %v5250_v2, 0.0 }
0x1020   :  { %v5273_v13 = vsub.f32 0.0, %v5271_v8 }
0x1021   :  { %v5224_v35 = vpop.f32.mrf.mxu2 }
0x1022   :  { %v5275_v6 = vmul.f32 1.442695, %v5273_v13  ;;  %v5225_v29 = vadd.f32 %v5224_v35, %v5188_v25 }
0x1024   :  { %5358 = vpow2.f32 %v5275_v6  ;;  %v5254_v1 = vadd.f32 %v5253_v42, %v5225_v29 }
0x1025   :  { %5360 = vlog2.f32 %v5299_v46 }
0x1026   :  { %v5272_v17 = vand.u32 2147483647, %v5254_v1  ;;  %v5270_v44 = vmax.f32 %v5254_v1, 0.0 }
0x1028   :  { %v5274_v43 = vsub.f32 0.0, %v5272_v17 }
0x102a   :  { %v5359_v36 = vpop.eup %5358  ;;  %v5277_v23 = vmul.f32 1.442695, %v5274_v43 }
0x102b   :  { %v5279_v62 = vadd.f32 1.0, %v5359_v36  ;;  %v5361_v27 = vpop.eup %5360 }
0x102c   :  { %5362 = vpow2.f32 %v5277_v23  ;;  %v5302_v34 = vmul.f32 0.6931472, %v5361_v27 }
0x102d   :  { %5364 = vlog2.f32 %v5279_v62 }
0x102e   :  { %5366 = vlog2.f32 %v5300_v50  ;;  %v5305_v49 = vadd.f32 %v5302_v34, %v5289_v18 }
0x1030   :  { %v5307_v40 = vsel %vm5268_vm6, %v7184_v37, %v5305_v49 }
0x1032   :  { %v5363_v41 = vpop.eup %5362 }
0x1033   :  { %v5365_v56 = vpop.eup %5364  ;;  %v5280_v24 = vadd.f32 1.0, %v5363_v41 }
0x1034   :  { %v5282_v52 = vmul.f32 0.6931472, %v5365_v56  ;;  %v5367_v22 = vpop.eup %5366 }
0x1035   :  { %5368 = vlog2.f32 %v5280_v24  ;;  %v5304_v4 = vmul.f32 0.6931472, %v5367_v22 }
0x1036   :  { %v5285_v61 = vadd.f32 %v5282_v52, %v5269_v47 }
0x1037   :  { %v5306_v0 = vadd.f32 %v5304_v4, %v5290_v20 }
0x1038   :  { %v5287_v15 = vsel %vm5268_vm6, %v5250_v2, %v5285_v61 }
0x1039   :  { %v5309_v16 = vmul.f32 %v5307_v40, %v5287_v15  ;;  %v5308_v53 = vsel %vm5268_vm6, %v7192_v28, %v5306_v0 }
0x103b   :  { %v5369_v54 = vpop.eup %5368  ;;  %5311 = vst.msk [vmem:[%s7213_s2] sm:$0xff] %vm24_vm0, %v5309_v16 }
0x103c   :  { %v5284_v48 = vmul.f32 0.6931472, %v5369_v54 }
0x103e   :  { %v5286_v38 = vadd.f32 %v5284_v48, %v5270_v44 }
0x1040   :  { %v5288_v37 = vsel %vm5268_vm6, %v5254_v1, %v5286_v38 }
0x1041   :  { %v5310_v33 = vmul.f32 %v5308_v53, %v5288_v37 }
0x1043   :  { %5312 = vst.msk [vmem:[%s7213_s2 + $0x8] sm:$0xff] %vm24_vm0, %v5310_v33 }

</bundles_post_ra>
